<compile_context>
chip_gen: v7x
topology: tpu7x:2x2x1
jax: 0.10.0
libtpu: 0.0.40
codegen_flags: <defaults>
</compile_context>

<pallas_src>
import functools

import jax
import jax.numpy as jnp
import numpy as np
from jax import lax
from jax.experimental import pallas as pl
from jax.experimental.pallas import tpu as pltpu


def _basic_block_kernel(mask_ref, x_ref, w1_ref, b1_ref, w2_ref, b2_ref,
                        out_ref, buf_ref, patch_ref, *, D, H, W):
    # mask_ref  : (27, S)       f32 {0,1}; 0 where a tap crosses a D/H/W edge
    # x_ref     : (C, S)        one batch element, channels-first, spatial flat
    # w1/w2_ref : (C, 27*C)     im2col weight matrices (BN scale folded in)
    # b1/b2_ref : (C, 1)        folded BatchNorm biases
    # out_ref   : (C, S)
    # buf_ref   : (C, S + 2*P)  VMEM staging buffer (feature map + halo room)
    # patch_ref : (27*C, S)     VMEM im2col patch
    C, S = x_ref.shape
    HW = H * W
    P = HW + W + 1  # largest |flat offset| of a 3x3x3 tap
    offsets = [(kd - 1) * HW + (kh - 1) * W + (kw - 1)
               for kd in range(3) for kh in range(3) for kw in range(3)]

    def im2col():
        # buf_ref[:, P:P+S] holds the current (C, S) feature map.  The halo
        # regions are never zero-filled: out-of-range / wrapped taps are
        # discarded by the boundary mask (jnp.where), so stale halo contents
        # (even NaNs) never enter the arithmetic.
        for t, off in enumerate(offsets):
            piece = buf_ref[:, P + off:P + off + S]
            m = mask_ref[t:t + 1, :]
            patch_ref[t * C:(t + 1) * C, :] = jnp.where(m > 0.0, piece, 0.0)

    # ---- conv1 (BN1 scale folded into w1) + bias + ReLU ----
    buf_ref[:, P:P + S] = x_ref[...]
    im2col()
    y = jnp.dot(w1_ref[...], patch_ref[...], preferred_element_type=jnp.float32)
    y = jnp.maximum(y + b1_ref[...], 0.0)

    # ---- conv2 (BN2 scale folded into w2) + bias + residual + ReLU ----
    buf_ref[:, P:P + S] = y
    im2col()
    y = jnp.dot(w2_ref[...], patch_ref[...], preferred_element_type=jnp.float32)
    y = y + b2_ref[...] + x_ref[...]          # residual = original input
    out_ref[...] = jnp.maximum(y, 0.0).astype(out_ref.dtype)


def _fold_bn(gamma, beta, mean, var, eps):
    scale = gamma / jnp.sqrt(var + eps)
    bias = beta - mean * scale
    return scale.astype(jnp.float32), bias.astype(jnp.float32)


def _im2col_weight(w_oidhw, scale):
    # OIDHW -> (C_out, 27*C_in), column order (kd, kh, kw, c_in), with the
    # folded BN scale applied per output channel (one-time weight transform).
    c_out, c_in = w_oidhw.shape[0], w_oidhw.shape[1]
    wmat = jnp.transpose(w_oidhw, (0, 2, 3, 4, 1)).reshape(c_out, 27 * c_in)
    return (wmat * scale[:, None]).astype(jnp.float32)


def _tap_masks(D, H, W):
    # mask[t, s] = 1 iff tap t=(kd,kh,kw) applied at flat position s stays
    # inside the D/H/W volume (i.e. the flat shift did not wrap a row/plane).
    dd, hh, ww = np.meshgrid(np.arange(D), np.arange(H), np.arange(W),
                             indexing="ij")
    masks = []
    for kd in range(3):
        for kh in range(3):
            for kw in range(3):
                ok = ((dd + kd - 1 >= 0) & (dd + kd - 1 < D) &
                      (hh + kh - 1 >= 0) & (hh + kh - 1 < H) &
                      (ww + kw - 1 >= 0) & (ww + kw - 1 < W))
                masks.append(ok.reshape(-1))
    return jnp.asarray(np.stack(masks), dtype=jnp.float32)


def basic_block_threed(x_ncdhw, w1_oidhw, bn1, w2_oidhw, bn2, eps=1e-5):
    """Fused BasicBlock_threed forward. x_ncdhw: (N, C, D, H, W) float32."""
    N, C, D, H, W = x_ncdhw.shape
    S = D * H * W
    P = H * W + W + 1

    s1, b1 = _fold_bn(*bn1, eps)
    s2, b2 = _fold_bn(*bn2, eps)
    w1m = _im2col_weight(w1_oidhw, s1)
    w2m = _im2col_weight(w2_oidhw, s2)
    b1 = b1.reshape(C, 1)
    b2 = b2.reshape(C, 1)
    masks = _tap_masks(D, H, W)

    x_flat = x_ncdhw.reshape(N, C, S)   # pure reshape: no transpose, no host pad

    grid_spec = pltpu.PrefetchScalarGridSpec(
        num_scalar_prefetch=0,
        grid=(N,),
        in_specs=[
            pl.BlockSpec((27, S), lambda n: (0, 0)),          # tap masks (grid-invariant)
            pl.BlockSpec((None, C, S), lambda n: (n, 0, 0)),  # x
            pl.BlockSpec((C, 27 * C), lambda n: (0, 0)),      # w1 (grid-invariant)
            pl.BlockSpec((C, 1), lambda n: (0, 0)),           # b1
            pl.BlockSpec((C, 27 * C), lambda n: (0, 0)),      # w2 (grid-invariant)
            pl.BlockSpec((C, 1), lambda n: (0, 0)),           # b2
        ],
        out_specs=pl.BlockSpec((None, C, S), lambda n: (n, 0, 0)),
        scratch_shapes=[
            pltpu.VMEM((C, S + 2 * P), jnp.float32),   # staging buffer w/ halo room
            pltpu.VMEM((27 * C, S), jnp.float32),      # im2col patch
        ],
    )

    out = pl.pallas_call(
        functools.partial(_basic_block_kernel, D=D, H=H, W=W),
        out_shape=jax.ShapeDtypeStruct((N, C, S), jnp.float32),
        grid_spec=grid_spec,
        compiler_params=pltpu.CompilerParams(
            dimension_semantics=("parallel",)),   # batch iterations independent
    )(masks, x_flat, w1m, b1, w2m, b2)

    return out.reshape(N, C, D, H, W)


def _ref_block(x, w1, bn1, w2, bn2, eps=1e-5):
    """Pure-JAX reference in the PyTorch NCDHW / OIDHW layout."""
    s1, b1 = _fold_bn(*bn1, eps)
    s2, b2 = _fold_bn(*bn2, eps)
    dn = lax.conv_dimension_numbers(x.shape, w1.shape, ("NCDHW", "OIDHW", "NCDHW"))
    y = lax.conv_general_dilated(x, w1, (1, 1, 1), "SAME", dimension_numbers=dn)
    y = jnp.maximum(y * s1[None, :, None, None, None]
                    + b1[None, :, None, None, None], 0.0)
    y = lax.conv_general_dilated(y, w2, (1, 1, 1), "SAME", dimension_numbers=dn)
    y = y * s2[None, :, None, None, None] + b2[None, :, None, None, None]
    return jnp.maximum(y + x, 0.0)


if __name__ == "__main__":
    # PyTorch-side shapes: x is NCDHW = (N, C, D, H, W); inplanes == planes == C
    N, C, D, H, W = 2, 8, 4, 8, 8
    key = jax.random.PRNGKey(0)
    ks = jax.random.split(key, 11)

    x = jax.random.normal(ks[0], (N, C, D, H, W), jnp.float32)

    # conv weights in PyTorch OIDHW layout (planes, inplanes, 3, 3, 3)
    w1 = jax.random.normal(ks[1], (C, C, 3, 3, 3), jnp.float32) * 0.1
    w2 = jax.random.normal(ks[2], (C, C, 3, 3, 3), jnp.float32) * 0.1

    # BatchNorm3d params (gamma, beta, running_mean, running_var)
    bn1 = (jax.random.uniform(ks[3], (C,), jnp.float32, 0.5, 1.5),
           jax.random.normal(ks[4], (C,), jnp.float32) * 0.1,
           jax.random.normal(ks[5], (C,), jnp.float32) * 0.1,
           jax.random.uniform(ks[6], (C,), jnp.float32, 0.5, 1.5))
    bn2 = (jax.random.uniform(ks[7], (C,), jnp.float32, 0.5, 1.5),
           jax.random.normal(ks[8], (C,), jnp.float32) * 0.1,
           jax.random.normal(ks[9], (C,), jnp.float32) * 0.1,
           jax.random.uniform(ks[10], (C,), jnp.float32, 0.5, 1.5))

    out = jax.block_until_ready(basic_block_threed(x, w1, bn1, w2, bn2))
    ref = _ref_block(x, w1, bn1, w2, bn2)

    err = float(jnp.max(jnp.abs(out - ref)))
    assert err < 1e-2, f"max abs err {err}"
    print("KERNEL_OK")
</pallas_src>

<mosaic_0001>
module attributes {stable_mosaic.version = 11 : i64} {
  func.func @_basic_block_kernel(%arg0: i32, %arg1: memref<27x256xf32, #tpu.memory_space<vmem>>, %arg2: memref<1x8x256xf32, #tpu.memory_space<vmem>>, %arg3: memref<8x216xf32, #tpu.memory_space<vmem>>, %arg4: memref<8x1xf32, #tpu.memory_space<vmem>>, %arg5: memref<8x216xf32, #tpu.memory_space<vmem>>, %arg6: memref<8x1xf32, #tpu.memory_space<vmem>>, %arg7: memref<1x8x256xf32, #tpu.memory_space<vmem>>, %arg8: memref<8x402xf32, #tpu.memory_space<vmem>>, %arg9: memref<216x256xf32, #tpu.memory_space<vmem>>) attributes {dimension_semantics = [#tpu.dimension_semantics<parallel>], iteration_bounds = array<i64: 2>, scalar_prefetch = 0 : i64, scratch_operands = 2 : i64, tpu.core_type = #tpu.core_type<tc>, window_params = [{pipeline_mode = #tpu.pipeline_mode<synchronous>, transform_indices = @transform_0, window_bounds = array<i64: 27, 256>}, {transform_indices = @transform_1, window_bounds = array<i64: 1, 8, 256>}, {pipeline_mode = #tpu.pipeline_mode<synchronous>, transform_indices = @transform_2, window_bounds = array<i64: 8, 216>}, {pipeline_mode = #tpu.pipeline_mode<synchronous>, transform_indices = @transform_3, window_bounds = array<i64: 8, 1>}, {pipeline_mode = #tpu.pipeline_mode<synchronous>, transform_indices = @transform_4, window_bounds = array<i64: 8, 216>}, {pipeline_mode = #tpu.pipeline_mode<synchronous>, transform_indices = @transform_5, window_bounds = array<i64: 8, 1>}, {transform_indices = @transform_6, window_bounds = array<i64: 1, 8, 256>}]} {
    %c0 = arith.constant 0 : index
    %c0_0 = arith.constant 0 : index
    %c0_1 = arith.constant 0 : index
    %0 = vector.load %arg2[%c0, %c0_0, %c0_1] : memref<1x8x256xf32, #tpu.memory_space<vmem>>, vector<1x8x256xf32>
    %1 = vector.shape_cast %0 : vector<1x8x256xf32> to vector<8x256xf32>
    %c0_2 = arith.constant 0 : index
    %c73 = arith.constant 73 : index
    %2 = vector.load %arg8[%c0_2, %c73] : memref<8x402xf32, #tpu.memory_space<vmem>>, vector<8x256xf32>
    tpu.vector_store %arg8[%c0_2, %c73], %1 {strides = array<i32>} : memref<8x402xf32, #tpu.memory_space<vmem>>, vector<8x256xf32>,
    %c0_3 = arith.constant 0 : index
    %c0_4 = arith.constant 0 : index
    %3 = vector.load %arg8[%c0_3, %c0_4] : memref<8x402xf32, #tpu.memory_space<vmem>>, vector<8x256xf32>
    %c0_5 = arith.constant 0 : index
    %c0_6 = arith.constant 0 : index
    %4 = vector.load %arg1[%c0_5, %c0_6] : memref<27x256xf32, #tpu.memory_space<vmem>>, vector<1x256xf32>
    %cst = arith.constant 0.000000e+00 : f32
    %5 = vector.broadcast %cst : f32 to vector<1x256xf32>
    %6 = arith.cmpf ogt, %4, %5 : vector<1x256xf32>
    %cst_7 = arith.constant 0.000000e+00 : f32
    %7 = vector.shape_cast %6 : vector<1x256xi1> to vector<1x256xi1>
    %8 = vector.broadcast %7 : vector<1x256xi1> to vector<8x256xi1>
    %9 = vector.broadcast %cst_7 : f32 to vector<8x256xf32>
    %10 = arith.select %8, %3, %9 : vector<8x256xi1>, vector<8x256xf32>
    %c0_8 = arith.constant 0 : index
    %c0_9 = arith.constant 0 : index
    %11 = vector.load %arg9[%c0_8, %c0_9] : memref<216x256xf32, #tpu.memory_space<vmem>>, vector<8x256xf32>
    tpu.vector_store %arg9[%c0_8, %c0_9], %10 {strides = array<i32>} : memref<216x256xf32, #tpu.memory_space<vmem>>, vector<8x256xf32>,
    %c0_10 = arith.constant 0 : index
    %c1 = arith.constant 1 : index
    %12 = vector.load %arg8[%c0_10, %c1] : memref<8x402xf32, #tpu.memory_space<vmem>>, vector<8x256xf32>
    %c1_11 = arith.constant 1 : index
    %c0_12 = arith.constant 0 : index
    %13 = vector.load %arg1[%c1_11, %c0_12] : memref<27x256xf32, #tpu.memory_space<vmem>>, vector<1x256xf32>
    %cst_13 = arith.constant 0.000000e+00 : f32
    %14 = vector.broadcast %cst_13 : f32 to vector<1x256xf32>
    %15 = arith.cmpf ogt, %13, %14 : vector<1x256xf32>
    %cst_14 = arith.constant 0.000000e+00 : f32
    %16 = vector.shape_cast %15 : vector<1x256xi1> to vector<1x256xi1>
    %17 = vector.broadcast %16 : vector<1x256xi1> to vector<8x256xi1>
    %18 = vector.broadcast %cst_14 : f32 to vector<8x256xf32>
    %19 = arith.select %17, %12, %18 : vector<8x256xi1>, vector<8x256xf32>
    %c8 = arith.constant 8 : index
    %c0_15 = arith.constant 0 : index
    %20 = vector.load %arg9[%c8, %c0_15] : memref<216x256xf32, #tpu.memory_space<vmem>>, vector<8x256xf32>
    tpu.vector_store %arg9[%c8, %c0_15], %19 {strides = array<i32>} : memref<216x256xf32, #tpu.memory_space<vmem>>, vector<8x256xf32>,
    %c0_16 = arith.constant 0 : index
    %c2 = arith.constant 2 : index
    %21 = vector.load %arg8[%c0_16, %c2] : memref<8x402xf32, #tpu.memory_space<vmem>>, vector<8x256xf32>
    %c2_17 = arith.constant 2 : index
    %c0_18 = arith.constant 0 : index
    %22 = vector.load %arg1[%c2_17, %c0_18] : memref<27x256xf32, #tpu.memory_space<vmem>>, vector<1x256xf32>
    %cst_19 = arith.constant 0.000000e+00 : f32
    %23 = vector.broadcast %cst_19 : f32 to vector<1x256xf32>
    %24 = arith.cmpf ogt, %22, %23 : vector<1x256xf32>
    %cst_20 = arith.constant 0.000000e+00 : f32
    %25 = vector.shape_cast %24 : vector<1x256xi1> to vector<1x256xi1>
    %26 = vector.broadcast %25 : vector<1x256xi1> to vector<8x256xi1>
    %27 = vector.broadcast %cst_20 : f32 to vector<8x256xf32>
    %28 = arith.select %26, %21, %27 : vector<8x256xi1>, vector<8x256xf32>
    %c16 = arith.constant 16 : index
    %c0_21 = arith.constant 0 : index
    %29 = vector.load %arg9[%c16, %c0_21] : memref<216x256xf32, #tpu.memory_space<vmem>>, vector<8x256xf32>
    tpu.vector_store %arg9[%c16, %c0_21], %28 {strides = array<i32>} : memref<216x256xf32, #tpu.memory_space<vmem>>, vector<8x256xf32>,
    %c0_22 = arith.constant 0 : index
    %c8_23 = arith.constant 8 : index
    %30 = vector.load %arg8[%c0_22, %c8_23] : memref<8x402xf32, #tpu.memory_space<vmem>>, vector<8x256xf32>
    %c3 = arith.constant 3 : index
    %c0_24 = arith.constant 0 : index
    %31 = vector.load %arg1[%c3, %c0_24] : memref<27x256xf32, #tpu.memory_space<vmem>>, vector<1x256xf32>
    %cst_25 = arith.constant 0.000000e+00 : f32
    %32 = vector.broadcast %cst_25 : f32 to vector<1x256xf32>
    %33 = arith.cmpf ogt, %31, %32 : vector<1x256xf32>
    %cst_26 = arith.constant 0.000000e+00 : f32
    %34 = vector.shape_cast %33 : vector<1x256xi1> to vector<1x256xi1>
    %35 = vector.broadcast %34 : vector<1x256xi1> to vector<8x256xi1>
    %36 = vector.broadcast %cst_26 : f32 to vector<8x256xf32>
    %37 = arith.select %35, %30, %36 : vector<8x256xi1>, vector<8x256xf32>
    %c24 = arith.constant 24 : index
    %c0_27 = arith.constant 0 : index
    %38 = vector.load %arg9[%c24, %c0_27] : memref<216x256xf32, #tpu.memory_space<vmem>>, vector<8x256xf32>
    tpu.vector_store %arg9[%c24, %c0_27], %37 {strides = array<i32>} : memref<216x256xf32, #tpu.memory_space<vmem>>, vector<8x256xf32>,
    %c0_28 = arith.constant 0 : index
    %c9 = arith.constant 9 : index
    %39 = vector.load %arg8[%c0_28, %c9] : memref<8x402xf32, #tpu.memory_space<vmem>>, vector<8x256xf32>
    %c4 = arith.constant 4 : index
    %c0_29 = arith.constant 0 : index
    %40 = vector.load %arg1[%c4, %c0_29] : memref<27x256xf32, #tpu.memory_space<vmem>>, vector<1x256xf32>
    %cst_30 = arith.constant 0.000000e+00 : f32
    %41 = vector.broadcast %cst_30 : f32 to vector<1x256xf32>
    %42 = arith.cmpf ogt, %40, %41 : vector<1x256xf32>
    %cst_31 = arith.constant 0.000000e+00 : f32
    %43 = vector.shape_cast %42 : vector<1x256xi1> to vector<1x256xi1>
    %44 = vector.broadcast %43 : vector<1x256xi1> to vector<8x256xi1>
    %45 = vector.broadcast %cst_31 : f32 to vector<8x256xf32>
    %46 = arith.select %44, %39, %45 : vector<8x256xi1>, vector<8x256xf32>
    %c32 = arith.constant 32 : index
    %c0_32 = arith.constant 0 : index
    %47 = vector.load %arg9[%c32, %c0_32] : memref<216x256xf32, #tpu.memory_space<vmem>>, vector<8x256xf32>
    tpu.vector_store %arg9[%c32, %c0_32], %46 {strides = array<i32>} : memref<216x256xf32, #tpu.memory_space<vmem>>, vector<8x256xf32>,
    %c0_33 = arith.constant 0 : index
    %c10 = arith.constant 10 : index
    %48 = vector.load %arg8[%c0_33, %c10] : memref<8x402xf32, #tpu.memory_space<vmem>>, vector<8x256xf32>
    %c5 = arith.constant 5 : index
    %c0_34 = arith.constant 0 : index
    %49 = vector.load %arg1[%c5, %c0_34] : memref<27x256xf32, #tpu.memory_space<vmem>>, vector<1x256xf32>
    %cst_35 = arith.constant 0.000000e+00 : f32
    %50 = vector.broadcast %cst_35 : f32 to vector<1x256xf32>
    %51 = arith.cmpf ogt, %49, %50 : vector<1x256xf32>
    %cst_36 = arith.constant 0.000000e+00 : f32
    %52 = vector.shape_cast %51 : vector<1x256xi1> to vector<1x256xi1>
    %53 = vector.broadcast %52 : vector<1x256xi1> to vector<8x256xi1>
    %54 = vector.broadcast %cst_36 : f32 to vector<8x256xf32>
    %55 = arith.select %53, %48, %54 : vector<8x256xi1>, vector<8x256xf32>
    %c40 = arith.constant 40 : index
    %c0_37 = arith.constant 0 : index
    %56 = vector.load %arg9[%c40, %c0_37] : memref<216x256xf32, #tpu.memory_space<vmem>>, vector<8x256xf32>
    tpu.vector_store %arg9[%c40, %c0_37], %55 {strides = array<i32>} : memref<216x256xf32, #tpu.memory_space<vmem>>, vector<8x256xf32>,
    %c0_38 = arith.constant 0 : index
    %c16_39 = arith.constant 16 : index
    %57 = vector.load %arg8[%c0_38, %c16_39] : memref<8x402xf32, #tpu.memory_space<vmem>>, vector<8x256xf32>
    %c6 = arith.constant 6 : index
    %c0_40 = arith.constant 0 : index
    %58 = vector.load %arg1[%c6, %c0_40] : memref<27x256xf32, #tpu.memory_space<vmem>>, vector<1x256xf32>
    %cst_41 = arith.constant 0.000000e+00 : f32
    %59 = vector.broadcast %cst_41 : f32 to vector<1x256xf32>
    %60 = arith.cmpf ogt, %58, %59 : vector<1x256xf32>
    %cst_42 = arith.constant 0.000000e+00 : f32
    %61 = vector.shape_cast %60 : vector<1x256xi1> to vector<1x256xi1>
    %62 = vector.broadcast %61 : vector<1x256xi1> to vector<8x256xi1>
    %63 = vector.broadcast %cst_42 : f32 to vector<8x256xf32>
    %64 = arith.select %62, %57, %63 : vector<8x256xi1>, vector<8x256xf32>
    %c48 = arith.constant 48 : index
    %c0_43 = arith.constant 0 : index
    %65 = vector.load %arg9[%c48, %c0_43] : memref<216x256xf32, #tpu.memory_space<vmem>>, vector<8x256xf32>
    tpu.vector_store %arg9[%c48, %c0_43], %64 {strides = array<i32>} : memref<216x256xf32, #tpu.memory_space<vmem>>, vector<8x256xf32>,
    %c0_44 = arith.constant 0 : index
    %c17 = arith.constant 17 : index
    %66 = vector.load %arg8[%c0_44, %c17] : memref<8x402xf32, #tpu.memory_space<vmem>>, vector<8x256xf32>
    %c7 = arith.constant 7 : index
    %c0_45 = arith.constant 0 : index
    %67 = vector.load %arg1[%c7, %c0_45] : memref<27x256xf32, #tpu.memory_space<vmem>>, vector<1x256xf32>
    %cst_46 = arith.constant 0.000000e+00 : f32
    %68 = vector.broadcast %cst_46 : f32 to vector<1x256xf32>
    %69 = arith.cmpf ogt, %67, %68 : vector<1x256xf32>
    %cst_47 = arith.constant 0.000000e+00 : f32
    %70 = vector.shape_cast %69 : vector<1x256xi1> to vector<1x256xi1>
    %71 = vector.broadcast %70 : vector<1x256xi1> to vector<8x256xi1>
    %72 = vector.broadcast %cst_47 : f32 to vector<8x256xf32>
    %73 = arith.select %71, %66, %72 : vector<8x256xi1>, vector<8x256xf32>
    %c56 = arith.constant 56 : index
    %c0_48 = arith.constant 0 : index
    %74 = vector.load %arg9[%c56, %c0_48] : memref<216x256xf32, #tpu.memory_space<vmem>>, vector<8x256xf32>
    tpu.vector_store %arg9[%c56, %c0_48], %73 {strides = array<i32>} : memref<216x256xf32, #tpu.memory_space<vmem>>, vector<8x256xf32>,
    %c0_49 = arith.constant 0 : index
    %c18 = arith.constant 18 : index
    %75 = vector.load %arg8[%c0_49, %c18] : memref<8x402xf32, #tpu.memory_space<vmem>>, vector<8x256xf32>
    %c8_50 = arith.constant 8 : index
    %c0_51 = arith.constant 0 : index
    %76 = vector.load %arg1[%c8_50, %c0_51] : memref<27x256xf32, #tpu.memory_space<vmem>>, vector<1x256xf32>
    %cst_52 = arith.constant 0.000000e+00 : f32
    %77 = vector.broadcast %cst_52 : f32 to vector<1x256xf32>
    %78 = arith.cmpf ogt, %76, %77 : vector<1x256xf32>
    %cst_53 = arith.constant 0.000000e+00 : f32
    %79 = vector.shape_cast %78 : vector<1x256xi1> to vector<1x256xi1>
    %80 = vector.broadcast %79 : vector<1x256xi1> to vector<8x256xi1>
    %81 = vector.broadcast %cst_53 : f32 to vector<8x256xf32>
    %82 = arith.select %80, %75, %81 : vector<8x256xi1>, vector<8x256xf32>
    %c64 = arith.constant 64 : index
    %c0_54 = arith.constant 0 : index
    %83 = vector.load %arg9[%c64, %c0_54] : memref<216x256xf32, #tpu.memory_space<vmem>>, vector<8x256xf32>
    tpu.vector_store %arg9[%c64, %c0_54], %82 {strides = array<i32>} : memref<216x256xf32, #tpu.memory_space<vmem>>, vector<8x256xf32>,
    %c0_55 = arith.constant 0 : index
    %c64_56 = arith.constant 64 : index
    %84 = vector.load %arg8[%c0_55, %c64_56] : memref<8x402xf32, #tpu.memory_space<vmem>>, vector<8x256xf32>
    %c9_57 = arith.constant 9 : index
    %c0_58 = arith.constant 0 : index
    %85 = vector.load %arg1[%c9_57, %c0_58] : memref<27x256xf32, #tpu.memory_space<vmem>>, vector<1x256xf32>
    %cst_59 = arith.constant 0.000000e+00 : f32
    %86 = vector.broadcast %cst_59 : f32 to vector<1x256xf32>
    %87 = arith.cmpf ogt, %85, %86 : vector<1x256xf32>
    %cst_60 = arith.constant 0.000000e+00 : f32
    %88 = vector.shape_cast %87 : vector<1x256xi1> to vector<1x256xi1>
    %89 = vector.broadcast %88 : vector<1x256xi1> to vector<8x256xi1>
    %90 = vector.broadcast %cst_60 : f32 to vector<8x256xf32>
    %91 = arith.select %89, %84, %90 : vector<8x256xi1>, vector<8x256xf32>
    %c72 = arith.constant 72 : index
    %c0_61 = arith.constant 0 : index
    %92 = vector.load %arg9[%c72, %c0_61] : memref<216x256xf32, #tpu.memory_space<vmem>>, vector<8x256xf32>
    tpu.vector_store %arg9[%c72, %c0_61], %91 {strides = array<i32>} : memref<216x256xf32, #tpu.memory_space<vmem>>, vector<8x256xf32>,
    %c0_62 = arith.constant 0 : index
    %c65 = arith.constant 65 : index
    %93 = vector.load %arg8[%c0_62, %c65] : memref<8x402xf32, #tpu.memory_space<vmem>>, vector<8x256xf32>
    %c10_63 = arith.constant 10 : index
    %c0_64 = arith.constant 0 : index
    %94 = vector.load %arg1[%c10_63, %c0_64] : memref<27x256xf32, #tpu.memory_space<vmem>>, vector<1x256xf32>
    %cst_65 = arith.constant 0.000000e+00 : f32
    %95 = vector.broadcast %cst_65 : f32 to vector<1x256xf32>
    %96 = arith.cmpf ogt, %94, %95 : vector<1x256xf32>
    %cst_66 = arith.constant 0.000000e+00 : f32
    %97 = vector.shape_cast %96 : vector<1x256xi1> to vector<1x256xi1>
    %98 = vector.broadcast %97 : vector<1x256xi1> to vector<8x256xi1>
    %99 = vector.broadcast %cst_66 : f32 to vector<8x256xf32>
    %100 = arith.select %98, %93, %99 : vector<8x256xi1>, vector<8x256xf32>
    %c80 = arith.constant 80 : index
    %c0_67 = arith.constant 0 : index
    %101 = vector.load %arg9[%c80, %c0_67] : memref<216x256xf32, #tpu.memory_space<vmem>>, vector<8x256xf32>
    tpu.vector_store %arg9[%c80, %c0_67], %100 {strides = array<i32>} : memref<216x256xf32, #tpu.memory_space<vmem>>, vector<8x256xf32>,
    %c0_68 = arith.constant 0 : index
    %c66 = arith.constant 66 : index
    %102 = vector.load %arg8[%c0_68, %c66] : memref<8x402xf32, #tpu.memory_space<vmem>>, vector<8x256xf32>
    %c11 = arith.constant 11 : index
    %c0_69 = arith.constant 0 : index
    %103 = vector.load %arg1[%c11, %c0_69] : memref<27x256xf32, #tpu.memory_space<vmem>>, vector<1x256xf32>
    %cst_70 = arith.constant 0.000000e+00 : f32
    %104 = vector.broadcast %cst_70 : f32 to vector<1x256xf32>
    %105 = arith.cmpf ogt, %103, %104 : vector<1x256xf32>
    %cst_71 = arith.constant 0.000000e+00 : f32
    %106 = vector.shape_cast %105 : vector<1x256xi1> to vector<1x256xi1>
    %107 = vector.broadcast %106 : vector<1x256xi1> to vector<8x256xi1>
    %108 = vector.broadcast %cst_71 : f32 to vector<8x256xf32>
    %109 = arith.select %107, %102, %108 : vector<8x256xi1>, vector<8x256xf32>
    %c88 = arith.constant 88 : index
    %c0_72 = arith.constant 0 : index
    %110 = vector.load %arg9[%c88, %c0_72] : memref<216x256xf32, #tpu.memory_space<vmem>>, vector<8x256xf32>
    tpu.vector_store %arg9[%c88, %c0_72], %109 {strides = array<i32>} : memref<216x256xf32, #tpu.memory_space<vmem>>, vector<8x256xf32>,
    %c0_73 = arith.constant 0 : index
    %c72_74 = arith.constant 72 : index
    %111 = vector.load %arg8[%c0_73, %c72_74] : memref<8x402xf32, #tpu.memory_space<vmem>>, vector<8x256xf32>
    %c12 = arith.constant 12 : index
    %c0_75 = arith.constant 0 : index
    %112 = vector.load %arg1[%c12, %c0_75] : memref<27x256xf32, #tpu.memory_space<vmem>>, vector<1x256xf32>
    %cst_76 = arith.constant 0.000000e+00 : f32
    %113 = vector.broadcast %cst_76 : f32 to vector<1x256xf32>
    %114 = arith.cmpf ogt, %112, %113 : vector<1x256xf32>
    %cst_77 = arith.constant 0.000000e+00 : f32
    %115 = vector.shape_cast %114 : vector<1x256xi1> to vector<1x256xi1>
    %116 = vector.broadcast %115 : vector<1x256xi1> to vector<8x256xi1>
    %117 = vector.broadcast %cst_77 : f32 to vector<8x256xf32>
    %118 = arith.select %116, %111, %117 : vector<8x256xi1>, vector<8x256xf32>
    %c96 = arith.constant 96 : index
    %c0_78 = arith.constant 0 : index
    %119 = vector.load %arg9[%c96, %c0_78] : memref<216x256xf32, #tpu.memory_space<vmem>>, vector<8x256xf32>
    tpu.vector_store %arg9[%c96, %c0_78], %118 {strides = array<i32>} : memref<216x256xf32, #tpu.memory_space<vmem>>, vector<8x256xf32>,
    %c0_79 = arith.constant 0 : index
    %c73_80 = arith.constant 73 : index
    %120 = vector.load %arg8[%c0_79, %c73_80] : memref<8x402xf32, #tpu.memory_space<vmem>>, vector<8x256xf32>
    %c13 = arith.constant 13 : index
    %c0_81 = arith.constant 0 : index
    %121 = vector.load %arg1[%c13, %c0_81] : memref<27x256xf32, #tpu.memory_space<vmem>>, vector<1x256xf32>
    %cst_82 = arith.constant 0.000000e+00 : f32
    %122 = vector.broadcast %cst_82 : f32 to vector<1x256xf32>
    %123 = arith.cmpf ogt, %121, %122 : vector<1x256xf32>
    %cst_83 = arith.constant 0.000000e+00 : f32
    %124 = vector.shape_cast %123 : vector<1x256xi1> to vector<1x256xi1>
    %125 = vector.broadcast %124 : vector<1x256xi1> to vector<8x256xi1>
    %126 = vector.broadcast %cst_83 : f32 to vector<8x256xf32>
    %127 = arith.select %125, %120, %126 : vector<8x256xi1>, vector<8x256xf32>
    %c104 = arith.constant 104 : index
    %c0_84 = arith.constant 0 : index
    %128 = vector.load %arg9[%c104, %c0_84] : memref<216x256xf32, #tpu.memory_space<vmem>>, vector<8x256xf32>
    tpu.vector_store %arg9[%c104, %c0_84], %127 {strides = array<i32>} : memref<216x256xf32, #tpu.memory_space<vmem>>, vector<8x256xf32>,
    %c0_85 = arith.constant 0 : index
    %c74 = arith.constant 74 : index
    %129 = vector.load %arg8[%c0_85, %c74] : memref<8x402xf32, #tpu.memory_space<vmem>>, vector<8x256xf32>
    %c14 = arith.constant 14 : index
    %c0_86 = arith.constant 0 : index
    %130 = vector.load %arg1[%c14, %c0_86] : memref<27x256xf32, #tpu.memory_space<vmem>>, vector<1x256xf32>
    %cst_87 = arith.constant 0.000000e+00 : f32
    %131 = vector.broadcast %cst_87 : f32 to vector<1x256xf32>
    %132 = arith.cmpf ogt, %130, %131 : vector<1x256xf32>
    %cst_88 = arith.constant 0.000000e+00 : f32
    %133 = vector.shape_cast %132 : vector<1x256xi1> to vector<1x256xi1>
    %134 = vector.broadcast %133 : vector<1x256xi1> to vector<8x256xi1>
    %135 = vector.broadcast %cst_88 : f32 to vector<8x256xf32>
    %136 = arith.select %134, %129, %135 : vector<8x256xi1>, vector<8x256xf32>
    %c112 = arith.constant 112 : index
    %c0_89 = arith.constant 0 : index
    %137 = vector.load %arg9[%c112, %c0_89] : memref<216x256xf32, #tpu.memory_space<vmem>>, vector<8x256xf32>
    tpu.vector_store %arg9[%c112, %c0_89], %136 {strides = array<i32>} : memref<216x256xf32, #tpu.memory_space<vmem>>, vector<8x256xf32>,
    %c0_90 = arith.constant 0 : index
    %c80_91 = arith.constant 80 : index
    %138 = vector.load %arg8[%c0_90, %c80_91] : memref<8x402xf32, #tpu.memory_space<vmem>>, vector<8x256xf32>
    %c15 = arith.constant 15 : index
    %c0_92 = arith.constant 0 : index
    %139 = vector.load %arg1[%c15, %c0_92] : memref<27x256xf32, #tpu.memory_space<vmem>>, vector<1x256xf32>
    %cst_93 = arith.constant 0.000000e+00 : f32
    %140 = vector.broadcast %cst_93 : f32 to vector<1x256xf32>
    %141 = arith.cmpf ogt, %139, %140 : vector<1x256xf32>
    %cst_94 = arith.constant 0.000000e+00 : f32
    %142 = vector.shape_cast %141 : vector<1x256xi1> to vector<1x256xi1>
    %143 = vector.broadcast %142 : vector<1x256xi1> to vector<8x256xi1>
    %144 = vector.broadcast %cst_94 : f32 to vector<8x256xf32>
    %145 = arith.select %143, %138, %144 : vector<8x256xi1>, vector<8x256xf32>
    %c120 = arith.constant 120 : index
    %c0_95 = arith.constant 0 : index
    %146 = vector.load %arg9[%c120, %c0_95] : memref<216x256xf32, #tpu.memory_space<vmem>>, vector<8x256xf32>
    tpu.vector_store %arg9[%c120, %c0_95], %145 {strides = array<i32>} : memref<216x256xf32, #tpu.memory_space<vmem>>, vector<8x256xf32>,
    %c0_96 = arith.constant 0 : index
    %c81 = arith.constant 81 : index
    %147 = vector.load %arg8[%c0_96, %c81] : memref<8x402xf32, #tpu.memory_space<vmem>>, vector<8x256xf32>
    %c16_97 = arith.constant 16 : index
    %c0_98 = arith.constant 0 : index
    %148 = vector.load %arg1[%c16_97, %c0_98] : memref<27x256xf32, #tpu.memory_space<vmem>>, vector<1x256xf32>
    %cst_99 = arith.constant 0.000000e+00 : f32
    %149 = vector.broadcast %cst_99 : f32 to vector<1x256xf32>
    %150 = arith.cmpf ogt, %148, %149 : vector<1x256xf32>
    %cst_100 = arith.constant 0.000000e+00 : f32
    %151 = vector.shape_cast %150 : vector<1x256xi1> to vector<1x256xi1>
    %152 = vector.broadcast %151 : vector<1x256xi1> to vector<8x256xi1>
    %153 = vector.broadcast %cst_100 : f32 to vector<8x256xf32>
    %154 = arith.select %152, %147, %153 : vector<8x256xi1>, vector<8x256xf32>
    %c128 = arith.constant 128 : index
    %c0_101 = arith.constant 0 : index
    %155 = vector.load %arg9[%c128, %c0_101] : memref<216x256xf32, #tpu.memory_space<vmem>>, vector<8x256xf32>
    tpu.vector_store %arg9[%c128, %c0_101], %154 {strides = array<i32>} : memref<216x256xf32, #tpu.memory_space<vmem>>, vector<8x256xf32>,
    %c0_102 = arith.constant 0 : index
    %c82 = arith.constant 82 : index
    %156 = vector.load %arg8[%c0_102, %c82] : memref<8x402xf32, #tpu.memory_space<vmem>>, vector<8x256xf32>
    %c17_103 = arith.constant 17 : index
    %c0_104 = arith.constant 0 : index
    %157 = vector.load %arg1[%c17_103, %c0_104] : memref<27x256xf32, #tpu.memory_space<vmem>>, vector<1x256xf32>
    %cst_105 = arith.constant 0.000000e+00 : f32
    %158 = vector.broadcast %cst_105 : f32 to vector<1x256xf32>
    %159 = arith.cmpf ogt, %157, %158 : vector<1x256xf32>
    %cst_106 = arith.constant 0.000000e+00 : f32
    %160 = vector.shape_cast %159 : vector<1x256xi1> to vector<1x256xi1>
    %161 = vector.broadcast %160 : vector<1x256xi1> to vector<8x256xi1>
    %162 = vector.broadcast %cst_106 : f32 to vector<8x256xf32>
    %163 = arith.select %161, %156, %162 : vector<8x256xi1>, vector<8x256xf32>
    %c136 = arith.constant 136 : index
    %c0_107 = arith.constant 0 : index
    %164 = vector.load %arg9[%c136, %c0_107] : memref<216x256xf32, #tpu.memory_space<vmem>>, vector<8x256xf32>
    tpu.vector_store %arg9[%c136, %c0_107], %163 {strides = array<i32>} : memref<216x256xf32, #tpu.memory_space<vmem>>, vector<8x256xf32>,
    %c0_108 = arith.constant 0 : index
    %c128_109 = arith.constant 128 : index
    %165 = vector.load %arg8[%c0_108, %c128_109] : memref<8x402xf32, #tpu.memory_space<vmem>>, vector<8x256xf32>
    %c18_110 = arith.constant 18 : index
    %c0_111 = arith.constant 0 : index
    %166 = vector.load %arg1[%c18_110, %c0_111] : memref<27x256xf32, #tpu.memory_space<vmem>>, vector<1x256xf32>
    %cst_112 = arith.constant 0.000000e+00 : f32
    %167 = vector.broadcast %cst_112 : f32 to vector<1x256xf32>
    %168 = arith.cmpf ogt, %166, %167 : vector<1x256xf32>
    %cst_113 = arith.constant 0.000000e+00 : f32
    %169 = vector.shape_cast %168 : vector<1x256xi1> to vector<1x256xi1>
    %170 = vector.broadcast %169 : vector<1x256xi1> to vector<8x256xi1>
    %171 = vector.broadcast %cst_113 : f32 to vector<8x256xf32>
    %172 = arith.select %170, %165, %171 : vector<8x256xi1>, vector<8x256xf32>
    %c144 = arith.constant 144 : index
    %c0_114 = arith.constant 0 : index
    %173 = vector.load %arg9[%c144, %c0_114] : memref<216x256xf32, #tpu.memory_space<vmem>>, vector<8x256xf32>
    tpu.vector_store %arg9[%c144, %c0_114], %172 {strides = array<i32>} : memref<216x256xf32, #tpu.memory_space<vmem>>, vector<8x256xf32>,
    %c0_115 = arith.constant 0 : index
    %c129 = arith.constant 129 : index
    %174 = vector.load %arg8[%c0_115, %c129] : memref<8x402xf32, #tpu.memory_space<vmem>>, vector<8x256xf32>
    %c19 = arith.constant 19 : index
    %c0_116 = arith.constant 0 : index
    %175 = vector.load %arg1[%c19, %c0_116] : memref<27x256xf32, #tpu.memory_space<vmem>>, vector<1x256xf32>
    %cst_117 = arith.constant 0.000000e+00 : f32
    %176 = vector.broadcast %cst_117 : f32 to vector<1x256xf32>
    %177 = arith.cmpf ogt, %175, %176 : vector<1x256xf32>
    %cst_118 = arith.constant 0.000000e+00 : f32
    %178 = vector.shape_cast %177 : vector<1x256xi1> to vector<1x256xi1>
    %179 = vector.broadcast %178 : vector<1x256xi1> to vector<8x256xi1>
    %180 = vector.broadcast %cst_118 : f32 to vector<8x256xf32>
    %181 = arith.select %179, %174, %180 : vector<8x256xi1>, vector<8x256xf32>
    %c152 = arith.constant 152 : index
    %c0_119 = arith.constant 0 : index
    %182 = vector.load %arg9[%c152, %c0_119] : memref<216x256xf32, #tpu.memory_space<vmem>>, vector<8x256xf32>
    tpu.vector_store %arg9[%c152, %c0_119], %181 {strides = array<i32>} : memref<216x256xf32, #tpu.memory_space<vmem>>, vector<8x256xf32>,
    %c0_120 = arith.constant 0 : index
    %c130 = arith.constant 130 : index
    %183 = vector.load %arg8[%c0_120, %c130] : memref<8x402xf32, #tpu.memory_space<vmem>>, vector<8x256xf32>
    %c20 = arith.constant 20 : index
    %c0_121 = arith.constant 0 : index
    %184 = vector.load %arg1[%c20, %c0_121] : memref<27x256xf32, #tpu.memory_space<vmem>>, vector<1x256xf32>
    %cst_122 = arith.constant 0.000000e+00 : f32
    %185 = vector.broadcast %cst_122 : f32 to vector<1x256xf32>
    %186 = arith.cmpf ogt, %184, %185 : vector<1x256xf32>
    %cst_123 = arith.constant 0.000000e+00 : f32
    %187 = vector.shape_cast %186 : vector<1x256xi1> to vector<1x256xi1>
    %188 = vector.broadcast %187 : vector<1x256xi1> to vector<8x256xi1>
    %189 = vector.broadcast %cst_123 : f32 to vector<8x256xf32>
    %190 = arith.select %188, %183, %189 : vector<8x256xi1>, vector<8x256xf32>
    %c160 = arith.constant 160 : index
    %c0_124 = arith.constant 0 : index
    %191 = vector.load %arg9[%c160, %c0_124] : memref<216x256xf32, #tpu.memory_space<vmem>>, vector<8x256xf32>
    tpu.vector_store %arg9[%c160, %c0_124], %190 {strides = array<i32>} : memref<216x256xf32, #tpu.memory_space<vmem>>, vector<8x256xf32>,
    %c0_125 = arith.constant 0 : index
    %c136_126 = arith.constant 136 : index
    %192 = vector.load %arg8[%c0_125, %c136_126] : memref<8x402xf32, #tpu.memory_space<vmem>>, vector<8x256xf32>
    %c21 = arith.constant 21 : index
    %c0_127 = arith.constant 0 : index
    %193 = vector.load %arg1[%c21, %c0_127] : memref<27x256xf32, #tpu.memory_space<vmem>>, vector<1x256xf32>
    %cst_128 = arith.constant 0.000000e+00 : f32
    %194 = vector.broadcast %cst_128 : f32 to vector<1x256xf32>
    %195 = arith.cmpf ogt, %193, %194 : vector<1x256xf32>
    %cst_129 = arith.constant 0.000000e+00 : f32
    %196 = vector.shape_cast %195 : vector<1x256xi1> to vector<1x256xi1>
    %197 = vector.broadcast %196 : vector<1x256xi1> to vector<8x256xi1>
    %198 = vector.broadcast %cst_129 : f32 to vector<8x256xf32>
    %199 = arith.select %197, %192, %198 : vector<8x256xi1>, vector<8x256xf32>
    %c168 = arith.constant 168 : index
    %c0_130 = arith.constant 0 : index
    %200 = vector.load %arg9[%c168, %c0_130] : memref<216x256xf32, #tpu.memory_space<vmem>>, vector<8x256xf32>
    tpu.vector_store %arg9[%c168, %c0_130], %199 {strides = array<i32>} : memref<216x256xf32, #tpu.memory_space<vmem>>, vector<8x256xf32>,
    %c0_131 = arith.constant 0 : index
    %c137 = arith.constant 137 : index
    %201 = vector.load %arg8[%c0_131, %c137] : memref<8x402xf32, #tpu.memory_space<vmem>>, vector<8x256xf32>
    %c22 = arith.constant 22 : index
    %c0_132 = arith.constant 0 : index
    %202 = vector.load %arg1[%c22, %c0_132] : memref<27x256xf32, #tpu.memory_space<vmem>>, vector<1x256xf32>
    %cst_133 = arith.constant 0.000000e+00 : f32
    %203 = vector.broadcast %cst_133 : f32 to vector<1x256xf32>
    %204 = arith.cmpf ogt, %202, %203 : vector<1x256xf32>
    %cst_134 = arith.constant 0.000000e+00 : f32
    %205 = vector.shape_cast %204 : vector<1x256xi1> to vector<1x256xi1>
    %206 = vector.broadcast %205 : vector<1x256xi1> to vector<8x256xi1>
    %207 = vector.broadcast %cst_134 : f32 to vector<8x256xf32>
    %208 = arith.select %206, %201, %207 : vector<8x256xi1>, vector<8x256xf32>
    %c176 = arith.constant 176 : index
    %c0_135 = arith.constant 0 : index
    %209 = vector.load %arg9[%c176, %c0_135] : memref<216x256xf32, #tpu.memory_space<vmem>>, vector<8x256xf32>
    tpu.vector_store %arg9[%c176, %c0_135], %208 {strides = array<i32>} : memref<216x256xf32, #tpu.memory_space<vmem>>, vector<8x256xf32>,
    %c0_136 = arith.constant 0 : index
    %c138 = arith.constant 138 : index
    %210 = vector.load %arg8[%c0_136, %c138] : memref<8x402xf32, #tpu.memory_space<vmem>>, vector<8x256xf32>
    %c23 = arith.constant 23 : index
    %c0_137 = arith.constant 0 : index
    %211 = vector.load %arg1[%c23, %c0_137] : memref<27x256xf32, #tpu.memory_space<vmem>>, vector<1x256xf32>
    %cst_138 = arith.constant 0.000000e+00 : f32
    %212 = vector.broadcast %cst_138 : f32 to vector<1x256xf32>
    %213 = arith.cmpf ogt, %211, %212 : vector<1x256xf32>
    %cst_139 = arith.constant 0.000000e+00 : f32
    %214 = vector.shape_cast %213 : vector<1x256xi1> to vector<1x256xi1>
    %215 = vector.broadcast %214 : vector<1x256xi1> to vector<8x256xi1>
    %216 = vector.broadcast %cst_139 : f32 to vector<8x256xf32>
    %217 = arith.select %215, %210, %216 : vector<8x256xi1>, vector<8x256xf32>
    %c184 = arith.constant 184 : index
    %c0_140 = arith.constant 0 : index
    %218 = vector.load %arg9[%c184, %c0_140] : memref<216x256xf32, #tpu.memory_space<vmem>>, vector<8x256xf32>
    tpu.vector_store %arg9[%c184, %c0_140], %217 {strides = array<i32>} : memref<216x256xf32, #tpu.memory_space<vmem>>, vector<8x256xf32>,
    %c0_141 = arith.constant 0 : index
    %c144_142 = arith.constant 144 : index
    %219 = vector.load %arg8[%c0_141, %c144_142] : memref<8x402xf32, #tpu.memory_space<vmem>>, vector<8x256xf32>
    %c24_143 = arith.constant 24 : index
    %c0_144 = arith.constant 0 : index
    %220 = vector.load %arg1[%c24_143, %c0_144] : memref<27x256xf32, #tpu.memory_space<vmem>>, vector<1x256xf32>
    %cst_145 = arith.constant 0.000000e+00 : f32
    %221 = vector.broadcast %cst_145 : f32 to vector<1x256xf32>
    %222 = arith.cmpf ogt, %220, %221 : vector<1x256xf32>
    %cst_146 = arith.constant 0.000000e+00 : f32
    %223 = vector.shape_cast %222 : vector<1x256xi1> to vector<1x256xi1>
    %224 = vector.broadcast %223 : vector<1x256xi1> to vector<8x256xi1>
    %225 = vector.broadcast %cst_146 : f32 to vector<8x256xf32>
    %226 = arith.select %224, %219, %225 : vector<8x256xi1>, vector<8x256xf32>
    %c192 = arith.constant 192 : index
    %c0_147 = arith.constant 0 : index
    %227 = vector.load %arg9[%c192, %c0_147] : memref<216x256xf32, #tpu.memory_space<vmem>>, vector<8x256xf32>
    tpu.vector_store %arg9[%c192, %c0_147], %226 {strides = array<i32>} : memref<216x256xf32, #tpu.memory_space<vmem>>, vector<8x256xf32>,
    %c0_148 = arith.constant 0 : index
    %c145 = arith.constant 145 : index
    %228 = vector.load %arg8[%c0_148, %c145] : memref<8x402xf32, #tpu.memory_space<vmem>>, vector<8x256xf32>
    %c25 = arith.constant 25 : index
    %c0_149 = arith.constant 0 : index
    %229 = vector.load %arg1[%c25, %c0_149] : memref<27x256xf32, #tpu.memory_space<vmem>>, vector<1x256xf32>
    %cst_150 = arith.constant 0.000000e+00 : f32
    %230 = vector.broadcast %cst_150 : f32 to vector<1x256xf32>
    %231 = arith.cmpf ogt, %229, %230 : vector<1x256xf32>
    %cst_151 = arith.constant 0.000000e+00 : f32
    %232 = vector.shape_cast %231 : vector<1x256xi1> to vector<1x256xi1>
    %233 = vector.broadcast %232 : vector<1x256xi1> to vector<8x256xi1>
    %234 = vector.broadcast %cst_151 : f32 to vector<8x256xf32>
    %235 = arith.select %233, %228, %234 : vector<8x256xi1>, vector<8x256xf32>
    %c200 = arith.constant 200 : index
    %c0_152 = arith.constant 0 : index
    %236 = vector.load %arg9[%c200, %c0_152] : memref<216x256xf32, #tpu.memory_space<vmem>>, vector<8x256xf32>
    tpu.vector_store %arg9[%c200, %c0_152], %235 {strides = array<i32>} : memref<216x256xf32, #tpu.memory_space<vmem>>, vector<8x256xf32>,
    %c0_153 = arith.constant 0 : index
    %c146 = arith.constant 146 : index
    %237 = vector.load %arg8[%c0_153, %c146] : memref<8x402xf32, #tpu.memory_space<vmem>>, vector<8x256xf32>
    %c26 = arith.constant 26 : index
    %c0_154 = arith.constant 0 : index
    %238 = vector.load %arg1[%c26, %c0_154] : memref<27x256xf32, #tpu.memory_space<vmem>>, vector<1x256xf32>
    %cst_155 = arith.constant 0.000000e+00 : f32
    %239 = vector.broadcast %cst_155 : f32 to vector<1x256xf32>
    %240 = arith.cmpf ogt, %238, %239 : vector<1x256xf32>
    %cst_156 = arith.constant 0.000000e+00 : f32
    %241 = vector.shape_cast %240 : vector<1x256xi1> to vector<1x256xi1>
    %242 = vector.broadcast %241 : vector<1x256xi1> to vector<8x256xi1>
    %243 = vector.broadcast %cst_156 : f32 to vector<8x256xf32>
    %244 = arith.select %242, %237, %243 : vector<8x256xi1>, vector<8x256xf32>
    %c208 = arith.constant 208 : index
    %c0_157 = arith.constant 0 : index
    %245 = vector.load %arg9[%c208, %c0_157] : memref<216x256xf32, #tpu.memory_space<vmem>>, vector<8x256xf32>
    tpu.vector_store %arg9[%c208, %c0_157], %244 {strides = array<i32>} : memref<216x256xf32, #tpu.memory_space<vmem>>, vector<8x256xf32>,
    %c0_158 = arith.constant 0 : index
    %c0_159 = arith.constant 0 : index
    %246 = vector.load %arg3[%c0_158, %c0_159] : memref<8x216xf32, #tpu.memory_space<vmem>>, vector<8x216xf32>
    %c0_160 = arith.constant 0 : index
    %c0_161 = arith.constant 0 : index
    %247 = vector.load %arg9[%c0_160, %c0_161] : memref<216x256xf32, #tpu.memory_space<vmem>>, vector<216x256xf32>
    %cst_162 = arith.constant dense<0.000000e+00> : vector<8x256xf32>
    %248 = tpu.matmul %246, %247, %cst_162 {dimension_numbers = #tpu.dot_dimension_numbers<[1], [0], [0], [1], [0, 0, 1, 1], [], []>} : vector<8x216xf32>, vector<216x256xf32>, vector<8x256xf32> -> vector<8x256xf32>
    %c0_163 = arith.constant 0 : index
    %c0_164 = arith.constant 0 : index
    %249 = vector.load %arg4[%c0_163, %c0_164] : memref<8x1xf32, #tpu.memory_space<vmem>>, vector<8x1xf32>
    %250 = vector.broadcast %249 : vector<8x1xf32> to vector<8x256xf32>
    %251 = arith.addf %248, %250 : vector<8x256xf32>
    %cst_165 = arith.constant 0.000000e+00 : f32
    %252 = vector.broadcast %cst_165 : f32 to vector<8x256xf32>
    %253 = arith.maximumf %251, %252 : vector<8x256xf32>
    %c0_166 = arith.constant 0 : index
    %c73_167 = arith.constant 73 : index
    %254 = vector.load %arg8[%c0_166, %c73_167] : memref<8x402xf32, #tpu.memory_space<vmem>>, vector<8x256xf32>
    tpu.vector_store %arg8[%c0_166, %c73_167], %253 {strides = array<i32>} : memref<8x402xf32, #tpu.memory_space<vmem>>, vector<8x256xf32>,
    %c0_168 = arith.constant 0 : index
    %c0_169 = arith.constant 0 : index
    %255 = vector.load %arg8[%c0_168, %c0_169] : memref<8x402xf32, #tpu.memory_space<vmem>>, vector<8x256xf32>
    %c0_170 = arith.constant 0 : index
    %c0_171 = arith.constant 0 : index
    %256 = vector.load %arg1[%c0_170, %c0_171] : memref<27x256xf32, #tpu.memory_space<vmem>>, vector<1x256xf32>
    %cst_172 = arith.constant 0.000000e+00 : f32
    %257 = vector.broadcast %cst_172 : f32 to vector<1x256xf32>
    %258 = arith.cmpf ogt, %256, %257 : vector<1x256xf32>
    %cst_173 = arith.constant 0.000000e+00 : f32
    %259 = vector.shape_cast %258 : vector<1x256xi1> to vector<1x256xi1>
    %260 = vector.broadcast %259 : vector<1x256xi1> to vector<8x256xi1>
    %261 = vector.broadcast %cst_173 : f32 to vector<8x256xf32>
    %262 = arith.select %260, %255, %261 : vector<8x256xi1>, vector<8x256xf32>
    %c0_174 = arith.constant 0 : index
    %c0_175 = arith.constant 0 : index
    %263 = vector.load %arg9[%c0_174, %c0_175] : memref<216x256xf32, #tpu.memory_space<vmem>>, vector<8x256xf32>
    tpu.vector_store %arg9[%c0_174, %c0_175], %262 {strides = array<i32>} : memref<216x256xf32, #tpu.memory_space<vmem>>, vector<8x256xf32>,
    %c0_176 = arith.constant 0 : index
    %c1_177 = arith.constant 1 : index
    %264 = vector.load %arg8[%c0_176, %c1_177] : memref<8x402xf32, #tpu.memory_space<vmem>>, vector<8x256xf32>
    %c1_178 = arith.constant 1 : index
    %c0_179 = arith.constant 0 : index
    %265 = vector.load %arg1[%c1_178, %c0_179] : memref<27x256xf32, #tpu.memory_space<vmem>>, vector<1x256xf32>
    %cst_180 = arith.constant 0.000000e+00 : f32
    %266 = vector.broadcast %cst_180 : f32 to vector<1x256xf32>
    %267 = arith.cmpf ogt, %265, %266 : vector<1x256xf32>
    %cst_181 = arith.constant 0.000000e+00 : f32
    %268 = vector.shape_cast %267 : vector<1x256xi1> to vector<1x256xi1>
    %269 = vector.broadcast %268 : vector<1x256xi1> to vector<8x256xi1>
    %270 = vector.broadcast %cst_181 : f32 to vector<8x256xf32>
    %271 = arith.select %269, %264, %270 : vector<8x256xi1>, vector<8x256xf32>
    %c8_182 = arith.constant 8 : index
    %c0_183 = arith.constant 0 : index
    %272 = vector.load %arg9[%c8_182, %c0_183] : memref<216x256xf32, #tpu.memory_space<vmem>>, vector<8x256xf32>
    tpu.vector_store %arg9[%c8_182, %c0_183], %271 {strides = array<i32>} : memref<216x256xf32, #tpu.memory_space<vmem>>, vector<8x256xf32>,
    %c0_184 = arith.constant 0 : index
    %c2_185 = arith.constant 2 : index
    %273 = vector.load %arg8[%c0_184, %c2_185] : memref<8x402xf32, #tpu.memory_space<vmem>>, vector<8x256xf32>
    %c2_186 = arith.constant 2 : index
    %c0_187 = arith.constant 0 : index
    %274 = vector.load %arg1[%c2_186, %c0_187] : memref<27x256xf32, #tpu.memory_space<vmem>>, vector<1x256xf32>
    %cst_188 = arith.constant 0.000000e+00 : f32
    %275 = vector.broadcast %cst_188 : f32 to vector<1x256xf32>
    %276 = arith.cmpf ogt, %274, %275 : vector<1x256xf32>
    %cst_189 = arith.constant 0.000000e+00 : f32
    %277 = vector.shape_cast %276 : vector<1x256xi1> to vector<1x256xi1>
    %278 = vector.broadcast %277 : vector<1x256xi1> to vector<8x256xi1>
    %279 = vector.broadcast %cst_189 : f32 to vector<8x256xf32>
    %280 = arith.select %278, %273, %279 : vector<8x256xi1>, vector<8x256xf32>
    %c16_190 = arith.constant 16 : index
    %c0_191 = arith.constant 0 : index
    %281 = vector.load %arg9[%c16_190, %c0_191] : memref<216x256xf32, #tpu.memory_space<vmem>>, vector<8x256xf32>
    tpu.vector_store %arg9[%c16_190, %c0_191], %280 {strides = array<i32>} : memref<216x256xf32, #tpu.memory_space<vmem>>, vector<8x256xf32>,
    %c0_192 = arith.constant 0 : index
    %c8_193 = arith.constant 8 : index
    %282 = vector.load %arg8[%c0_192, %c8_193] : memref<8x402xf32, #tpu.memory_space<vmem>>, vector<8x256xf32>
    %c3_194 = arith.constant 3 : index
    %c0_195 = arith.constant 0 : index
    %283 = vector.load %arg1[%c3_194, %c0_195] : memref<27x256xf32, #tpu.memory_space<vmem>>, vector<1x256xf32>
    %cst_196 = arith.constant 0.000000e+00 : f32
    %284 = vector.broadcast %cst_196 : f32 to vector<1x256xf32>
    %285 = arith.cmpf ogt, %283, %284 : vector<1x256xf32>
    %cst_197 = arith.constant 0.000000e+00 : f32
    %286 = vector.shape_cast %285 : vector<1x256xi1> to vector<1x256xi1>
    %287 = vector.broadcast %286 : vector<1x256xi1> to vector<8x256xi1>
    %288 = vector.broadcast %cst_197 : f32 to vector<8x256xf32>
    %289 = arith.select %287, %282, %288 : vector<8x256xi1>, vector<8x256xf32>
    %c24_198 = arith.constant 24 : index
    %c0_199 = arith.constant 0 : index
    %290 = vector.load %arg9[%c24_198, %c0_199] : memref<216x256xf32, #tpu.memory_space<vmem>>, vector<8x256xf32>
    tpu.vector_store %arg9[%c24_198, %c0_199], %289 {strides = array<i32>} : memref<216x256xf32, #tpu.memory_space<vmem>>, vector<8x256xf32>,
    %c0_200 = arith.constant 0 : index
    %c9_201 = arith.constant 9 : index
    %291 = vector.load %arg8[%c0_200, %c9_201] : memref<8x402xf32, #tpu.memory_space<vmem>>, vector<8x256xf32>
    %c4_202 = arith.constant 4 : index
    %c0_203 = arith.constant 0 : index
    %292 = vector.load %arg1[%c4_202, %c0_203] : memref<27x256xf32, #tpu.memory_space<vmem>>, vector<1x256xf32>
    %cst_204 = arith.constant 0.000000e+00 : f32
    %293 = vector.broadcast %cst_204 : f32 to vector<1x256xf32>
    %294 = arith.cmpf ogt, %292, %293 : vector<1x256xf32>
    %cst_205 = arith.constant 0.000000e+00 : f32
    %295 = vector.shape_cast %294 : vector<1x256xi1> to vector<1x256xi1>
    %296 = vector.broadcast %295 : vector<1x256xi1> to vector<8x256xi1>
    %297 = vector.broadcast %cst_205 : f32 to vector<8x256xf32>
    %298 = arith.select %296, %291, %297 : vector<8x256xi1>, vector<8x256xf32>
    %c32_206 = arith.constant 32 : index
    %c0_207 = arith.constant 0 : index
    %299 = vector.load %arg9[%c32_206, %c0_207] : memref<216x256xf32, #tpu.memory_space<vmem>>, vector<8x256xf32>
    tpu.vector_store %arg9[%c32_206, %c0_207], %298 {strides = array<i32>} : memref<216x256xf32, #tpu.memory_space<vmem>>, vector<8x256xf32>,
    %c0_208 = arith.constant 0 : index
    %c10_209 = arith.constant 10 : index
    %300 = vector.load %arg8[%c0_208, %c10_209] : memref<8x402xf32, #tpu.memory_space<vmem>>, vector<8x256xf32>
    %c5_210 = arith.constant 5 : index
    %c0_211 = arith.constant 0 : index
    %301 = vector.load %arg1[%c5_210, %c0_211] : memref<27x256xf32, #tpu.memory_space<vmem>>, vector<1x256xf32>
    %cst_212 = arith.constant 0.000000e+00 : f32
    %302 = vector.broadcast %cst_212 : f32 to vector<1x256xf32>
    %303 = arith.cmpf ogt, %301, %302 : vector<1x256xf32>
    %cst_213 = arith.constant 0.000000e+00 : f32
    %304 = vector.shape_cast %303 : vector<1x256xi1> to vector<1x256xi1>
    %305 = vector.broadcast %304 : vector<1x256xi1> to vector<8x256xi1>
    %306 = vector.broadcast %cst_213 : f32 to vector<8x256xf32>
    %307 = arith.select %305, %300, %306 : vector<8x256xi1>, vector<8x256xf32>
    %c40_214 = arith.constant 40 : index
    %c0_215 = arith.constant 0 : index
    %308 = vector.load %arg9[%c40_214, %c0_215] : memref<216x256xf32, #tpu.memory_space<vmem>>, vector<8x256xf32>
    tpu.vector_store %arg9[%c40_214, %c0_215], %307 {strides = array<i32>} : memref<216x256xf32, #tpu.memory_space<vmem>>, vector<8x256xf32>,
    %c0_216 = arith.constant 0 : index
    %c16_217 = arith.constant 16 : index
    %309 = vector.load %arg8[%c0_216, %c16_217] : memref<8x402xf32, #tpu.memory_space<vmem>>, vector<8x256xf32>
    %c6_218 = arith.constant 6 : index
    %c0_219 = arith.constant 0 : index
    %310 = vector.load %arg1[%c6_218, %c0_219] : memref<27x256xf32, #tpu.memory_space<vmem>>, vector<1x256xf32>
    %cst_220 = arith.constant 0.000000e+00 : f32
    %311 = vector.broadcast %cst_220 : f32 to vector<1x256xf32>
    %312 = arith.cmpf ogt, %310, %311 : vector<1x256xf32>
    %cst_221 = arith.constant 0.000000e+00 : f32
    %313 = vector.shape_cast %312 : vector<1x256xi1> to vector<1x256xi1>
    %314 = vector.broadcast %313 : vector<1x256xi1> to vector<8x256xi1>
    %315 = vector.broadcast %cst_221 : f32 to vector<8x256xf32>
    %316 = arith.select %314, %309, %315 : vector<8x256xi1>, vector<8x256xf32>
    %c48_222 = arith.constant 48 : index
    %c0_223 = arith.constant 0 : index
    %317 = vector.load %arg9[%c48_222, %c0_223] : memref<216x256xf32, #tpu.memory_space<vmem>>, vector<8x256xf32>
    tpu.vector_store %arg9[%c48_222, %c0_223], %316 {strides = array<i32>} : memref<216x256xf32, #tpu.memory_space<vmem>>, vector<8x256xf32>,
    %c0_224 = arith.constant 0 : index
    %c17_225 = arith.constant 17 : index
    %318 = vector.load %arg8[%c0_224, %c17_225] : memref<8x402xf32, #tpu.memory_space<vmem>>, vector<8x256xf32>
    %c7_226 = arith.constant 7 : index
    %c0_227 = arith.constant 0 : index
    %319 = vector.load %arg1[%c7_226, %c0_227] : memref<27x256xf32, #tpu.memory_space<vmem>>, vector<1x256xf32>
    %cst_228 = arith.constant 0.000000e+00 : f32
    %320 = vector.broadcast %cst_228 : f32 to vector<1x256xf32>
    %321 = arith.cmpf ogt, %319, %320 : vector<1x256xf32>
    %cst_229 = arith.constant 0.000000e+00 : f32
    %322 = vector.shape_cast %321 : vector<1x256xi1> to vector<1x256xi1>
    %323 = vector.broadcast %322 : vector<1x256xi1> to vector<8x256xi1>
    %324 = vector.broadcast %cst_229 : f32 to vector<8x256xf32>
    %325 = arith.select %323, %318, %324 : vector<8x256xi1>, vector<8x256xf32>
    %c56_230 = arith.constant 56 : index
    %c0_231 = arith.constant 0 : index
    %326 = vector.load %arg9[%c56_230, %c0_231] : memref<216x256xf32, #tpu.memory_space<vmem>>, vector<8x256xf32>
    tpu.vector_store %arg9[%c56_230, %c0_231], %325 {strides = array<i32>} : memref<216x256xf32, #tpu.memory_space<vmem>>, vector<8x256xf32>,
    %c0_232 = arith.constant 0 : index
    %c18_233 = arith.constant 18 : index
    %327 = vector.load %arg8[%c0_232, %c18_233] : memref<8x402xf32, #tpu.memory_space<vmem>>, vector<8x256xf32>
    %c8_234 = arith.constant 8 : index
    %c0_235 = arith.constant 0 : index
    %328 = vector.load %arg1[%c8_234, %c0_235] : memref<27x256xf32, #tpu.memory_space<vmem>>, vector<1x256xf32>
    %cst_236 = arith.constant 0.000000e+00 : f32
    %329 = vector.broadcast %cst_236 : f32 to vector<1x256xf32>
    %330 = arith.cmpf ogt, %328, %329 : vector<1x256xf32>
    %cst_237 = arith.constant 0.000000e+00 : f32
    %331 = vector.shape_cast %330 : vector<1x256xi1> to vector<1x256xi1>
    %332 = vector.broadcast %331 : vector<1x256xi1> to vector<8x256xi1>
    %333 = vector.broadcast %cst_237 : f32 to vector<8x256xf32>
    %334 = arith.select %332, %327, %333 : vector<8x256xi1>, vector<8x256xf32>
    %c64_238 = arith.constant 64 : index
    %c0_239 = arith.constant 0 : index
    %335 = vector.load %arg9[%c64_238, %c0_239] : memref<216x256xf32, #tpu.memory_space<vmem>>, vector<8x256xf32>
    tpu.vector_store %arg9[%c64_238, %c0_239], %334 {strides = array<i32>} : memref<216x256xf32, #tpu.memory_space<vmem>>, vector<8x256xf32>,
    %c0_240 = arith.constant 0 : index
    %c64_241 = arith.constant 64 : index
    %336 = vector.load %arg8[%c0_240, %c64_241] : memref<8x402xf32, #tpu.memory_space<vmem>>, vector<8x256xf32>
    %c9_242 = arith.constant 9 : index
    %c0_243 = arith.constant 0 : index
    %337 = vector.load %arg1[%c9_242, %c0_243] : memref<27x256xf32, #tpu.memory_space<vmem>>, vector<1x256xf32>
    %cst_244 = arith.constant 0.000000e+00 : f32
    %338 = vector.broadcast %cst_244 : f32 to vector<1x256xf32>
    %339 = arith.cmpf ogt, %337, %338 : vector<1x256xf32>
    %cst_245 = arith.constant 0.000000e+00 : f32
    %340 = vector.shape_cast %339 : vector<1x256xi1> to vector<1x256xi1>
    %341 = vector.broadcast %340 : vector<1x256xi1> to vector<8x256xi1>
    %342 = vector.broadcast %cst_245 : f32 to vector<8x256xf32>
    %343 = arith.select %341, %336, %342 : vector<8x256xi1>, vector<8x256xf32>
    %c72_246 = arith.constant 72 : index
    %c0_247 = arith.constant 0 : index
    %344 = vector.load %arg9[%c72_246, %c0_247] : memref<216x256xf32, #tpu.memory_space<vmem>>, vector<8x256xf32>
    tpu.vector_store %arg9[%c72_246, %c0_247], %343 {strides = array<i32>} : memref<216x256xf32, #tpu.memory_space<vmem>>, vector<8x256xf32>,
    %c0_248 = arith.constant 0 : index
    %c65_249 = arith.constant 65 : index
    %345 = vector.load %arg8[%c0_248, %c65_249] : memref<8x402xf32, #tpu.memory_space<vmem>>, vector<8x256xf32>
    %c10_250 = arith.constant 10 : index
    %c0_251 = arith.constant 0 : index
    %346 = vector.load %arg1[%c10_250, %c0_251] : memref<27x256xf32, #tpu.memory_space<vmem>>, vector<1x256xf32>
    %cst_252 = arith.constant 0.000000e+00 : f32
    %347 = vector.broadcast %cst_252 : f32 to vector<1x256xf32>
    %348 = arith.cmpf ogt, %346, %347 : vector<1x256xf32>
    %cst_253 = arith.constant 0.000000e+00 : f32
    %349 = vector.shape_cast %348 : vector<1x256xi1> to vector<1x256xi1>
    %350 = vector.broadcast %349 : vector<1x256xi1> to vector<8x256xi1>
    %351 = vector.broadcast %cst_253 : f32 to vector<8x256xf32>
    %352 = arith.select %350, %345, %351 : vector<8x256xi1>, vector<8x256xf32>
    %c80_254 = arith.constant 80 : index
    %c0_255 = arith.constant 0 : index
    %353 = vector.load %arg9[%c80_254, %c0_255] : memref<216x256xf32, #tpu.memory_space<vmem>>, vector<8x256xf32>
    tpu.vector_store %arg9[%c80_254, %c0_255], %352 {strides = array<i32>} : memref<216x256xf32, #tpu.memory_space<vmem>>, vector<8x256xf32>,
    %c0_256 = arith.constant 0 : index
    %c66_257 = arith.constant 66 : index
    %354 = vector.load %arg8[%c0_256, %c66_257] : memref<8x402xf32, #tpu.memory_space<vmem>>, vector<8x256xf32>
    %c11_258 = arith.constant 11 : index
    %c0_259 = arith.constant 0 : index
    %355 = vector.load %arg1[%c11_258, %c0_259] : memref<27x256xf32, #tpu.memory_space<vmem>>, vector<1x256xf32>
    %cst_260 = arith.constant 0.000000e+00 : f32
    %356 = vector.broadcast %cst_260 : f32 to vector<1x256xf32>
    %357 = arith.cmpf ogt, %355, %356 : vector<1x256xf32>
    %cst_261 = arith.constant 0.000000e+00 : f32
    %358 = vector.shape_cast %357 : vector<1x256xi1> to vector<1x256xi1>
    %359 = vector.broadcast %358 : vector<1x256xi1> to vector<8x256xi1>
    %360 = vector.broadcast %cst_261 : f32 to vector<8x256xf32>
    %361 = arith.select %359, %354, %360 : vector<8x256xi1>, vector<8x256xf32>
    %c88_262 = arith.constant 88 : index
    %c0_263 = arith.constant 0 : index
    %362 = vector.load %arg9[%c88_262, %c0_263] : memref<216x256xf32, #tpu.memory_space<vmem>>, vector<8x256xf32>
    tpu.vector_store %arg9[%c88_262, %c0_263], %361 {strides = array<i32>} : memref<216x256xf32, #tpu.memory_space<vmem>>, vector<8x256xf32>,
    %c0_264 = arith.constant 0 : index
    %c72_265 = arith.constant 72 : index
    %363 = vector.load %arg8[%c0_264, %c72_265] : memref<8x402xf32, #tpu.memory_space<vmem>>, vector<8x256xf32>
    %c12_266 = arith.constant 12 : index
    %c0_267 = arith.constant 0 : index
    %364 = vector.load %arg1[%c12_266, %c0_267] : memref<27x256xf32, #tpu.memory_space<vmem>>, vector<1x256xf32>
    %cst_268 = arith.constant 0.000000e+00 : f32
    %365 = vector.broadcast %cst_268 : f32 to vector<1x256xf32>
    %366 = arith.cmpf ogt, %364, %365 : vector<1x256xf32>
    %cst_269 = arith.constant 0.000000e+00 : f32
    %367 = vector.shape_cast %366 : vector<1x256xi1> to vector<1x256xi1>
    %368 = vector.broadcast %367 : vector<1x256xi1> to vector<8x256xi1>
    %369 = vector.broadcast %cst_269 : f32 to vector<8x256xf32>
    %370 = arith.select %368, %363, %369 : vector<8x256xi1>, vector<8x256xf32>
    %c96_270 = arith.constant 96 : index
    %c0_271 = arith.constant 0 : index
    %371 = vector.load %arg9[%c96_270, %c0_271] : memref<216x256xf32, #tpu.memory_space<vmem>>, vector<8x256xf32>
    tpu.vector_store %arg9[%c96_270, %c0_271], %370 {strides = array<i32>} : memref<216x256xf32, #tpu.memory_space<vmem>>, vector<8x256xf32>,
    %c0_272 = arith.constant 0 : index
    %c73_273 = arith.constant 73 : index
    %372 = vector.load %arg8[%c0_272, %c73_273] : memref<8x402xf32, #tpu.memory_space<vmem>>, vector<8x256xf32>
    %c13_274 = arith.constant 13 : index
    %c0_275 = arith.constant 0 : index
    %373 = vector.load %arg1[%c13_274, %c0_275] : memref<27x256xf32, #tpu.memory_space<vmem>>, vector<1x256xf32>
    %cst_276 = arith.constant 0.000000e+00 : f32
    %374 = vector.broadcast %cst_276 : f32 to vector<1x256xf32>
    %375 = arith.cmpf ogt, %373, %374 : vector<1x256xf32>
    %cst_277 = arith.constant 0.000000e+00 : f32
    %376 = vector.shape_cast %375 : vector<1x256xi1> to vector<1x256xi1>
    %377 = vector.broadcast %376 : vector<1x256xi1> to vector<8x256xi1>
    %378 = vector.broadcast %cst_277 : f32 to vector<8x256xf32>
    %379 = arith.select %377, %372, %378 : vector<8x256xi1>, vector<8x256xf32>
    %c104_278 = arith.constant 104 : index
    %c0_279 = arith.constant 0 : index
    %380 = vector.load %arg9[%c104_278, %c0_279] : memref<216x256xf32, #tpu.memory_space<vmem>>, vector<8x256xf32>
    tpu.vector_store %arg9[%c104_278, %c0_279], %379 {strides = array<i32>} : memref<216x256xf32, #tpu.memory_space<vmem>>, vector<8x256xf32>,
    %c0_280 = arith.constant 0 : index
    %c74_281 = arith.constant 74 : index
    %381 = vector.load %arg8[%c0_280, %c74_281] : memref<8x402xf32, #tpu.memory_space<vmem>>, vector<8x256xf32>
    %c14_282 = arith.constant 14 : index
    %c0_283 = arith.constant 0 : index
    %382 = vector.load %arg1[%c14_282, %c0_283] : memref<27x256xf32, #tpu.memory_space<vmem>>, vector<1x256xf32>
    %cst_284 = arith.constant 0.000000e+00 : f32
    %383 = vector.broadcast %cst_284 : f32 to vector<1x256xf32>
    %384 = arith.cmpf ogt, %382, %383 : vector<1x256xf32>
    %cst_285 = arith.constant 0.000000e+00 : f32
    %385 = vector.shape_cast %384 : vector<1x256xi1> to vector<1x256xi1>
    %386 = vector.broadcast %385 : vector<1x256xi1> to vector<8x256xi1>
    %387 = vector.broadcast %cst_285 : f32 to vector<8x256xf32>
    %388 = arith.select %386, %381, %387 : vector<8x256xi1>, vector<8x256xf32>
    %c112_286 = arith.constant 112 : index
    %c0_287 = arith.constant 0 : index
    %389 = vector.load %arg9[%c112_286, %c0_287] : memref<216x256xf32, #tpu.memory_space<vmem>>, vector<8x256xf32>
    tpu.vector_store %arg9[%c112_286, %c0_287], %388 {strides = array<i32>} : memref<216x256xf32, #tpu.memory_space<vmem>>, vector<8x256xf32>,
    %c0_288 = arith.constant 0 : index
    %c80_289 = arith.constant 80 : index
    %390 = vector.load %arg8[%c0_288, %c80_289] : memref<8x402xf32, #tpu.memory_space<vmem>>, vector<8x256xf32>
    %c15_290 = arith.constant 15 : index
    %c0_291 = arith.constant 0 : index
    %391 = vector.load %arg1[%c15_290, %c0_291] : memref<27x256xf32, #tpu.memory_space<vmem>>, vector<1x256xf32>
    %cst_292 = arith.constant 0.000000e+00 : f32
    %392 = vector.broadcast %cst_292 : f32 to vector<1x256xf32>
    %393 = arith.cmpf ogt, %391, %392 : vector<1x256xf32>
    %cst_293 = arith.constant 0.000000e+00 : f32
    %394 = vector.shape_cast %393 : vector<1x256xi1> to vector<1x256xi1>
    %395 = vector.broadcast %394 : vector<1x256xi1> to vector<8x256xi1>
    %396 = vector.broadcast %cst_293 : f32 to vector<8x256xf32>
    %397 = arith.select %395, %390, %396 : vector<8x256xi1>, vector<8x256xf32>
    %c120_294 = arith.constant 120 : index
    %c0_295 = arith.constant 0 : index
    %398 = vector.load %arg9[%c120_294, %c0_295] : memref<216x256xf32, #tpu.memory_space<vmem>>, vector<8x256xf32>
    tpu.vector_store %arg9[%c120_294, %c0_295], %397 {strides = array<i32>} : memref<216x256xf32, #tpu.memory_space<vmem>>, vector<8x256xf32>,
    %c0_296 = arith.constant 0 : index
    %c81_297 = arith.constant 81 : index
    %399 = vector.load %arg8[%c0_296, %c81_297] : memref<8x402xf32, #tpu.memory_space<vmem>>, vector<8x256xf32>
    %c16_298 = arith.constant 16 : index
    %c0_299 = arith.constant 0 : index
    %400 = vector.load %arg1[%c16_298, %c0_299] : memref<27x256xf32, #tpu.memory_space<vmem>>, vector<1x256xf32>
    %cst_300 = arith.constant 0.000000e+00 : f32
    %401 = vector.broadcast %cst_300 : f32 to vector<1x256xf32>
    %402 = arith.cmpf ogt, %400, %401 : vector<1x256xf32>
    %cst_301 = arith.constant 0.000000e+00 : f32
    %403 = vector.shape_cast %402 : vector<1x256xi1> to vector<1x256xi1>
    %404 = vector.broadcast %403 : vector<1x256xi1> to vector<8x256xi1>
    %405 = vector.broadcast %cst_301 : f32 to vector<8x256xf32>
    %406 = arith.select %404, %399, %405 : vector<8x256xi1>, vector<8x256xf32>
    %c128_302 = arith.constant 128 : index
    %c0_303 = arith.constant 0 : index
    %407 = vector.load %arg9[%c128_302, %c0_303] : memref<216x256xf32, #tpu.memory_space<vmem>>, vector<8x256xf32>
    tpu.vector_store %arg9[%c128_302, %c0_303], %406 {strides = array<i32>} : memref<216x256xf32, #tpu.memory_space<vmem>>, vector<8x256xf32>,
    %c0_304 = arith.constant 0 : index
    %c82_305 = arith.constant 82 : index
    %408 = vector.load %arg8[%c0_304, %c82_305] : memref<8x402xf32, #tpu.memory_space<vmem>>, vector<8x256xf32>
    %c17_306 = arith.constant 17 : index
    %c0_307 = arith.constant 0 : index
    %409 = vector.load %arg1[%c17_306, %c0_307] : memref<27x256xf32, #tpu.memory_space<vmem>>, vector<1x256xf32>
    %cst_308 = arith.constant 0.000000e+00 : f32
    %410 = vector.broadcast %cst_308 : f32 to vector<1x256xf32>
    %411 = arith.cmpf ogt, %409, %410 : vector<1x256xf32>
    %cst_309 = arith.constant 0.000000e+00 : f32
    %412 = vector.shape_cast %411 : vector<1x256xi1> to vector<1x256xi1>
    %413 = vector.broadcast %412 : vector<1x256xi1> to vector<8x256xi1>
    %414 = vector.broadcast %cst_309 : f32 to vector<8x256xf32>
    %415 = arith.select %413, %408, %414 : vector<8x256xi1>, vector<8x256xf32>
    %c136_310 = arith.constant 136 : index
    %c0_311 = arith.constant 0 : index
    %416 = vector.load %arg9[%c136_310, %c0_311] : memref<216x256xf32, #tpu.memory_space<vmem>>, vector<8x256xf32>
    tpu.vector_store %arg9[%c136_310, %c0_311], %415 {strides = array<i32>} : memref<216x256xf32, #tpu.memory_space<vmem>>, vector<8x256xf32>,
    %c0_312 = arith.constant 0 : index
    %c128_313 = arith.constant 128 : index
    %417 = vector.load %arg8[%c0_312, %c128_313] : memref<8x402xf32, #tpu.memory_space<vmem>>, vector<8x256xf32>
    %c18_314 = arith.constant 18 : index
    %c0_315 = arith.constant 0 : index
    %418 = vector.load %arg1[%c18_314, %c0_315] : memref<27x256xf32, #tpu.memory_space<vmem>>, vector<1x256xf32>
    %cst_316 = arith.constant 0.000000e+00 : f32
    %419 = vector.broadcast %cst_316 : f32 to vector<1x256xf32>
    %420 = arith.cmpf ogt, %418, %419 : vector<1x256xf32>
    %cst_317 = arith.constant 0.000000e+00 : f32
    %421 = vector.shape_cast %420 : vector<1x256xi1> to vector<1x256xi1>
    %422 = vector.broadcast %421 : vector<1x256xi1> to vector<8x256xi1>
    %423 = vector.broadcast %cst_317 : f32 to vector<8x256xf32>
    %424 = arith.select %422, %417, %423 : vector<8x256xi1>, vector<8x256xf32>
    %c144_318 = arith.constant 144 : index
    %c0_319 = arith.constant 0 : index
    %425 = vector.load %arg9[%c144_318, %c0_319] : memref<216x256xf32, #tpu.memory_space<vmem>>, vector<8x256xf32>
    tpu.vector_store %arg9[%c144_318, %c0_319], %424 {strides = array<i32>} : memref<216x256xf32, #tpu.memory_space<vmem>>, vector<8x256xf32>,
    %c0_320 = arith.constant 0 : index
    %c129_321 = arith.constant 129 : index
    %426 = vector.load %arg8[%c0_320, %c129_321] : memref<8x402xf32, #tpu.memory_space<vmem>>, vector<8x256xf32>
    %c19_322 = arith.constant 19 : index
    %c0_323 = arith.constant 0 : index
    %427 = vector.load %arg1[%c19_322, %c0_323] : memref<27x256xf32, #tpu.memory_space<vmem>>, vector<1x256xf32>
    %cst_324 = arith.constant 0.000000e+00 : f32
    %428 = vector.broadcast %cst_324 : f32 to vector<1x256xf32>
    %429 = arith.cmpf ogt, %427, %428 : vector<1x256xf32>
    %cst_325 = arith.constant 0.000000e+00 : f32
    %430 = vector.shape_cast %429 : vector<1x256xi1> to vector<1x256xi1>
    %431 = vector.broadcast %430 : vector<1x256xi1> to vector<8x256xi1>
    %432 = vector.broadcast %cst_325 : f32 to vector<8x256xf32>
    %433 = arith.select %431, %426, %432 : vector<8x256xi1>, vector<8x256xf32>
    %c152_326 = arith.constant 152 : index
    %c0_327 = arith.constant 0 : index
    %434 = vector.load %arg9[%c152_326, %c0_327] : memref<216x256xf32, #tpu.memory_space<vmem>>, vector<8x256xf32>
    tpu.vector_store %arg9[%c152_326, %c0_327], %433 {strides = array<i32>} : memref<216x256xf32, #tpu.memory_space<vmem>>, vector<8x256xf32>,
    %c0_328 = arith.constant 0 : index
    %c130_329 = arith.constant 130 : index
    %435 = vector.load %arg8[%c0_328, %c130_329] : memref<8x402xf32, #tpu.memory_space<vmem>>, vector<8x256xf32>
    %c20_330 = arith.constant 20 : index
    %c0_331 = arith.constant 0 : index
    %436 = vector.load %arg1[%c20_330, %c0_331] : memref<27x256xf32, #tpu.memory_space<vmem>>, vector<1x256xf32>
    %cst_332 = arith.constant 0.000000e+00 : f32
    %437 = vector.broadcast %cst_332 : f32 to vector<1x256xf32>
    %438 = arith.cmpf ogt, %436, %437 : vector<1x256xf32>
    %cst_333 = arith.constant 0.000000e+00 : f32
    %439 = vector.shape_cast %438 : vector<1x256xi1> to vector<1x256xi1>
    %440 = vector.broadcast %439 : vector<1x256xi1> to vector<8x256xi1>
    %441 = vector.broadcast %cst_333 : f32 to vector<8x256xf32>
    %442 = arith.select %440, %435, %441 : vector<8x256xi1>, vector<8x256xf32>
    %c160_334 = arith.constant 160 : index
    %c0_335 = arith.constant 0 : index
    %443 = vector.load %arg9[%c160_334, %c0_335] : memref<216x256xf32, #tpu.memory_space<vmem>>, vector<8x256xf32>
    tpu.vector_store %arg9[%c160_334, %c0_335], %442 {strides = array<i32>} : memref<216x256xf32, #tpu.memory_space<vmem>>, vector<8x256xf32>,
    %c0_336 = arith.constant 0 : index
    %c136_337 = arith.constant 136 : index
    %444 = vector.load %arg8[%c0_336, %c136_337] : memref<8x402xf32, #tpu.memory_space<vmem>>, vector<8x256xf32>
    %c21_338 = arith.constant 21 : index
    %c0_339 = arith.constant 0 : index
    %445 = vector.load %arg1[%c21_338, %c0_339] : memref<27x256xf32, #tpu.memory_space<vmem>>, vector<1x256xf32>
    %cst_340 = arith.constant 0.000000e+00 : f32
    %446 = vector.broadcast %cst_340 : f32 to vector<1x256xf32>
    %447 = arith.cmpf ogt, %445, %446 : vector<1x256xf32>
    %cst_341 = arith.constant 0.000000e+00 : f32
    %448 = vector.shape_cast %447 : vector<1x256xi1> to vector<1x256xi1>
    %449 = vector.broadcast %448 : vector<1x256xi1> to vector<8x256xi1>
    %450 = vector.broadcast %cst_341 : f32 to vector<8x256xf32>
    %451 = arith.select %449, %444, %450 : vector<8x256xi1>, vector<8x256xf32>
    %c168_342 = arith.constant 168 : index
    %c0_343 = arith.constant 0 : index
    %452 = vector.load %arg9[%c168_342, %c0_343] : memref<216x256xf32, #tpu.memory_space<vmem>>, vector<8x256xf32>
    tpu.vector_store %arg9[%c168_342, %c0_343], %451 {strides = array<i32>} : memref<216x256xf32, #tpu.memory_space<vmem>>, vector<8x256xf32>,
    %c0_344 = arith.constant 0 : index
    %c137_345 = arith.constant 137 : index
    %453 = vector.load %arg8[%c0_344, %c137_345] : memref<8x402xf32, #tpu.memory_space<vmem>>, vector<8x256xf32>
    %c22_346 = arith.constant 22 : index
    %c0_347 = arith.constant 0 : index
    %454 = vector.load %arg1[%c22_346, %c0_347] : memref<27x256xf32, #tpu.memory_space<vmem>>, vector<1x256xf32>
    %cst_348 = arith.constant 0.000000e+00 : f32
    %455 = vector.broadcast %cst_348 : f32 to vector<1x256xf32>
    %456 = arith.cmpf ogt, %454, %455 : vector<1x256xf32>
    %cst_349 = arith.constant 0.000000e+00 : f32
    %457 = vector.shape_cast %456 : vector<1x256xi1> to vector<1x256xi1>
    %458 = vector.broadcast %457 : vector<1x256xi1> to vector<8x256xi1>
    %459 = vector.broadcast %cst_349 : f32 to vector<8x256xf32>
    %460 = arith.select %458, %453, %459 : vector<8x256xi1>, vector<8x256xf32>
    %c176_350 = arith.constant 176 : index
    %c0_351 = arith.constant 0 : index
    %461 = vector.load %arg9[%c176_350, %c0_351] : memref<216x256xf32, #tpu.memory_space<vmem>>, vector<8x256xf32>
    tpu.vector_store %arg9[%c176_350, %c0_351], %460 {strides = array<i32>} : memref<216x256xf32, #tpu.memory_space<vmem>>, vector<8x256xf32>,
    %c0_352 = arith.constant 0 : index
    %c138_353 = arith.constant 138 : index
    %462 = vector.load %arg8[%c0_352, %c138_353] : memref<8x402xf32, #tpu.memory_space<vmem>>, vector<8x256xf32>
    %c23_354 = arith.constant 23 : index
    %c0_355 = arith.constant 0 : index
    %463 = vector.load %arg1[%c23_354, %c0_355] : memref<27x256xf32, #tpu.memory_space<vmem>>, vector<1x256xf32>
    %cst_356 = arith.constant 0.000000e+00 : f32
    %464 = vector.broadcast %cst_356 : f32 to vector<1x256xf32>
    %465 = arith.cmpf ogt, %463, %464 : vector<1x256xf32>
    %cst_357 = arith.constant 0.000000e+00 : f32
    %466 = vector.shape_cast %465 : vector<1x256xi1> to vector<1x256xi1>
    %467 = vector.broadcast %466 : vector<1x256xi1> to vector<8x256xi1>
    %468 = vector.broadcast %cst_357 : f32 to vector<8x256xf32>
    %469 = arith.select %467, %462, %468 : vector<8x256xi1>, vector<8x256xf32>
    %c184_358 = arith.constant 184 : index
    %c0_359 = arith.constant 0 : index
    %470 = vector.load %arg9[%c184_358, %c0_359] : memref<216x256xf32, #tpu.memory_space<vmem>>, vector<8x256xf32>
    tpu.vector_store %arg9[%c184_358, %c0_359], %469 {strides = array<i32>} : memref<216x256xf32, #tpu.memory_space<vmem>>, vector<8x256xf32>,
    %c0_360 = arith.constant 0 : index
    %c144_361 = arith.constant 144 : index
    %471 = vector.load %arg8[%c0_360, %c144_361] : memref<8x402xf32, #tpu.memory_space<vmem>>, vector<8x256xf32>
    %c24_362 = arith.constant 24 : index
    %c0_363 = arith.constant 0 : index
    %472 = vector.load %arg1[%c24_362, %c0_363] : memref<27x256xf32, #tpu.memory_space<vmem>>, vector<1x256xf32>
    %cst_364 = arith.constant 0.000000e+00 : f32
    %473 = vector.broadcast %cst_364 : f32 to vector<1x256xf32>
    %474 = arith.cmpf ogt, %472, %473 : vector<1x256xf32>
    %cst_365 = arith.constant 0.000000e+00 : f32
    %475 = vector.shape_cast %474 : vector<1x256xi1> to vector<1x256xi1>
    %476 = vector.broadcast %475 : vector<1x256xi1> to vector<8x256xi1>
    %477 = vector.broadcast %cst_365 : f32 to vector<8x256xf32>
    %478 = arith.select %476, %471, %477 : vector<8x256xi1>, vector<8x256xf32>
    %c192_366 = arith.constant 192 : index
    %c0_367 = arith.constant 0 : index
    %479 = vector.load %arg9[%c192_366, %c0_367] : memref<216x256xf32, #tpu.memory_space<vmem>>, vector<8x256xf32>
    tpu.vector_store %arg9[%c192_366, %c0_367], %478 {strides = array<i32>} : memref<216x256xf32, #tpu.memory_space<vmem>>, vector<8x256xf32>,
    %c0_368 = arith.constant 0 : index
    %c145_369 = arith.constant 145 : index
    %480 = vector.load %arg8[%c0_368, %c145_369] : memref<8x402xf32, #tpu.memory_space<vmem>>, vector<8x256xf32>
    %c25_370 = arith.constant 25 : index
    %c0_371 = arith.constant 0 : index
    %481 = vector.load %arg1[%c25_370, %c0_371] : memref<27x256xf32, #tpu.memory_space<vmem>>, vector<1x256xf32>
    %cst_372 = arith.constant 0.000000e+00 : f32
    %482 = vector.broadcast %cst_372 : f32 to vector<1x256xf32>
    %483 = arith.cmpf ogt, %481, %482 : vector<1x256xf32>
    %cst_373 = arith.constant 0.000000e+00 : f32
    %484 = vector.shape_cast %483 : vector<1x256xi1> to vector<1x256xi1>
    %485 = vector.broadcast %484 : vector<1x256xi1> to vector<8x256xi1>
    %486 = vector.broadcast %cst_373 : f32 to vector<8x256xf32>
    %487 = arith.select %485, %480, %486 : vector<8x256xi1>, vector<8x256xf32>
    %c200_374 = arith.constant 200 : index
    %c0_375 = arith.constant 0 : index
    %488 = vector.load %arg9[%c200_374, %c0_375] : memref<216x256xf32, #tpu.memory_space<vmem>>, vector<8x256xf32>
    tpu.vector_store %arg9[%c200_374, %c0_375], %487 {strides = array<i32>} : memref<216x256xf32, #tpu.memory_space<vmem>>, vector<8x256xf32>,
    %c0_376 = arith.constant 0 : index
    %c146_377 = arith.constant 146 : index
    %489 = vector.load %arg8[%c0_376, %c146_377] : memref<8x402xf32, #tpu.memory_space<vmem>>, vector<8x256xf32>
    %c26_378 = arith.constant 26 : index
    %c0_379 = arith.constant 0 : index
    %490 = vector.load %arg1[%c26_378, %c0_379] : memref<27x256xf32, #tpu.memory_space<vmem>>, vector<1x256xf32>
    %cst_380 = arith.constant 0.000000e+00 : f32
    %491 = vector.broadcast %cst_380 : f32 to vector<1x256xf32>
    %492 = arith.cmpf ogt, %490, %491 : vector<1x256xf32>
    %cst_381 = arith.constant 0.000000e+00 : f32
    %493 = vector.shape_cast %492 : vector<1x256xi1> to vector<1x256xi1>
    %494 = vector.broadcast %493 : vector<1x256xi1> to vector<8x256xi1>
    %495 = vector.broadcast %cst_381 : f32 to vector<8x256xf32>
    %496 = arith.select %494, %489, %495 : vector<8x256xi1>, vector<8x256xf32>
    %c208_382 = arith.constant 208 : index
    %c0_383 = arith.constant 0 : index
    %497 = vector.load %arg9[%c208_382, %c0_383] : memref<216x256xf32, #tpu.memory_space<vmem>>, vector<8x256xf32>
    tpu.vector_store %arg9[%c208_382, %c0_383], %496 {strides = array<i32>} : memref<216x256xf32, #tpu.memory_space<vmem>>, vector<8x256xf32>,
    %c0_384 = arith.constant 0 : index
    %c0_385 = arith.constant 0 : index
    %498 = vector.load %arg5[%c0_384, %c0_385] : memref<8x216xf32, #tpu.memory_space<vmem>>, vector<8x216xf32>
    %c0_386 = arith.constant 0 : index
    %c0_387 = arith.constant 0 : index
    %499 = vector.load %arg9[%c0_386, %c0_387] : memref<216x256xf32, #tpu.memory_space<vmem>>, vector<216x256xf32>
    %cst_388 = arith.constant dense<0.000000e+00> : vector<8x256xf32>
    %500 = tpu.matmul %498, %499, %cst_388 {dimension_numbers = #tpu.dot_dimension_numbers<[1], [0], [0], [1], [0, 0, 1, 1], [], []>} : vector<8x216xf32>, vector<216x256xf32>, vector<8x256xf32> -> vector<8x256xf32>
    %c0_389 = arith.constant 0 : index
    %c0_390 = arith.constant 0 : index
    %501 = vector.load %arg6[%c0_389, %c0_390] : memref<8x1xf32, #tpu.memory_space<vmem>>, vector<8x1xf32>
    %502 = vector.broadcast %501 : vector<8x1xf32> to vector<8x256xf32>
    %503 = arith.addf %500, %502 : vector<8x256xf32>
    %c0_391 = arith.constant 0 : index
    %c0_392 = arith.constant 0 : index
    %c0_393 = arith.constant 0 : index
    %504 = vector.load %arg2[%c0_391, %c0_392, %c0_393] : memref<1x8x256xf32, #tpu.memory_space<vmem>>, vector<1x8x256xf32>
    %505 = vector.shape_cast %504 : vector<1x8x256xf32> to vector<8x256xf32>
    %506 = arith.addf %503, %505 : vector<8x256xf32>
    %cst_394 = arith.constant 0.000000e+00 : f32
    %507 = vector.broadcast %cst_394 : f32 to vector<8x256xf32>
    %508 = arith.maximumf %506, %507 : vector<8x256xf32>
    %c0_395 = arith.constant 0 : index
    %c0_396 = arith.constant 0 : index
    %c0_397 = arith.constant 0 : index
    %509 = vector.load %arg7[%c0_395, %c0_396, %c0_397] : memref<1x8x256xf32, #tpu.memory_space<vmem>>, vector<1x8x256xf32>
    %510 = vector.shape_cast %509 : vector<1x8x256xf32> to vector<8x256xf32>
    %511 = vector.shape_cast %508 : vector<8x256xf32> to vector<1x8x256xf32>
    tpu.vector_store %arg7[%c0_395, %c0_396, %c0_397], %511 {strides = array<i32>} : memref<1x8x256xf32, #tpu.memory_space<vmem>>, vector<1x8x256xf32>,
    return
  }
  func.func @transform_0(%arg0: i32) -> (i32, i32) {
    %c0_i32 = arith.constant 0 : i32
    %c0_i32_0 = arith.constant 0 : i32
    %c0_i32_1 = arith.constant 0 : i32
    return %c0_i32, %c0_i32_0 : i32, i32
  }
  func.func @transform_1(%arg0: i32) -> (i32, i32, i32) {
    %c0_i32 = arith.constant 0 : i32
    %c0_i32_0 = arith.constant 0 : i32
    %c0_i32_1 = arith.constant 0 : i32
    return %arg0, %c0_i32, %c0_i32_0 : i32, i32, i32
  }
  func.func @transform_2(%arg0: i32) -> (i32, i32) {
    %c0_i32 = arith.constant 0 : i32
    %c0_i32_0 = arith.constant 0 : i32
    %c0_i32_1 = arith.constant 0 : i32
    return %c0_i32, %c0_i32_0 : i32, i32
  }
  func.func @transform_3(%arg0: i32) -> (i32, i32) {
    %c0_i32 = arith.constant 0 : i32
    %c0_i32_0 = arith.constant 0 : i32
    %c0_i32_1 = arith.constant 0 : i32
    return %c0_i32, %c0_i32_0 : i32, i32
  }
  func.func @transform_4(%arg0: i32) -> (i32, i32) {
    %c0_i32 = arith.constant 0 : i32
    %c0_i32_0 = arith.constant 0 : i32
    %c0_i32_1 = arith.constant 0 : i32
    return %c0_i32, %c0_i32_0 : i32, i32
  }
  func.func @transform_5(%arg0: i32) -> (i32, i32) {
    %c0_i32 = arith.constant 0 : i32
    %c0_i32_0 = arith.constant 0 : i32
    %c0_i32_1 = arith.constant 0 : i32
    return %c0_i32, %c0_i32_0 : i32, i32
  }
  func.func @transform_6(%arg0: i32) -> (i32, i32, i32) {
    %c0_i32 = arith.constant 0 : i32
    %c0_i32_0 = arith.constant 0 : i32
    %c0_i32_1 = arith.constant 0 : i32
    return %arg0, %c0_i32, %c0_i32_0 : i32, i32, i32
  }
}

</mosaic_0001>

<bundles_post_ra>
// kernel: tpu_custom_call.1
= control target key start
LH: loop header
LB: loop body
LE: loop exit
PB: predicated region body
PF: predicated region fallthrough
CT: control target
= control target key end

     0   :  { %s5115_s0 = inlined_call_operand.hbm [shape: f32[27,256], index: 0, kind: input, shape index: {}]   ;;  %s5116_s1 = inlined_call_operand.hbm [shape: f32[2,8,256], index: 1, kind: input, shape index: {}]   ;;  %s5117_s2 = inlined_call_operand.vmem [shape: f32[8,216], index: 2, kind: input, shape index: {}]   ;;  %s5118_s3 = inlined_call_operand.vmem [shape: f32[8,1], index: 3, kind: input, shape index: {}]   ;;  %s5119_s4 = inlined_call_operand.vmem [shape: f32[8,216], index: 4, kind: input, shape index: {}]   ;;  %s5120_s5 = inlined_call_operand.vmem [shape: f32[8,1], index: 5, kind: input, shape index: {}]   ;;  %s5121_s6 = inlined_call_operand.hbm [shape: f32[2,8,256], index: 6, kind: output, shape index: {}]  }
   0x1   :  { %5207 = sst [smem:[#allocation17_spill]] %s5115_s0 }
   0x2   :  { %5208 = sst [smem:[#allocation18_spill]] %s5116_s1 }
   0x3   :  { %5209 = sst [smem:[#allocation19_spill]] %s5117_s2 }
   0x4   :  { %5210 = sst [smem:[#allocation20_spill]] %s5118_s3 }
   0x5   :  { %11 = vsyncpa [#allocation5], 0 }
   0x6   :  { %12 = vsyncpa [#allocation8], 0 }
   0x7   :  { %14 = vsyncpa [#allocation8 + $0x1], 0 }
   0x8   :  { %15 = vsyncpa [#allocation6], 0 }
   0x9   :  { %17 = vsyncpa [#allocation6 + $0x1], 0  ;;  %s3255_s21 = smov 0   ;;  %s3257_s22 = smov 0  }
   0xa   :  { %s3259_s23 = smov 0   ;;  %s3261_s24 = smov 0  }
   0xb LB: > { %s3276_s25 = sadd.s32 4294967295, %s3194_s24   ;;  %s2462_s26 = sadd.s32 4294967294, %s3194_s24   ;;  %s3194_s24 = sphi %s3261_s24, %s5639_s24   ;;  %s3190_s23 = sphi %s3259_s23, %s5638_s23   ;;  %s3186_s22 = sphi %s3257_s22, %s5637_s22   ;;  %s3182_s21 = sphi %s3255_s21, %s5636_s21  }
   0xc   : > { %p64_p0 = scmp.ne.s32.totalorder %s3186_s22, %s3182_s21  ;;  %p5122_p1 = scmp.eq.s32.totalorder %s3276_s25, 0 }
   0xd   : > { %p178_p3 = scmp.eq.s32.totalorder %s2462_s26, 1  ;;  %p2463_p5 = scmp.ge.s32.totalorder %s3194_s24, 1 }
   0xe   : > { %p3285_p4 = por %p5122_p1, %p64_p0  ;;  %p185_p7 = scmp.lt.s32.totalorder %s3194_s24, 3 }
   0xf   : > { %p3290_p6 = por %p178_p3, %p64_p0  ;;  %s3196_s30 = smov [#allocation4]  }
  0x10   : > { %s5211_s27 = scalar_select %p3285_p4, 1, 0 }
  0x11   : > { %s5212_s28 = scalar_select %p3290_p6, 1, 0 }
  0x12   : > { %p3295_p8 = pnand %p2463_p5, %p185_p7  ;;  %s197_s7 = sshll.u32 %s3196_s30, 4  ;;  %s3299_s7 = int_to_ptr.vmem [resolvable:$true] %s197_s7 }
  0x13   : > { %s3311_s9 = sadd.s32 1, %s3194_s24   ;;  %s51_s10 = sadd.s32 1, %s3190_s23 }
  0x14   : > { %s5213_s29 = scalar_select %p3295_p8, 1, 0 }
  0x15   : > { %p2754_p9 = pneg %p3295_p8  ;;  %s48_s11 = ssub.s32 %s3194_s24, %s3311_s9 }
  0x16   : > { %s5215_s0 = sld [smem:[#allocation17_spill]] }
  0x17   : > { %p3306_p11 = pnand %p2754_p9, %p5122_p1 }
  0x19   : > { %p3068_p13 = pneg %p3306_p11 }
  0x1c   : > { %s3066_s14 = scalar_lea.hbm %s5215_s0, 1024 }
  0x1d   : > { %p3067_p12 = scmp.ne.s32.totalorder %s5215_s0, %s3066_s14  ;;  %p3073_p5 = scmp.lt.u32.totalorder %s3066_s14, %s5215_s0 }
  0x1f   : > { %p3069_p0 = pnand %p3068_p13, %p3067_p12 }
  0x21   : > { %p3070_p3 = pneg %p3069_p0 }
  0x23   : > { %p3075_p7 = pnand %p3073_p5, %p3070_p3 }
  0x25   : > { %3078 = shalt.err (!%p3075_p7)
}
  0x26   : > { %s3079_s19 = scalar_lea.vmem %s3299_s7, 1024  ;;  %p3087_p2 = scmp.lt.s32.totalorder %s3299_s7, %s3299_s7 }
  0x27   : > { %p3080_p9 = scmp.ne.s32.totalorder %s3299_s7, %s3079_s19  ;;  %p3088_p6 = scmp.lt.s32.totalorder %s3079_s19, %s3079_s19 }
  0x29   : > { %p3082_p10 = pnand %p3080_p9, %p3068_p13  ;;  %p3089_p4 = por %p3088_p6, %p3087_p2 }
  0x2b   : > { %p3083_p1 = pneg %p3082_p10 }
  0x2d   : > { %p3090_p8 = pnand %p3089_p4, %p3083_p1 }
  0x2f   : > { %3093 = shalt.err (!%p3090_p8)
}
  0x30   : > { %s3197_s20 = smov 256   ;;  %s3198_s26 = smov 16  }
  0x31   : > { %2757 = dma.hbm_to_vmem [thread:$0]  (!%p3306_p11), %s5215_s0, 1024, %s3299_s7, [#allocation5], %s3197_s20, %s3197_s20, %s3198_s26  }
  0x32   : > { %p49_p2 = scmp.eq.s32.totalorder %s48_s11, 0  ;;  %p58_p1 = scmp.ne.s32.totalorder %s3190_s23, %s3186_s22 }
  0x33   : > { %p59_p4 = scmp.eq.s32.totalorder %s3194_s24, 0  ;;  %p2767_p6 = scmp.lt.s32.totalorder %s3194_s24, 2 }
  0x34   : > { %s3342_s13 = scalar_select %p49_p2, %s3190_s23, %s51_s10  }
  0x35   : > { %p60_p8 = por %p59_p4, %p58_p1  ;;  %p5216_p10 = scmp.eq.s32.totalorder %s3276_s25, 1 }
  0x36   : > { %s223_s15 = sand.u32 1, %s3190_s23   ;;  %s2480_s16 = sshll.u32 %s3194_s24, 8 }
  0x37   : > { %p3346_p12 = por %p5216_p10, %p58_p1  ;;  %s2466_s17 = sshll.u32 %s223_s15, 4 }
  0x38   : > { %s5218_s1 = sld [smem:[#allocation18_spill]]  ;;  %s227_s7 = scalar_lea.vmem [#allocation7], %s2466_s17 }
  0x39   : > { %s235_s10 = sshll.u32 %s227_s7, 4  ;;  %p3357_p11 = pnand %p2767_p6, %p60_p8  ;;  %s3361_s10 = int_to_ptr.vmem [resolvable:$true] %s235_s10 }
  0x3a   : > { %s224_s20 = scalar_lea.sflag [#allocation8], %s223_s15 }
  0x3b   : > { %p3096_p0 = pneg %p3357_p11 }
  0x3e   : > { %s3355_s19 = scalar_lea.hbm %s5218_s1, %s2480_s16  ;;  %s3099_s16 = scalar_lea.hbm %s5218_s1, 512 }
  0x3f   : > { %s3094_s26 = scalar_lea.hbm %s3355_s19, 256  ;;  %p3100_p7 = scmp.lt.u32.totalorder %s3355_s19, %s5218_s1 }
  0x40   : > { %p3095_p13 = scmp.ne.s32.totalorder %s3355_s19, %s3094_s26  ;;  %p3101_p9 = scmp.lt.u32.totalorder %s3099_s16, %s3094_s26 }
  0x41   : > { %p3103_p1 = scmp.lt.u32.totalorder %s3094_s26, %s3355_s19 }
  0x42   : > { %p3097_p3 = pnand %p3096_p0, %p3095_p13  ;;  %p3102_p2 = por %p3101_p9, %p3100_p7 }
  0x44   : > { %p3098_p5 = pneg %p3097_p3  ;;  %p3104_p4 = por %p3103_p1, %p3102_p2 }
  0x46   : > { %p3105_p6 = pnand %p3104_p4, %p3098_p5 }
  0x48   : > { %3108 = shalt.err (!%p3105_p6)
}
  0x49   : > { %s3109_s15 = scalar_lea.vmem %s3361_s10, 256  ;;  %s3199_s18 = smov [#allocation7]  }
  0x4a   : > { %p3110_p8 = scmp.ne.s32.totalorder %s3361_s10, %s3109_s15  ;;  %s3114_s7 = sshll.u32 %s3199_s18, 4  ;;  %s3115_s7 = int_to_ptr.vmem [resolvable:$false] %s3114_s7 }
  0x4b   : > { %s3116_s30 = scalar_lea.vmem %s3115_s7, 512  ;;  %p3117_p3 = scmp.lt.s32.totalorder %s3361_s10, %s3115_s7 }
  0x4c   : > { %p3112_p10 = pnand %p3110_p8, %p3096_p0  ;;  %p3118_p7 = scmp.lt.s32.totalorder %s3116_s30, %s3109_s15 }
  0x4e   : > { %p3113_p13 = pneg %p3112_p10  ;;  %p3119_p9 = por %p3118_p7, %p3117_p3 }
  0x50   : > { %p3120_p2 = pnand %p3119_p9, %p3113_p13 }
  0x52   : > { %3123 = shalt.err (!%p3120_p2)
}
  0x53   : > { %2761 = dma.hbm_to_vmem [thread:$0]  (!%p3357_p11), %s3355_s19, 256, %s3361_s10, %s224_s20  }
  0x54   : > { %p5220_p5 = scmp.ne.s32.totalorder %s5213_s29, 0 }
  0x56   : > { %244 = sbr.rel (%p5220_p5) target bundleno = 1279 (0x4ff), region = 44 }
  0x5d   : > { %p5221_p0 = scmp.eq.s32.totalorder %s3276_s25, 0 }
  0x5f   : > { %3169 = dma.done.wait (%p5221_p0), [#allocation5], 1024   ;;  %p5222_p1 = pmov %p5221_p0 }
  0x60   : > { %s3395_s26 = sand.u32 1, %s3186_s22   ;;  %p5223_p11 = scmp.ne.s32.totalorder %s5211_s27, 0 }
  0x61   : > { %3171 = vsyncadd (%p5222_p1), [#allocation5], 4294966272  ;;  %s5125_s11 = sshll.u32 %s3395_s26, 4  ;;  %s251_s12 = scalar_lea.sflag [#allocation8], %s3395_s26 }
  0x62   : > { %s3401_s19 = scalar_lea.vmem [#allocation7], %s5125_s11 }
  0x63   : > { %3173 = dma.done.wait (%p5223_p11), %s251_s12, 256  }
  0x64   : > { %3175 = vsyncadd (%p5223_p11), %s251_s12, 4294967040  ;;  %v283_v0 = vld [vmem:[%s3401_s19] sm:$0xff]  ;;  %s5126_s29 = smov 73   ;;  %v284_v1 = vld [vmem:[%s3401_s19 + $0x8] sm:$0xff]  ;;  %vm5164_vm0 = vcmask 1048136   ;;  %vm5163_vm1 = vcmask 596992   ;;  %v305_v25 = vlaneseq }
  0x65   : > { %287 = vrot.lane.b32.xlu0 %v283_v0, %s5126_s29  ;;  %s5158_s27 = smov 126   ;;  %s5142_s10 = smov 127   ;;  %v936_v5 = vld [vmem:[#allocation2 + $0x18] sm:$0xff]  ;;  %v5167_v8 = vmov 0   ;;  %vm5162_vm2 = vcmask 719872  }
  0x66   : > { %s5146_s20 = smov 119   ;;  %s5144_s16 = smov 120   ;;  %2944 = vset.pattern.permute.xlu1 %v5167_v8  ;;  %3065 = vset.pattern.permute.xlu0 %v5167_v8  ;;  %v302_v26 = vld [vmem:[#allocation4] ss:$8 sm:$0x3]  ;;  %v306_v29 = vshrl.u32 %v305_v25, 7 }
  0x67   : > { %s5160_s17 = smov 112   ;;  %s5148_s8 = smov 118   ;;  %v323_v30 = vld [vmem:[#allocation4 + $0x1] ss:$8 sm:$0x3]  ;;  %vm303_vm3 = vcmp.gt.f32.partialorder %v302_v26, 0.0 }
  0x68   : > { %s5156_s15 = smov 110   ;;  %s5128_s18 = smov 111   ;;  %v358_v31 = vld [vmem:[#allocation4 + $0x2] ss:$8 sm:$0x3]  ;;  %vm324_vm4 = vcmp.gt.f32.partialorder %v323_v30, 0.0 }
  0x69   : > { %289 = vrot.lane.b32.xlu0 %v284_v1, %s5126_s29  ;;  %s5150_s7 = smov 63   ;;  %s5130_s30 = smov 64   ;;  %v393_v32 = vld [vmem:[#allocation4 + $0x3] ss:$8 sm:$0x3]  ;;  %v3541_v35 = vsub.s32 1, %v306_v29 }
  0x6a   : > { %s5132_s12 = smov 56   ;;  %s5152_s11 = smov 62   ;;  %v304_v36 = vsel %vm303_vm3, 1, %v5167_v8  ;;  %vm359_vm5 = vcmp.gt.f32.partialorder %v358_v31, 0.0  ;;  %vm394_vm6 = vcmp.gt.f32.partialorder %v393_v32, 0.0  ;;  %v325_v37 = vsel %vm324_vm4, 1, %v5167_v8 }
  0x6b   : > { %s5134_s29 = smov 54   ;;  %s5235_s2 = sld [smem:[#allocation19_spill]]  ;;  %v3545_v38 = vsub.s32 0, %v306_v29  ;;  %v428_v39 = vld [vmem:[#allocation4 + $0x4] ss:$8 sm:$0x3]  ;;  %v312_v43 = vrot.slane %v304_v36, %v3541_v35  ;;  %v333_v46 = vrot.slane %v325_v37, %v3541_v35 }
  0x6c   : > { %s5237_s1 = smov 118   ;;  %s5238_s3 = sld [smem:[#allocation20_spill]]  ;;  %v463_v40 = vld [vmem:[#allocation4 + $0x5] ss:$8 sm:$0x3]  ;;  %v360_v44 = vsel %vm359_vm5, 1, %v5167_v8 }
  0x6d   : > { %v395_v45 = vsel %vm394_vm6, 1, %v5167_v8  ;;  %v498_v47 = vld [vmem:[#allocation4 + $0x6] ss:$8 sm:$0x3]  ;;  %v308_v49 = vrot.slane %v304_v36, %v3545_v38  ;;  %vm429_vm7 = vcmp.gt.f32.partialorder %v428_v39, 0.0  ;;  %vm464_vm8 = vcmp.gt.f32.partialorder %v463_v40, 0.0 }
  0x6e   : > { %v533_v48 = vld [vmem:[#allocation4 + $0x7] ss:$8 sm:$0x3]  ;;  %v329_v50 = vrot.slane %v325_v37, %v3545_v38  ;;  %v568_v51 = vld [vmem:[#allocation4 + $0x10] ss:$8 sm:$0x3]  ;;  %v368_v56 = vrot.slane %v360_v44, %v3541_v35  ;;  %v403_v57 = vrot.slane %v395_v45, %v3541_v35  ;;  %v364_v60 = vrot.slane %v360_v44, %v3545_v38 }
  0x6f   : > { %v603_v52 = vld [vmem:[#allocation4 + $0x11] ss:$8 sm:$0x3]  ;;  %vm3561_vm9 = vcmp.eq.s32.totalorder %v312_v43, 1  ;;  %vm499_vm10 = vcmp.gt.f32.partialorder %v498_v47, 0.0  ;;  %vm534_vm11 = vcmp.gt.f32.partialorder %v533_v48, 0.0  ;;  %v399_v0 = vrot.slane %v395_v45, %v3545_v38 }
  0x70   : > { %v638_v58 = vld [vmem:[#allocation4 + $0x12] ss:$8 sm:$0x3]  ;;  %vm3567_vm12 = vcmp.eq.s32.totalorder %v333_v46, 1  ;;  %v430_v61 = vsel %vm429_vm7, 1, %v5167_v8  ;;  %v465_v62 = vsel %vm464_vm8, 1, %v5167_v8 }
  0x71   : > { %v1207_v11 = vld [vmem:[%s5235_s2 + $0x8] sm:$0xff]  ;;  %vm3574_vm14 = vcmp.eq.s32.totalorder %v308_v49, 1  ;;  %vm569_vm15 = vcmp.gt.f32.partialorder %v568_v51, 0.0  ;;  %vm604_vm3 = vcmp.gt.f32.partialorder %v603_v52, 0.0  ;;  %vm3579_vm4 = vcmp.eq.s32.totalorder %v329_v50, 1  ;;  %s5429_s0 = smov 73  }
  0x72   : > { %2473 = vmatprep.mubr.msk.f32.mxu0 %vm5162_vm2, %v1207_v11  ;;  %v1262_v12 = vld [vmem:[%s5238_s3] sm:$0xff]  ;;  %v673_v1 = vld [vmem:[#allocation4 + $0x13] ss:$8 sm:$0x3]  ;;  %vm639_vm5 = vcmp.gt.f32.partialorder %v638_v58, 0.0  ;;  %vm3593_vm6 = vcmp.eq.s32.totalorder %v368_v56, 1  ;;  %v438_v25 = vrot.slane %v430_v61, %v3541_v35  ;;  %v473_v26 = vrot.slane %v465_v62, %v3541_v35 }
  0x73   : > { %vm3597_vm7 = vcmp.eq.s32.totalorder %v403_v57, 1  ;;  %v434_v29 = vrot.slane %v430_v61, %v3545_v38  ;;  %v708_v30 = vld [vmem:[#allocation4 + $0x14] ss:$8 sm:$0x3]  ;;  %v469_v36 = vrot.slane %v465_v62, %v3545_v38  ;;  %v3611_v37 = vsel %vm569_vm15, 1, %v5167_v8  ;;  %s5438_s3 = smov 55  }
  0x74   : > { %v743_v31 = vld [vmem:[#allocation4 + $0x15] ss:$8 sm:$0x3]  ;;  %v3615_v39 = vsel %vm604_vm3, 1, %v5167_v8  ;;  %v3627_v45 = vsel %vm639_vm5, 1, %v5167_v8  ;;  %vm709_vm15 = vcmp.gt.f32.partialorder %v708_v30, 0.0  ;;  %v578_v52 = vrot.slane %v3611_v37, %v3541_v35 }
  0x75   : > { %vm744_vm3 = vcmp.gt.f32.partialorder %v743_v31, 0.0  ;;  %vm3637_vm2 = vcmp.eq.s32.totalorder %v473_v26, 1  ;;  %v5257_v51 = vmov 0  ;;  %v613_v56 = vrot.slane %v3615_v39, %v3541_v35  ;;  %v848_v55 = vld [vmem:[#allocation4 + $0x20] ss:$8 sm:$0x3] }
  0x76   : > { %v5258_v51 = vsel %vm3637_vm2, 4294967295, %v5257_v51  ;;  %vm3651_vm5 = vcmp.eq.s32.totalorder %v434_v29, 1  ;;  %vm3655_vm8 = vcmp.eq.s32.totalorder %v469_v36, 1  ;;  %v3665_v29 = vsel %vm709_vm15, 1, %v5167_v8 }
  0x77   : > { %v3669_v36 = vsel %vm744_vm3, 1, %v5167_v8  ;;  %vm5273_vm3 = vcmask 1031168   ;;  %v883_v59 = vld [vmem:[#allocation4 + $0x21] ss:$8 sm:$0x3]  ;;  %v5298_v32 = vrot.slane %v3627_v45, %v3541_v35 }
  0x78   : > { %vm5274_vm15 = vmmov %vm5273_vm3  ;;  %v938_v11 = vld [vmem:[#allocation4 + $0x23] ss:$8 sm:$0x3] }
  0xd7   : > { %v288_v2 = vpop.permute.xlu0 %287 }
  0xd8   : > { %297 = vst.msk [vmem:[#allocation2] sm:$0xff] %vm5164_vm0, %v288_v2  ;;  %vm3633_vm0 = vcmp.eq.s32.totalorder %v438_v25, 1 }
  0xdb   : > { %v290_v3 = vpop.permute.xlu0 %289 }
  0xdc   : > { %299 = vst.msk [vmem:[#allocation2 + $0x10] sm:$0xff] %vm5163_vm1, %v290_v3  ;;  %v3460_v9 = vsel %vm5163_vm1, %v288_v2, %v290_v3  ;;  %v3584_v3 = vsel %vm499_vm10, 1, %v5167_v8  ;;  %vm3604_vm10 = vcmp.eq.s32.totalorder %v364_v60, 1  ;;  %vm3617_vm1 = vcmp.eq.s32.totalorder %v399_v0, 1 }
  0xdd   : > { %5224 = vst [vmem:[#allocation13_spill] sm:$0xff] %v3460_v9  ;;  %v508_v43 = vrot.slane %v3584_v3, %v3541_v35  ;;  %v504_v46 = vrot.slane %v3584_v3, %v3545_v38  ;;  %v778_v60 = vld [vmem:[#allocation4 + $0x16] ss:$8 sm:$0x3]  ;;  %v5259_v0 = vmov 0  ;;  %v5261_v3 = vmov 0 }
  0xde   : > { %v5260_v0 = vsel %vm3651_vm5, 4294967295, %v5259_v0  ;;  %v5262_v3 = vsel %vm3655_vm8, 4294967295, %v5261_v3  ;;  %vm5263_vm5 = vcmask 1039360  }
  0xdf   : > { %v3413_v4 = vld [vmem:[#allocation2] sm:$0xff]  ;;  %vm5264_vm13 = vmmov %vm5263_vm5  ;;  %vm3686_vm8 = vcmp.eq.s32.totalorder %v508_v43, 1  ;;  %v5271_v43 = vmov 0 }
  0xe0   : > { %374 = vrot.lane.b32.xlu0 %v3413_v4, %s5158_s27  ;;  %339 = vrot.lane.b32.xlu1 %v3413_v4, %s5142_s10 }
  0xe3   : > { %v3443_v6 = vld [vmem:[#allocation2 + $0x10] sm:$0xff] }
  0xe4   : > { %444 = vrot.lane.b32.xlu0 %v3413_v4, %s5146_s20  ;;  %409 = vrot.lane.b32.xlu1 %v3413_v4, %s5144_s16  ;;  %v2824_v7 = vpack.i.bf16 %v936_v5, %v3443_v6  ;;  %v2854_v10 = vpack.i.bf16 %v3443_v6, %v3460_v9 }
  0xe8   : > { %514 = vrot.lane.b32.xlu0 %v3413_v4, %s5160_s17  ;;  %479 = vrot.lane.b32.xlu1 %v3413_v4, %s5148_s8 }
  0xec   : > { %584 = vrot.lane.b32.xlu0 %v3413_v4, %s5156_s15  ;;  %549 = vrot.lane.b32.xlu1 %v3413_v4, %s5128_s18  ;;  %s5154_s18 = smov 55  }
  0xf0   : > { %654 = vrot.lane.b32.xlu0 %v3413_v4, %s5150_s7  ;;  %619 = vrot.lane.b32.xlu1 %v3413_v4, %s5130_s30  ;;  %s5140_s30 = smov 47  }
  0xf4   : > { %724 = vrot.lane.b32.xlu0 %v3413_v4, %s5132_s12  ;;  %689 = vrot.lane.b32.xlu1 %v3413_v4, %s5152_s11  ;;  %s5138_s12 = smov 48  }
  0xf8   : > { %794 = vrot.lane.b32.xlu0 %v3413_v4, %s5134_s29  ;;  %759 = vrot.lane.b32.xlu1 %v3413_v4, %s5154_s18  ;;  %s5136_s29 = smov 46  }
  0xfc   : > { %864 = vrot.lane.b32.xlu0 %v3413_v4, %s5140_s30  ;;  %829 = vrot.lane.b32.xlu1 %v3413_v4, %s5138_s12  ;;  %s5226_s12 = smov 64   ;;  %s5227_s30 = smov 56  }
 0x100   : > { %899 = vrot.lane.b32.xlu1 %v3413_v4, %s5136_s29  ;;  %2825 = vrot.lane.b32.xlu0 %v2824_v7, %s5142_s10  ;;  %s5225_s29 = smov 111  }
 0x104   : > { %2835 = vrot.lane.b32.xlu1 %v2824_v7, %s5144_s16  ;;  %2830 = vrot.lane.b32.xlu0 %v2824_v7, %s5158_s27 }
 0x108   : > { %2845 = vrot.lane.b32.xlu1 %v2824_v7, %s5148_s8  ;;  %2840 = vrot.lane.b32.xlu0 %v2824_v7, %s5146_s20 }
 0x10c   : > { %2855 = vrot.lane.b32.xlu0 %v2854_v10, %s5158_s27  ;;  %2850 = vrot.lane.b32.xlu1 %v2854_v10, %s5142_s10  ;;  %s5228_s10 = smov 54  }
 0x110   : > { %2865 = vrot.lane.b32.xlu0 %v2854_v10, %s5146_s20  ;;  %2860 = vrot.lane.b32.xlu1 %v2854_v10, %s5144_s16  ;;  %s5229_s16 = smov 47   ;;  %s5230_s20 = smov 48  }
 0x114   : > { %2875 = vrot.lane.b32.xlu0 %v2854_v10, %s5160_s17  ;;  %2870 = vrot.lane.b32.xlu1 %v2854_v10, %s5148_s8  ;;  %s5231_s8 = smov 46  }
 0x118   : > { %2885 = vrot.lane.b32.xlu0 %v2854_v10, %s5156_s15  ;;  %2880 = vrot.lane.b32.xlu1 %v2854_v10, %s5225_s29  ;;  %s5435_s15 = smov 112  }
 0x11c   : > { %2895 = vrot.lane.b32.xlu0 %v2854_v10, %s5150_s7  ;;  %2890 = vrot.lane.b32.xlu1 %v2854_v10, %s5226_s12  ;;  %s5232_s7 = smov 119  }
 0x120   : > { %2905 = vrot.lane.b32.xlu0 %v2854_v10, %s5227_s30  ;;  %2900 = vrot.lane.b32.xlu1 %v2854_v10, %s5152_s11  ;;  %s5233_s11 = smov 127  }
 0x124   : > { %2915 = vrot.lane.b32.xlu0 %v2854_v10, %s5228_s10  ;;  %2910 = vrot.lane.b32.xlu1 %v2854_v10, %s5154_s18  ;;  %s5234_s18 = smov 120  }
 0x128   : > { %2925 = vrot.lane.b32.xlu0 %v2854_v10, %s5229_s16  ;;  %2920 = vrot.lane.b32.xlu1 %v2854_v10, %s5230_s20 }
 0x12c   : > { %2930 = vrot.lane.b32.xlu0 %v2824_v7, %s5160_s17  ;;  %2935 = vrot.lane.b32.xlu1 %v2854_v10, %s5231_s8 }
 0x130   : > { %988 = vrot.lane.b32.xlu0 %v3460_v9, %s5158_s27  ;;  %2940 = vrot.lane.b32.xlu1 %v2824_v7, %s5225_s29  ;;  %s5236_s27 = smov 110  }
 0x134   : > { %1056 = vrot.lane.b32.xlu0 %v3460_v9, %s5232_s7  ;;  %954 = vrot.lane.b32.xlu1 %v3460_v9, %s5233_s11 }
 0x138   : > { %1124 = vrot.lane.b32.xlu0 %v3460_v9, %s5160_s17  ;;  %1022 = vrot.lane.b32.xlu1 %v3460_v9, %s5234_s18  ;;  %s5434_s17 = smov 126  }
 0x13c   : > { %1194 = vrot.lane.b32.xlu0 %v3443_v6, %s5236_s27  ;;  %1090 = vrot.lane.b32.xlu1 %v3460_v9, %s5237_s1 }
 0x140   : > { %1192 = vrot.lane.b32.xlu0 %v3460_v9, %s5236_s27  ;;  %1158 = vrot.lane.b32.xlu1 %v3460_v9, %s5225_s29 }
 0x144   : > { %1196 = vrot.lane.b32.xlu1 %v936_v5, %s5236_s27  ;;  %v3587_v5 = vsel %vm534_vm11, 1, %v5167_v8  ;;  %vm674_vm11 = vcmp.gt.f32.partialorder %v673_v1, 0.0 }
 0x145   : > { %v543_v44 = vrot.slane %v3587_v5, %v3541_v35  ;;  %v539_v47 = vrot.slane %v3587_v5, %v3545_v38  ;;  %v3649_v58 = vsel %vm674_vm11, 1, %v5167_v8  ;;  %v609_v5 = vrot.slane %v3615_v39, %v3545_v38 }
 0x146   : > { %vm3698_vm11 = vcmp.eq.s32.totalorder %v504_v46, 1  ;;  %v5269_v8 = vmov 0  ;;  %v5276_v46 = vmov 0  }
 0x147   : > { %v5270_v8 = vsel %vm3698_vm11, 4294967295, %v5269_v8  ;;  %vm5275_vm11 = vmpackc.low %vm3567_vm12, %vm3561_vm9 }
 0x148   : > { %1265 = vperm.xlu1 %2944, %v1262_v12   ;;  %vm2597_vm9 = vmpackc.low %vm3597_vm7, %vm3593_vm6  ;;  %vm5295_vm6 = vnez %v5258_v51 }
 0x149   : > { %vm2603_vm7 = vmpackc.low %vm5295_vm6, %vm3633_vm0 }
 0x152   : > { %v3509_v13 = vpop.permute.xlu1 %339  ;;  %v3511_v14 = vpop.permute.xlu0 %374 }
 0x156   : > { %v3513_v15 = vpop.permute.xlu1 %409  ;;  %v3515_v16 = vpop.permute.xlu0 %444 }
 0x15a   : > { %v3517_v17 = vpop.permute.xlu1 %479  ;;  %v3519_v18 = vpop.permute.xlu0 %514 }
 0x15e   : > { %v3521_v19 = vpop.permute.xlu1 %549  ;;  %v3523_v20 = vpop.permute.xlu0 %584 }
 0x162   : > { %v3525_v21 = vpop.permute.xlu1 %619  ;;  %v3527_v22 = vpop.permute.xlu0 %654 }
 0x166   : > { %v3529_v23 = vpop.permute.xlu1 %689  ;;  %v3531_v24 = vpop.permute.xlu0 %724 }
 0x16a   : > { %v3533_v27 = vpop.permute.xlu1 %759  ;;  %v3535_v28 = vpop.permute.xlu0 %794 }
 0x16e   : > { %v3537_v33 = vpop.permute.xlu1 %829  ;;  %v3539_v34 = vpop.permute.xlu0 %864 }
 0x172   : > { %v3547_v41 = vpop.permute.xlu1 %899  ;;  %v3549_v42 = vpop.permute.xlu0 %2825 }
 0x176   : > { %v3557_v53 = vpop.permute.xlu1 %2835  ;;  %v3559_v54 = vpop.permute.xlu0 %2830 }
 0x17a   : > { %v3589_v7 = vpop.permute.xlu1 %2845  ;;  %v3591_v10 = vpop.permute.xlu0 %2840 }
 0x17e   : > { %v2851_v48 = vpop.permute.xlu1 %2850  ;;  %v2856_v49 = vpop.permute.xlu0 %2855 }
 0x17f   : > { %v2853_v61 = vunpack.i.h.bf16 %v2851_v48  ;;  %v2852_v62 = vunpack.i.l.bf16 %v2851_v48  ;;  %v2858_v1 = vunpack.i.h.bf16 %v2856_v49  ;;  %v2857_v26 = vunpack.i.l.bf16 %v2856_v49  ;;  %v813_v49 = vld [vmem:[#allocation4 + $0x17] ss:$8 sm:$0x3] }
 0x181   : > { %v347_v48 = vsel %vm5263_vm5, %v2852_v62, %v2853_v61  ;;  %v346_v39 = vsel %vm5264_vm13, %v3509_v13, %v2852_v62  ;;  %v5265_v13 = vmov 0  ;;  %vm3690_vm13 = vcmp.eq.s32.totalorder %v543_v44, 1 }
 0x182   : > { %v2861_v25 = vpop.permute.xlu1 %2860  ;;  %v2866_v31 = vpop.permute.xlu0 %2865  ;;  %v2590_v57 = vpack.c.bf16 %v347_v48, %v3460_v9  ;;  %v2593_v61 = vpack.c.bf16 %v346_v39, %v3413_v4  ;;  %v5266_v13 = vsel %vm3686_vm8, 4294967295, %v5265_v13  ;;  %v5267_v62 = vmov 0 }
 0x183   : > { %v5268_v62 = vsel %vm3690_vm13, 4294967295, %v5267_v62  ;;  %v2863_v48 = vunpack.i.h.bf16 %v2861_v25  ;;  %v2862_v39 = vunpack.i.l.bf16 %v2861_v25  ;;  %vm3702_vm5 = vcmp.eq.s32.totalorder %v539_v47, 1 }
 0x184   : > { %v5272_v43 = vsel %vm3702_vm5, 4294967295, %v5271_v43  ;;  %v381_v30 = vsel %vm5273_vm3, %v3511_v14, %v2857_v26  ;;  %v382_v4 = vsel %vm5274_vm15, %v2857_v26, %v2858_v1  ;;  %2592 = vmatprep.subr.msk.bf16.mxu0 %vm5275_vm11, %v2590_v57  ;;  %vm5277_vm13 = vcmp.gt.f32.partialorder %v778_v60, 0.0  ;;  %vm5280_vm15 = vmpackc.low %vm3579_vm4, %vm3574_vm14 }
 0x185   : > { %v3720_v47 = vsel %vm5277_vm13, 1, %v5276_v46  ;;  %vm814_vm5 = vcmp.gt.f32.partialorder %v813_v49, 0.0  ;;  %vm5278_vm8 = vcmask 982016   ;;  %v2868_v44 = vunpack.i.h.bf16 %v2866_v31  ;;  %2595 = vmatpush1.bf16.msk.msra.mxu0 %vm5280_vm15, %v2593_v61 }
 0x186   : > { %v416_v25 = vsel %vm5278_vm8, %v3513_v15, %v2862_v39  ;;  %vm5279_vm2 = vmmov %vm5278_vm8  ;;  %v2867_v14 = vunpack.i.l.bf16 %v2866_v31  ;;  %v2871_v15 = vpop.permute.xlu1 %2870  ;;  %v2876_v1 = vpop.permute.xlu0 %2875  ;;  %vm3738_vm14 = vcmp.eq.s32.totalorder %v578_v52, 1  ;;  %vm3742_vm4 = vcmp.eq.s32.totalorder %v613_v56, 1 }
 0x187   : > { %v417_v9 = vsel %vm5279_vm2, %v2862_v39, %v2863_v48  ;;  %v2599_v60 = vpack.c.bf16 %v416_v25, %v381_v30  ;;  %v749_v26 = vrot.slane %v3669_v36, %v3545_v38  ;;  %v2873_v30 = vunpack.i.h.bf16 %v2871_v15 }
 0x188   : > { %v2596_v57 = vpack.c.bf16 %v417_v9, %v382_v4  ;;  %v714_v9 = vrot.slane %v3665_v29, %v3545_v38  ;;  %v2872_v31 = vunpack.i.l.bf16 %v2871_v15  ;;  %v5285_v61 = vrot.slane %v3611_v37, %v3545_v38 }
 0x189   : > { %vm3757_vm3 = vcmp.eq.s32.totalorder %v609_v5, 1  ;;  %v5288_v56 = vmov 0  ;;  %v788_v4 = vrot.slane %v3720_v47, %v3541_v35  ;;  %v3765_v48 = vsel %vm814_vm5, 1, %v5276_v46 }
 0x18a   : > { %vm3753_vm11 = vcmp.eq.s32.totalorder %v5285_v61, 1  ;;  %v5289_v56 = vsel %vm3757_vm3, 4294967295, %v5288_v56  ;;  %v2878_v39 = vunpack.i.h.bf16 %v2876_v1  ;;  %v2877_v25 = vunpack.i.l.bf16 %v2876_v1  ;;  %2598 = vmatprep.subr.msk.bf16.mxu0 %vm2597_vm9, %v2596_v57  ;;  %vm5294_vm3 = vmpackc.low %vm3617_vm1, %vm3604_vm10 }
 0x18b   : > { %vm849_vm13 = vcmp.gt.f32.partialorder %v848_v55, 0.0  ;;  %vm884_vm15 = vcmp.gt.f32.partialorder %v883_v59, 0.0  ;;  %vm5290_vm8 = vcmask 973824   ;;  %vm5292_vm2 = vcmask 965632   ;;  %2601 = vmatpush1.bf16.msk.msra.mxu0 %vm5294_vm3, %v2599_v60 }
 0x18c   : > { %v451_v37 = vsel %vm5290_vm8, %v3515_v16, %v2867_v14  ;;  %vm5291_vm12 = vmmov %vm5290_vm8  ;;  %v486_v49 = vsel %vm5292_vm2, %v3517_v17, %v2872_v31  ;;  %v917_v16 = vld [vmem:[#allocation4 + $0x22] ss:$8 sm:$0x3]  ;;  %v2886_v17 = vpop.permute.xlu0 %2885  ;;  %vm3794_vm1 = vcmp.eq.s32.totalorder %v5298_v32, 1  ;;  %v5301_v57 = vrot.slane %v3649_v58, %v3541_v35 }
 0x18d   : > { %v452_v5 = vsel %vm5291_vm12, %v2867_v14, %v2868_v44  ;;  %vm5293_vm5 = vmmov %vm5292_vm2  ;;  %v2605_v44 = vpack.c.bf16 %v486_v49, %v451_v37  ;;  %v2881_v14 = vpop.permute.xlu1 %2880  ;;  %vm5296_vm2 = vnez %v5260_v0  ;;  %vm5297_vm12 = vnez %v5262_v3 }
 0x18e   : > { %v487_v15 = vsel %vm5293_vm5, %v2872_v31, %v2873_v30  ;;  %vm3801_vm10 = vcmp.eq.s32.totalorder %v5301_v57, 1  ;;  %v5302_v60 = vmov 0  ;;  %v823_v1 = vrot.slane %v3765_v48, %v3541_v35 }
 0x18f   : > { %v2602_v12 = vpack.c.bf16 %v487_v15, %v452_v5  ;;  %v5303_v60 = vsel %vm3801_vm10, 4294967295, %v5302_v60  ;;  %v784_v30 = vrot.slane %v3720_v47, %v3545_v38  ;;  %v2883_v31 = vunpack.i.h.bf16 %v2881_v14 }
 0x190   : > { %v2882_v61 = vunpack.i.l.bf16 %v2881_v14  ;;  %v5304_v37 = vrot.slane %v3627_v45, %v3545_v38  ;;  %v5305_v5 = vmov 0  ;;  %v5307_v49 = vrot.slane %v3649_v58, %v3545_v38 }
 0x191   : > { %v5308_v15 = vmov 0  ;;  %v3825_v32 = vsel %vm849_vm13, 1, %v5276_v46  ;;  %v3829_v14 = vsel %vm884_vm15, 1, %v5276_v46  ;;  %vm5310_vm9 = vcmask 916480   ;;  %2604 = vmatprep.subr.msk.bf16.mxu0 %vm2603_vm7, %v2602_v12  ;;  %vm5314_vm15 = vmpackc.low %vm5297_vm12, %vm5296_vm2 }
 0x192   : > { %vm3812_vm3 = vcmp.eq.s32.totalorder %v5304_v37, 1  ;;  %vm3819_vm5 = vcmp.eq.s32.totalorder %v5307_v49, 1  ;;  %v521_v45 = vsel %vm5310_vm9, %v3519_v18, %v2877_v25  ;;  %vm5311_vm8 = vmmov %vm5310_vm9  ;;  %vm5312_vm13 = vcmask 908288   ;;  %2607 = vmatpush1.bf16.msk.msra.mxu0 %vm5314_vm15, %v2605_v44  ;;  %v972_v18 = vld [vmem:[#allocation4 + $0x24] ss:$8 sm:$0x3] }
 0x193   : > { %v5306_v5 = vsel %vm3812_vm3, 4294967295, %v5305_v5  ;;  %v5309_v15 = vsel %vm3819_vm5, 4294967295, %v5308_v15  ;;  %v522_v57 = vsel %vm5311_vm8, %v2877_v25, %v2878_v39  ;;  %vm918_vm5 = vcmp.gt.f32.partialorder %v917_v16, 0.0  ;;  %vm5313_vm10 = vmmov %vm5312_vm13  ;;  %v2891_v39 = vpop.permute.xlu1 %2890 }
 0x194   : > { %v556_v58 = vsel %vm5312_vm13, %v3521_v19, %v2882_v61  ;;  %v557_v55 = vsel %vm5313_vm10, %v2882_v61, %v2883_v31  ;;  %v2888_v59 = vunpack.i.h.bf16 %v2886_v17  ;;  %v2887_v37 = vunpack.i.l.bf16 %v2886_v17  ;;  %v2896_v19 = vpop.permute.xlu0 %2895 }
 0x195   : > { %vm5315_vm9 = vnez %v5266_v13  ;;  %vm5316_vm0 = vnez %v5268_v62  ;;  %v2608_v50 = vpack.c.bf16 %v557_v55, %v522_v57  ;;  %v2611_v51 = vpack.c.bf16 %v556_v58, %v521_v45 }
 0x196   : > { %vm2609_vm6 = vmpackc.low %vm5316_vm0, %vm5315_vm9  ;;  %vm5317_vm7 = vnez %v5270_v8  ;;  %vm5318_vm8 = vnez %v5272_v43  ;;  %v5319_v0 = vrot.slane %v3665_v29, %v3541_v35  ;;  %v5322_v25 = vrot.slane %v3669_v36, %v3541_v35 }
 0x197   : > { %v5323_v12 = vmov 0  ;;  %v819_v44 = vrot.slane %v3765_v48, %v3545_v38  ;;  %v858_v17 = vrot.slane %v3825_v32, %v3541_v35  ;;  %v2893_v31 = vunpack.i.h.bf16 %v2891_v39  ;;  %2610 = vmatprep.subr.msk.bf16.mxu0 %vm2609_vm6, %v2608_v50  ;;  %vm5334_vm9 = vmpackc.low %vm5318_vm8, %vm5317_vm7 }
 0x198   : > { %vm3858_vm2 = vcmp.eq.s32.totalorder %v5319_v0, 1  ;;  %vm3865_vm12 = vcmp.eq.s32.totalorder %v5322_v25, 1  ;;  %v2892_v61 = vunpack.i.l.bf16 %v2891_v39  ;;  %vm3873_vm15 = vcmp.eq.s32.totalorder %v714_v9, 1  ;;  %2613 = vmatpush1.bf16.msk.msra.mxu0 %vm5334_vm9, %v2611_v51  ;;  %vm2615_vm0 = vmpackc.low %vm3742_vm4, %vm3738_vm14 }
 0x199   : > { %v5324_v12 = vsel %vm3865_vm12, 4294967295, %v5323_v12  ;;  %v5325_v29 = vmov 0  ;;  %vm3877_vm3 = vcmp.eq.s32.totalorder %v749_v26, 1  ;;  %v5327_v49 = vmov 0 }
 0x19a   : > { %v5326_v29 = vsel %vm3873_vm15, 4294967295, %v5325_v29  ;;  %v5328_v49 = vsel %vm3877_vm3, 4294967295, %v5327_v49  ;;  %v893_v36 = vrot.slane %v3829_v14, %v3541_v35  ;;  %v3885_v45 = vsel %vm918_vm5, 1, %v5276_v46 }
 0x19b   : > { %v2898_v48 = vunpack.i.h.bf16 %v2896_v19  ;;  %v2897_v57 = vunpack.i.l.bf16 %v2896_v19  ;;  %vm5329_vm13 = vcmp.gt.f32.partialorder %v938_v11, 0.0  ;;  %vm973_vm10 = vcmp.gt.f32.partialorder %v972_v18, 0.0  ;;  %v2901_v11 = vpop.permute.xlu1 %2900 }
 0x19c   : > { %v3894_v9 = vsel %vm5329_vm13, 1, %v5276_v46  ;;  %vm5330_vm3 = vcmask 900096   ;;  %vm5332_vm5 = vcmask 523264   ;;  %vm3918_vm7 = vcmp.eq.s32.totalorder %v788_v4, 1 }
 0x19d   : > { %v591_v26 = vsel %vm5330_vm3, %v3523_v20, %v2887_v37  ;;  %vm5331_vm15 = vmmov %vm5330_vm3  ;;  %v626_v58 = vsel %vm5332_vm5, %v3525_v21, %v2892_v61  ;;  %v1006_v20 = vld [vmem:[#allocation4 + $0x25] ss:$8 sm:$0x3]  ;;  %vm5335_vm3 = vnez %v5289_v56  ;;  %vm3922_vm8 = vcmp.eq.s32.totalorder %v823_v1, 1 }
 0x19e   : > { %v592_v16 = vsel %vm5331_vm15, %v2887_v37, %v2888_v59  ;;  %vm5333_vm12 = vmmov %vm5332_vm5  ;;  %v2617_v62 = vpack.c.bf16 %v626_v58, %v591_v26  ;;  %v2906_v59 = vpop.permute.xlu0 %2905  ;;  %v854_v43 = vrot.slane %v3825_v32, %v3545_v38  ;;  %v889_v37 = vrot.slane %v3829_v14, %v3545_v38  ;;  %v1074_v26 = vld [vmem:[#allocation4 + $0x27] ss:$8 sm:$0x3] }
 0x19f   : > { %v627_v55 = vsel %vm5333_vm12, %v2892_v61, %v2893_v31  ;;  %v2903_v50 = vunpack.i.h.bf16 %v2901_v11  ;;  %v2902_v51 = vunpack.i.l.bf16 %v2901_v11  ;;  %vm3930_vm15 = vcmp.eq.s32.totalorder %v784_v30, 1  ;;  %v2911_v18 = vpop.permute.xlu1 %2910 }
 0x1a0   : > { %v2614_v13 = vpack.c.bf16 %v627_v55, %v592_v16  ;;  %vm3934_vm5 = vcmp.eq.s32.totalorder %v819_v44, 1  ;;  %v5342_v47 = vmov 0  ;;  %v927_v4 = vrot.slane %v3885_v45, %v3541_v35 }
 0x1a1   : > { %v5343_v47 = vsel %vm3934_vm5, 4294967295, %v5342_v47  ;;  %v948_v1 = vrot.slane %v3894_v9, %v3541_v35  ;;  %vm5344_vm9 = vcmask 515072   ;;  %v3952_v30 = vsel %vm973_vm10, 1, %v5276_v46 }
 0x1a2   : > { %v661_v32 = vsel %vm5344_vm9, %v3527_v22, %v2897_v57  ;;  %vm5345_vm12 = vmmov %vm5344_vm9  ;;  %2616 = vmatprep.subr.msk.bf16.mxu0 %vm2615_vm0, %v2614_v13  ;;  %vm5346_vm13 = vcmask 506880   ;;  %v2908_v25 = vunpack.i.h.bf16 %v2906_v59  ;;  %v2907_v22 = vunpack.i.l.bf16 %v2906_v59  ;;  %v2916_v44 = vpop.permute.xlu0 %2915 }
 0x1a3   : > { %v662_v14 = vsel %vm5345_vm12, %v2897_v57, %v2898_v48  ;;  %v696_v19 = vsel %vm5346_vm13, %v3529_v23, %v2902_v51  ;;  %vm5347_vm5 = vmmov %vm5346_vm13  ;;  %vm5349_vm14 = vnez %v5303_v60  ;;  %vm5350_vm10 = vnez %v5306_v5  ;;  %v2921_v59 = vpop.permute.xlu1 %2920 }
 0x1a4   : > { %v697_v0 = vsel %vm5347_vm5, %v2902_v51, %v2903_v50  ;;  %vm5348_vm12 = vmpackc.low %vm5335_vm3, %vm3753_vm11  ;;  %v2623_v2 = vpack.c.bf16 %v696_v19, %v661_v32  ;;  %vm5351_vm0 = vnez %v5309_v15  ;;  %vm3970_vm6 = vcmp.eq.s32.totalorder %v858_v17, 1 }
 0x1a5   : > { %2619 = vmatpush1.bf16.msk.msra.mxu0 %vm5348_vm12, %v2617_v62  ;;  %vm2621_vm4 = vmpackc.low %vm5349_vm14, %vm3794_vm1  ;;  %v2620_v63 = vpack.c.bf16 %v697_v0, %v662_v14  ;;  %vm3974_vm11 = vcmp.eq.s32.totalorder %v893_v36, 1  ;;  %v2913_v56 = vunpack.i.h.bf16 %v2911_v18  ;;  %v2912_v31 = vunpack.i.l.bf16 %v2911_v18  ;;  %v1040_v36 = vld [vmem:[#allocation4 + $0x26] ss:$8 sm:$0x3] }
 0x1a6   : > { %vm3978_vm3 = vcmp.eq.s32.totalorder %v854_v43, 1  ;;  %v5356_v61 = vmov 0  ;;  %vm3982_vm12 = vcmp.eq.s32.totalorder %v889_v37, 1  ;;  %v5358_v48 = vmov 0  ;;  %v2926_v43 = vpop.permute.xlu0 %2925 }
 0x1a7   : > { %v5357_v61 = vsel %vm3978_vm3, 4294967295, %v5356_v61  ;;  %v5359_v48 = vsel %vm3982_vm12, 4294967295, %v5358_v48  ;;  %v923_v17 = vrot.slane %v3885_v45, %v3545_v38  ;;  %v944_v57 = vrot.slane %v3894_v9, %v3545_v38  ;;  %2622 = vmatprep.subr.msk.bf16.mxu0 %vm2621_vm4, %v2620_v63  ;;  %v2936_v0 = vpop.permute.xlu1 %2935 }
 0x1a8   : > { %v2918_v16 = vunpack.i.h.bf16 %v2916_v44  ;;  %v2917_v58 = vunpack.i.l.bf16 %v2916_v44  ;;  %vm3995_vm9 = vcmp.eq.s32.totalorder %v927_v4, 1  ;;  %v5360_v55 = vmov 0  ;;  %v1108_v44 = vld [vmem:[#allocation4 + $0x30] ss:$8 sm:$0x3] }
 0x1a9   : > { %v5361_v55 = vsel %vm3995_vm9, 4294967295, %v5360_v55  ;;  %vm3999_vm5 = vcmp.eq.s32.totalorder %v948_v1, 1  ;;  %v5362_v13 = vmov 0  ;;  %v982_v45 = vrot.slane %v3952_v30, %v3541_v35 }
 0x1aa   : > { %v5363_v13 = vsel %vm3999_vm5, 4294967295, %v5362_v13  ;;  %vm5364_vm13 = vcmp.gt.f32.partialorder %v1006_v20, 0.0  ;;  %vm5365_vm12 = vcmask 457728   ;;  %vm5367_vm14 = vcmask 449536   ;;  %vm5369_vm5 = vmpackc.low %vm5351_vm0, %vm5350_vm10 }
 0x1ab   : > { %v4007_v9 = vsel %vm5364_vm13, 1, %v5276_v46  ;;  %v731_v40 = vsel %vm5365_vm12, %v3531_v24, %v2907_v22  ;;  %vm5366_vm1 = vmmov %vm5365_vm12  ;;  %v766_v62 = vsel %vm5367_vm14, %v3533_v27, %v2912_v31  ;;  %2625 = vmatpush1.bf16.msk.msra.mxu0 %vm5369_vm5, %v2623_v2  ;;  %vm5370_vm13 = vnez %v5324_v12  ;;  %v4096_v8 = vpop.permute.xlu1 %2940 }
 0x1ac   : > { %v732_v60 = vsel %vm5366_vm1, %v2907_v22, %v2908_v25  ;;  %vm5368_vm4 = vmmov %vm5367_vm14  ;;  %v2629_v24 = vpack.c.bf16 %v766_v62, %v731_v40  ;;  %vm5371_vm12 = vnez %v5326_v29  ;;  %vm5372_vm1 = vnez %v5328_v49  ;;  %v4057_v25 = vpop.permute.xlu0 %2930 }
 0x1ad   : > { %v767_v11 = vsel %vm5368_vm4, %v2912_v31, %v2913_v56  ;;  %vm2627_vm9 = vmpackc.low %vm5370_vm13, %vm3858_vm2  ;;  %vm1041_vm4 = vcmp.gt.f32.partialorder %v1040_v36, 0.0  ;;  %v2828_v27 = vunpack.i.h.bf16 %v3549_v42  ;;  %v2827_v5 = vunpack.i.l.bf16 %v3549_v42  ;;  %v1142_v56 = vld [vmem:[#allocation4 + $0x31] ss:$8 sm:$0x3]  ;;  %v2277_v42 = vld [vmem:[%s5120_s5] sm:$0xff] }
 0x1ae   : > { %v2626_v20 = vpack.c.bf16 %v767_v11, %v732_v60  ;;  %vm2630_vm14 = vmpackc.low %vm5372_vm1, %vm5371_vm12  ;;  %v2923_v15 = vunpack.i.h.bf16 %v2921_v59  ;;  %v2922_v3 = vunpack.i.l.bf16 %v2921_v59  ;;  %vm5373_vm10 = vcmask 441344  }
 0x1af   : > { %v801_v12 = vsel %vm5373_vm10, %v3535_v28, %v2917_v58  ;;  %vm5374_vm2 = vmmov %vm5373_vm10  ;;  %vm4033_vm0 = vcmp.eq.s32.totalorder %v923_v17, 1  ;;  %vm4037_vm5 = vcmp.eq.s32.totalorder %v944_v57, 1  ;;  %vm5379_vm13 = vcmask 392192  }
 0x1b0   : > { %v802_v37 = vsel %vm5374_vm2, %v2917_v58, %v2918_v16  ;;  %2628 = vmatprep.subr.msk.bf16.mxu0 %vm2627_vm9, %v2626_v20  ;;  %v836_v4 = vsel %vm5379_vm13, %v3537_v33, %v2922_v3  ;;  %vm5380_vm3 = vmmov %vm5379_vm13  ;;  %v2928_v32 = vunpack.i.h.bf16 %v2926_v43  ;;  %v2927_v14 = vunpack.i.l.bf16 %v2926_v43  ;;  %v989_v21 = vpop.permute.xlu0 %988 }
 0x1b1   : > { %v837_v1 = vsel %vm5380_vm3, %v2922_v3, %v2923_v15  ;;  %2631 = vmatpush1.bf16.msk.msra.mxu0 %vm2630_vm14, %v2629_v24  ;;  %vm2633_vm9 = vmpackc.low %vm3922_vm8, %vm3918_vm7  ;;  %vm4053_vm10 = vcmp.eq.s32.totalorder %v982_v45, 1  ;;  %v2635_v19 = vpack.c.bf16 %v836_v4, %v801_v12  ;;  %vm5383_vm3 = vnez %v5343_v47  ;;  %v955_v24 = vpop.permute.xlu1 %954  ;;  %v1176_v15 = vld [vmem:[#allocation4 + $0x32] ss:$8 sm:$0x3] }
 0x1b2   : > { %v2632_v33 = vpack.c.bf16 %v837_v1, %v802_v37  ;;  %vm2636_vm12 = vmpackc.low %vm5383_vm3, %vm3930_vm15  ;;  %v1042_v29 = vsel %vm1041_vm4, 1, %v5276_v46  ;;  %vm5384_vm1 = vcmp.gt.f32.partialorder %v1074_v26, 0.0  ;;  %vm5385_vm14 = vcmask 1039360  }
 0x1b3   : > { %v1076_v49 = vsel %vm5384_vm1, 1, %v5276_v46  ;;  %v961_v22 = vsel %vm5385_vm14, %v2827_v5, %v2828_v27  ;;  %v2938_v63 = vunpack.i.h.bf16 %v2936_v0  ;;  %v2937_v2 = vunpack.i.l.bf16 %v2936_v0  ;;  %vm2639_vm7 = vmpackc.low %vm3974_vm11, %vm3970_vm6 }
 0x1b4   : > { %v1016_v18 = vrot.slane %v4007_v9, %v3541_v35  ;;  %v2838_v31 = vunpack.i.h.bf16 %v3557_v53  ;;  %v2837_v17 = vunpack.i.l.bf16 %v3557_v53  ;;  %v2833_v57 = vunpack.i.h.bf16 %v3559_v54  ;;  %2634 = vmatprep.subr.msk.bf16.mxu0 %vm2633_vm9, %v2632_v33  ;;  %v1057_v59 = vpop.permute.xlu0 %1056 }
 0x1b5   : > { %v2832_v36 = vunpack.i.l.bf16 %v3559_v54  ;;  %vm5386_vm4 = vcmask 384000   ;;  %vm5388_vm13 = vcmask 375808   ;;  %2637 = vmatpush1.bf16.msk.msra.mxu0 %vm2636_vm12, %v2635_v19  ;;  %vm5390_vm8 = vnez %v5357_v61  ;;  %v1023_v19 = vpop.permute.xlu1 %1022 }
 0x1b6   : > { %v871_v26 = vsel %vm5386_vm4, %v3539_v34, %v2927_v14  ;;  %vm5387_vm2 = vmmov %vm5386_vm4  ;;  %v906_v58 = vsel %vm5388_vm13, %v3547_v41, %v2937_v2  ;;  %vm5391_vm9 = vnez %v5359_v48  ;;  %vm1109_vm4 = vcmp.gt.f32.partialorder %v1108_v44, 0.0  ;;  %v1479_v44 = vld [vmem:[#allocation4 + $0x4] ss:$8 sm:$0x3] }
 0x1b7   : > { %v872_v16 = vsel %vm5387_vm2, %v2927_v14, %v2928_v32  ;;  %vm5389_vm1 = vmmov %vm5388_vm13  ;;  %v2641_v34 = vpack.c.bf16 %v906_v58, %v871_v26  ;;  %vm1143_vm2 = vcmp.gt.f32.partialorder %v1142_v56, 0.0  ;;  %vm5392_vm15 = vnez %v5361_v55  ;;  %v5403_v55 = vld [vmem:[#allocation13_spill] sm:$0xff] }
 0x1b8   : > { %v907_v53 = vsel %vm5389_vm1, %v2937_v2, %v2938_v63  ;;  %vm2642_vm14 = vmpackc.low %vm5391_vm9, %vm5390_vm8  ;;  %vm5393_vm3 = vnez %v5363_v13  ;;  %vm4106_vm13 = vcmp.eq.s32.totalorder %v1016_v18, 1  ;;  %v978_v39 = vrot.slane %v3952_v30, %v3545_v38  ;;  %v1125_v0 = vpop.permute.xlu0 %1124 }
 0x1b9   : > { %v2638_v54 = vpack.c.bf16 %v907_v53, %v872_v16  ;;  %vm2645_vm12 = vmpackc.low %vm5393_vm3, %vm5392_vm15  ;;  %v1012_v47 = vrot.slane %v4007_v9, %v3545_v38  ;;  %v1050_v23 = vrot.slane %v1042_v29, %v3541_v35  ;;  %v2644_v52 = vpack.c.bf16 %v961_v22, %v3443_v6 }
 0x1ba   : > { %v1084_v61 = vrot.slane %v1076_v49, %v3541_v35  ;;  %v1046_v48 = vrot.slane %v1042_v29, %v3545_v38  ;;  %v1080_v45 = vrot.slane %v1076_v49, %v3545_v38  ;;  %vm5396_vm6 = vcmask 982016  }
 0x1bb   : > { %2640 = vmatprep.subr.msk.bf16.mxu0 %vm2639_vm7, %v2638_v54  ;;  %v1029_v40 = vsel %vm5396_vm6, %v2837_v17, %v2838_v31  ;;  %vm5397_vm11 = vcmask 1031168   ;;  %v1110_v30 = vsel %vm1109_vm4, 1, %v5276_v46  ;;  %v1144_v9 = vsel %vm1143_vm2, 1, %v5276_v46  ;;  %vm2648_vm7 = vmpackc.low %vm4037_vm5, %vm4033_vm0 }
 0x1bc   : > { %v995_v60 = vsel %vm5397_vm11, %v2832_v36, %v2833_v57  ;;  %2643 = vmatpush1.bf16.msk.msra.mxu0 %vm2642_vm14, %v2641_v34  ;;  %v2848_v62 = vunpack.i.h.bf16 %v3589_v7  ;;  %v2847_v6 = vunpack.i.l.bf16 %v3589_v7  ;;  %v2843_v11 = vunpack.i.h.bf16 %v3591_v10  ;;  %vm2651_vm14 = vmpackc.low %vm4106_vm13, %vm4053_vm10  ;;  %v1195_v16 = vpop.permute.xlu0 %1194  ;;  %v1959_v7 = vld [vmem:[#allocation2 + $0x18] sm:$0xff] }
 0x1bd   : > { %v2842_v20 = vunpack.i.l.bf16 %v3591_v10  ;;  %2646 = vmatprep.subr.msk.bf16.mxu0 %vm2645_vm12, %v2644_v52  ;;  %vm5398_vm1 = vcmask 1039360   ;;  %vm4139_vm8 = vcmp.eq.s32.totalorder %v978_v39, 1  ;;  %vm4143_vm9 = vcmp.eq.s32.totalorder %v1012_v47, 1 }
 0x1be   : > { %v960_v43 = vsel %vm5398_vm1, %v955_v24, %v2827_v5  ;;  %vm4152_vm4 = vcmp.eq.s32.totalorder %v1050_v23, 1  ;;  %vm4156_vm2 = vcmp.eq.s32.totalorder %v1084_v61, 1  ;;  %v1118_v5 = vrot.slane %v1110_v30, %v3541_v35  ;;  %v1206_v61 = vld [vmem:[%s5235_s2] sm:$0xff]  ;;  %s5437_s2 = smov 62  }
 0x1bf   : > { %v2647_v13 = vpack.c.bf16 %v960_v43, %v5403_v55  ;;  %v2650_v3 = vpack.c.bf16 %v1029_v40, %v995_v60  ;;  %vm4161_vm15 = vcmp.eq.s32.totalorder %v1046_v48, 1  ;;  %vm4165_vm3 = vcmp.eq.s32.totalorder %v1080_v45, 1  ;;  %vm2657_vm0 = vmpackc.low %vm4156_vm2, %vm4152_vm4 }
 0x1c0   : > { %v1152_v4 = vrot.slane %v1144_v9, %v3541_v35  ;;  %vm5412_vm12 = vcmask 965632   ;;  %vm5413_vm6 = vcmask 973824   ;;  %v2943_v14 = vunpack.i.h.bf16 %v4096_v8  ;;  %v1193_v47 = vpop.permute.xlu0 %1192 }
 0x1c1   : > { %v1097_v1 = vsel %vm5412_vm12, %v2847_v6, %v2848_v62  ;;  %v1063_v32 = vsel %vm5413_vm6, %v2842_v20, %v2843_v11  ;;  %v2942_v33 = vunpack.i.l.bf16 %v4096_v8  ;;  %2649 = vmatpush1.bf16.msk.msra.mxu0 %vm2648_vm7, %v2647_v13  ;;  %v994_v29 = vsel %vm5397_vm11, %v989_v21, %v2832_v36  ;;  %vm2654_vm12 = vmpackc.low %vm4143_vm9, %vm4139_vm8  ;;  %v2222_v13 = vld [vmem:[%s5119_s4 + $0x8] sm:$0xff] }
 0x1c2   : > { %vm5414_vm1 = vcmask 982016   ;;  %2652 = vmatprep.subr.msk.bf16.mxu0 %vm2651_vm14, %v2650_v3  ;;  %v1114_v51 = vrot.slane %v1110_v30, %v3545_v38  ;;  %vm1177_vm6 = vcmp.gt.f32.partialorder %v1176_v15, 0.0  ;;  %v2933_v50 = vunpack.i.h.bf16 %v4057_v25  ;;  %vm2660_vm9 = vmpackc.low %vm4165_vm3, %vm4161_vm15 }
 0x1c3   : > { %v1028_v49 = vsel %vm5414_vm1, %v1023_v19, %v2837_v17  ;;  %v2932_v22 = vunpack.i.l.bf16 %v4057_v25  ;;  %v1148_v28 = vrot.slane %v1144_v9, %v3545_v38  ;;  %v2656_v2 = vpack.c.bf16 %v1097_v1, %v1063_v32  ;;  %v1091_v25 = vpop.permute.xlu1 %1090 }
 0x1c4   : > { %v2653_v63 = vpack.c.bf16 %v1028_v49, %v994_v29  ;;  %vm4198_vm5 = vcmp.eq.s32.totalorder %v1118_v5, 1  ;;  %vm4202_vm10 = vcmp.eq.s32.totalorder %v1152_v4, 1  ;;  %vm5419_vm13 = vcmask 908288   ;;  %v1380_v29 = vld [vmem:[#allocation4 + $0x1] ss:$8 sm:$0x3] }
 0x1c5   : > { %v1165_v56 = vsel %vm5419_vm13, %v2942_v33, %v2943_v14  ;;  %v1178_v31 = vsel %vm1177_vm6, 1, %v5276_v46  ;;  %vm5420_vm7 = vcmask 973824   ;;  %vm5421_vm8 = vcmask 965632   ;;  %vm2663_vm4 = vmpackc.low %vm4202_vm10, %vm4198_vm5 }
 0x1c6   : > { %2655 = vmatpush1.bf16.msk.msra.mxu0 %vm2654_vm12, %v2653_v63  ;;  %v1062_v17 = vsel %vm5420_vm7, %v1057_v59, %v2842_v20  ;;  %v1096_v57 = vsel %vm5421_vm8, %v1091_v25, %v2847_v6  ;;  %vm5422_vm14 = vcmask 916480   ;;  %vm4219_vm2 = vcmp.eq.s32.totalorder %v1114_v51, 1  ;;  %vm5426_vm3 = vmmov %vm5419_vm13  ;;  %v1545_v25 = vld [vmem:[#allocation4 + $0x6] ss:$8 sm:$0x3] }
 0x1c7   : > { %2658 = vmatprep.subr.msk.bf16.mxu0 %vm2657_vm0, %v2656_v2  ;;  %v1131_v36 = vsel %vm5422_vm14, %v2932_v22, %v2933_v50  ;;  %v2659_v26 = vpack.c.bf16 %v1096_v57, %v1062_v17  ;;  %vm1153_vm11 = vcmp.eq.s32.totalorder %v1148_v28, 1  ;;  %v1186_v54 = vrot.slane %v1178_v31, %v3541_v35  ;;  %v1159_v34 = vpop.permute.xlu1 %1158  ;;  %vm5425_vm15 = vmmov %vm5422_vm14  ;;  %v1413_v50 = vld [vmem:[#allocation4 + $0x2] ss:$8 sm:$0x3] }
 0x1c8   : > { %v2662_v53 = vpack.c.bf16 %v1165_v56, %v1131_v36  ;;  %v1130_v8 = vsel %vm5425_vm15, %v1125_v0, %v2932_v22  ;;  %v1164_v21 = vsel %vm5426_vm3, %v1159_v34, %v2942_v33  ;;  %vm2666_vm1 = vmpackc.low %vm1153_vm11, %vm4219_vm2  ;;  %v1182_v41 = vrot.slane %v1178_v31, %v3545_v38  ;;  %v1360_v0 = vld [vmem:[#allocation4] ss:$8 sm:$0x3]  ;;  %v1446_v22 = vld [vmem:[#allocation4 + $0x3] ss:$8 sm:$0x3] }
 0x1c9   : > { %v2665_v39 = vpack.c.bf16 %v1164_v21, %v1130_v8  ;;  %vm1188_vm12 = vcmp.eq.s32.totalorder %v1186_v54, 1  ;;  %vm5427_vm6 = vcmask 900096   ;;  %vm5430_vm10 = vcmask 1048136   ;;  %v1512_v56 = vld [vmem:[#allocation4 + $0x5] ss:$8 sm:$0x3] }
 0x1ca   : > { %2661 = vmatpush1.bf16.msk.msra.mxu0 %vm2660_vm9, %v2659_v26  ;;  %vm1187_vm0 = vcmp.eq.s32.totalorder %v1182_v41, 1  ;;  %vm5428_vm5 = vmmov %vm5427_vm6  ;;  %vm5431_vm13 = vcmask 596992   ;;  %vm5440_vm8 = vcmask 719872   ;;  %vm1361_vm9 = vcmp.gt.f32.partialorder %v1360_v0, 0.0 }
 0x1cb   : > { %2664 = vmatprep.subr.msk.bf16.mxu0 %vm2663_vm4, %v2662_v53  ;;  %v1197_v23 = vpop.permute.xlu1 %1196  ;;  %v1198_v48 = vsel %vm5428_vm5, %v1193_v47, %v1195_v16  ;;  %vm5433_vm7 = vmmov %vm5431_vm13  ;;  %2474 = vmatprep.mubr.msk.f32.mxu1 %vm5440_vm8, %v2222_v13  ;;  %vm1381_vm14 = vcmp.gt.f32.partialorder %v1380_v29, 0.0  ;;  %v1362_v2 = vsel %vm1361_vm9, 1, %v5276_v46  ;;  %vm1414_vm4 = vcmp.gt.f32.partialorder %v1413_v50, 0.0  ;;  %v1578_v31 = vld [vmem:[#allocation4 + $0x7] ss:$8 sm:$0x3] }
 0x1cc   : > { %v1199_v52 = vsel %vm5427_vm6, %v1195_v16, %v1197_v23  ;;  %v1382_v18 = vsel %vm1381_vm14, 1, %v5276_v46  ;;  %vm1447_vm2 = vcmp.gt.f32.partialorder %v1446_v22, 0.0  ;;  %v1370_v36 = vrot.slane %v1362_v2, %v3541_v35  ;;  %v1611_v34 = vld [vmem:[#allocation4 + $0x10] ss:$8 sm:$0x3] }
 0x1cd   : > { %v1390_v26 = vrot.slane %v1382_v18, %v3541_v35  ;;  %v1366_v16 = vrot.slane %v1362_v2, %v3545_v38  ;;  %v1386_v58 = vrot.slane %v1382_v18, %v3545_v38  ;;  %v1415_v53 = vsel %vm1414_vm4, 1, %v5276_v46  ;;  %v1644_v8 = vld [vmem:[#allocation4 + $0x11] ss:$8 sm:$0x3] }
 0x1ce   : > { %2667 = vmatpush1.bf16.msk.msra.mxu0 %vm2666_vm1, %v2665_v39  ;;  %v1448_v54 = vsel %vm1447_vm2, 1, %v5276_v46  ;;  %vm1480_vm11 = vcmp.gt.f32.partialorder %v1479_v44, 0.0  ;;  %vm1513_vm15 = vcmp.gt.f32.partialorder %v1512_v56, 0.0  ;;  %vm1546_vm3 = vcmp.gt.f32.partialorder %v1545_v25, 0.0 }
 0x1cf   : > { %2534 = vmatprep.subr.msk.mxu0 %vm1188_vm12, %v1199_v52  ;;  %v1266_v45 = vpop.permute.xlu1 %1265  ;;  %vm1579_vm1 = vcmp.gt.f32.partialorder %v1578_v31, 0.0  ;;  %vm4380_vm12 = vcmp.eq.s32.totalorder %v1370_v36, 1  ;;  %vm4384_vm6 = vcmp.eq.s32.totalorder %v1390_v26, 1  ;;  %v1423_v23 = vrot.slane %v1415_v53, %v3541_v35  ;;  %v1743_v0 = vld [vmem:[#allocation4 + $0x14] ss:$8 sm:$0x3] }
 0x1d0   : > { %v1456_v52 = vrot.slane %v1448_v54, %v3541_v35  ;;  %vm4400_vm5 = vcmp.eq.s32.totalorder %v1386_v58, 1  ;;  %v1776_v29 = vld [vmem:[#allocation4 + $0x15] ss:$8 sm:$0x3] }
 0x1d1   : > { %vm4412_vm9 = vcmp.eq.s32.totalorder %v1423_v23, 1  ;;  %v1875_v39 = vld [vmem:[#allocation4 + $0x20] ss:$8 sm:$0x3] }
 0x1d2   : > { %2535 = vmatpush1.msk.msra.mxu0 %vm1187_vm0, %v1198_v48  ;;  %v1710_v48 = vld [vmem:[#allocation4 + $0x13] ss:$8 sm:$0x3]  ;;  %vm4396_vm0 = vcmp.eq.s32.totalorder %v1366_v16, 1  ;;  %vm4416_vm14 = vcmp.eq.s32.totalorder %v1456_v52, 1 }
 0x1d3   : > { %1337 = vmatmul.mubr.f32.vlgmr.msra.gmra.mrb[0].mxu0 %v1206_v61  ;;  %v1677_v61 = vld [vmem:[#allocation4 + $0x12] ss:$8 sm:$0x3]  ;;  %vm1711_vm8 = vcmp.gt.f32.partialorder %v1710_v48, 0.0 }
 0x1d4   : > { %v4448_v26 = vsel %vm1711_vm8, 1, %v5276_v46  ;;  %vm2669_vm8 = vmpackc.low %vm4384_vm6, %vm4380_vm12  ;;  %v1908_v47 = vld [vmem:[#allocation4 + $0x21] ss:$8 sm:$0x3] }
 0x1d5   : > { %vm5483_vm12 = vmpackc.low %vm4400_vm5, %vm4396_vm0  ;;  %v5503_v22 = vrot.slane %v4448_v26, %v3541_v35 }
 0x1d6   : > { %vm2675_vm6 = vmpackc.low %vm4416_vm14, %vm4412_vm9 }
 0x2a6   : > { %v1338_v40 = vpop.f32.mrb[0].mxu0 }
 0x2a7   : > { %v1339_v60 = vadd.f32 %v1338_v40, %v1266_v45  ;;  %v1340_v30 = vpop.f32.mrb[1].mxu0  ;;  %v1452_v40 = vrot.slane %v1448_v54, %v3545_v38 }
 0x2a8   : > { %v1341_v9 = vadd.f32 %v1340_v30, %v1266_v45  ;;  %v1419_v45 = vrot.slane %v1415_v53, %v3545_v38  ;;  %v1514_v30 = vsel %vm1513_vm15, 1, %v5276_v46  ;;  %vm1777_vm15 = vcmp.gt.f32.partialorder %v1776_v29, 0.0 }
 0x2a9   : > { %v1343_v62 = vmax.f32 %v1339_v60, 0.0  ;;  %v1481_v60 = vsel %vm1480_vm11, 1, %v5276_v46  ;;  %vm4426_vm2 = vcmp.eq.s32.totalorder %v1452_v40, 1  ;;  %v1518_v18 = vrot.slane %v1514_v30, %v3545_v38  ;;  %v1842_v40 = vld [vmem:[#allocation4 + $0x17] ss:$8 sm:$0x3] }
 0x2aa   : > { %v1344_v6 = vmax.f32 %v1341_v9, 0.0  ;;  %v1489_v13 = vrot.slane %v1481_v60, %v3541_v35  ;;  %vm4422_vm4 = vcmp.eq.s32.totalorder %v1419_v45, 1  ;;  %v1485_v2 = vrot.slane %v1481_v60, %v3545_v38  ;;  %v1809_v45 = vld [vmem:[#allocation4 + $0x16] ss:$8 sm:$0x3] }
 0x2ab   : > { %1347 = vrot.lane.b32.xlu0 %v1343_v62, %s5429_s0  ;;  %vm1744_vm11 = vcmp.gt.f32.partialorder %v1743_v0, 0.0  ;;  %v5486_v9 = vmov 0 }
 0x2ac   : > { %1349 = vrot.lane.b32.xlu1 %v1344_v6, %s5429_s0  ;;  %s5436_s0 = smov 63   ;;  %v1547_v6 = vsel %vm1546_vm3, 1, %v5276_v46  ;;  %vm4452_vm3 = vcmp.eq.s32.totalorder %v1489_v13, 1 }
 0x2ad   : > { %v1555_v25 = vrot.slane %v1547_v6, %v3541_v35  ;;  %v1551_v16 = vrot.slane %v1547_v6, %v3545_v38  ;;  %v5463_v6 = vmov 0 }
 0x31d   : > { %v1348_v11 = vpop.permute.xlu0 %1347 }
 0x31e   : > { %1355 = vst.msk [vmem:[#allocation2] sm:$0xff] %vm5430_vm10, %v1348_v11  ;;  %v1350_v20 = vpop.permute.xlu1 %1349  ;;  %vm1612_vm10 = vcmp.gt.f32.partialorder %v1611_v34, 0.0  ;;  %v2026_v34 = vld [vmem:[#allocation4 + $0x25] ss:$8 sm:$0x3] }
 0x31f   : > { %v4238_v24 = vsel %vm5431_vm13, %v1348_v11, %v1350_v20  ;;  %1357 = vst.msk [vmem:[#allocation2 + $0x10] sm:$0xff] %vm5433_vm7, %v1350_v20  ;;  %vm1645_vm13 = vcmp.gt.f32.partialorder %v1644_v8, 0.0  ;;  %v1580_v11 = vsel %vm1579_vm1, 1, %v5276_v46  ;;  %vm1678_vm7 = vcmp.gt.f32.partialorder %v1677_v61, 0.0 }
 0x320   : > { %5432 = vst [vmem:[#allocation13_spill] sm:$0xff] %v4238_v24  ;;  %v4434_v44 = vsel %vm1612_vm10, 1, %v5276_v46  ;;  %v4438_v56 = vsel %vm1645_vm13, 1, %v5276_v46  ;;  %v1588_v31 = vrot.slane %v1580_v11, %v3541_v35  ;;  %v4444_v36 = vsel %vm1678_vm7, 1, %v5276_v46 }
 0x321   : > { %v1584_v58 = vrot.slane %v1580_v11, %v3545_v38  ;;  %v5461_v8 = vmov 0  ;;  %v1621_v23 = vrot.slane %v4434_v44, %v3541_v35  ;;  %v1654_v52 = vrot.slane %v4438_v56, %v3541_v35 }
 0x322   : > { %v1617_v61 = vrot.slane %v4434_v44, %v3545_v38  ;;  %v1650_v48 = vrot.slane %v4438_v56, %v3545_v38  ;;  %vm4468_vm10 = vcmp.eq.s32.totalorder %v1485_v2, 1  ;;  %vm4472_vm13 = vcmp.eq.s32.totalorder %v1518_v18, 1 }
 0x323   : > { %v5464_v6 = vsel %vm4468_vm10, 4294967295, %v5463_v6  ;;  %v5465_v11 = vmov 0  ;;  %v4486_v2 = vsel %vm1777_vm15, 1, %v5276_v46  ;;  %vm5467_vm7 = vcmask 1039360  }
 0x324   : > { %v5466_v11 = vsel %vm4472_vm13, 4294967295, %v5465_v11  ;;  %vm5468_vm13 = vmmov %vm5467_vm7  ;;  %vm4501_vm15 = vcmp.eq.s32.totalorder %v1555_v25, 1  ;;  %v5475_v25 = vmov 0  ;;  %vm4561_vm0 = vcmp.eq.s32.totalorder %v1654_v52, 1 }
 0x325   : > { %v4241_v59 = vld [vmem:[#allocation2] sm:$0xff]  ;;  %v5487_v9 = vsel %vm4561_vm0, 4294967295, %v5486_v9  ;;  %vm4569_vm5 = vcmp.eq.s32.totalorder %v1617_v61, 1  ;;  %vm5496_vm0 = vmpackc.low %vm4426_vm2, %vm4422_vm4  ;;  %vm4615_vm2 = vcmp.eq.s32.totalorder %v5503_v22, 1 }
 0x326   : > { %1429 = vrot.lane.b32.xlu0 %v4241_v59, %s5434_s17  ;;  %1396 = vrot.lane.b32.xlu1 %v4241_v59, %s5233_s11  ;;  %v4271_v43 = vld [vmem:[#allocation2 + $0x10] sm:$0xff] }
 0x327   : > { %5439 = vst [vmem:[#allocation14_spill] sm:$0xff] %v4271_v43  ;;  %v2945_v10 = vpack.i.bf16 %v1959_v7, %v4271_v43  ;;  %v2980_v55 = vpack.i.bf16 %v4271_v43, %v4238_v24 }
 0x32a   : > { %1495 = vrot.lane.b32.xlu0 %v4241_v59, %s5232_s7  ;;  %1462 = vrot.lane.b32.xlu1 %v4241_v59, %s5234_s18 }
 0x32e   : > { %1561 = vrot.lane.b32.xlu0 %v4241_v59, %s5435_s15  ;;  %1528 = vrot.lane.b32.xlu1 %v4241_v59, %s5237_s1 }
 0x332   : > { %1627 = vrot.lane.b32.xlu0 %v4241_v59, %s5236_s27  ;;  %1594 = vrot.lane.b32.xlu1 %v4241_v59, %s5225_s29 }
 0x336   : > { %1693 = vrot.lane.b32.xlu0 %v4241_v59, %s5436_s0  ;;  %1660 = vrot.lane.b32.xlu1 %v4241_v59, %s5226_s12 }
 0x33a   : > { %1759 = vrot.lane.b32.xlu0 %v4241_v59, %s5227_s30  ;;  %1726 = vrot.lane.b32.xlu1 %v4241_v59, %s5437_s2 }
 0x33e   : > { %1825 = vrot.lane.b32.xlu0 %v4241_v59, %s5228_s10  ;;  %1792 = vrot.lane.b32.xlu1 %v4241_v59, %s5438_s3 }
 0x342   : > { %1891 = vrot.lane.b32.xlu0 %v4241_v59, %s5229_s16  ;;  %1858 = vrot.lane.b32.xlu1 %v4241_v59, %s5230_s20 }
 0x346   : > { %2946 = vrot.lane.b32.xlu0 %v2945_v10, %s5233_s11  ;;  %1924 = vrot.lane.b32.xlu1 %v4241_v59, %s5231_s8 }
 0x34a   : > { %2951 = vrot.lane.b32.xlu0 %v2945_v10, %s5434_s17  ;;  %2956 = vrot.lane.b32.xlu1 %v2945_v10, %s5234_s18 }
 0x34e   : > { %2961 = vrot.lane.b32.xlu0 %v2945_v10, %s5232_s7  ;;  %2966 = vrot.lane.b32.xlu1 %v2945_v10, %s5237_s1 }
 0x352   : > { %2981 = vrot.lane.b32.xlu1 %v2980_v55, %s5234_s18  ;;  %2971 = vrot.lane.b32.xlu0 %v2980_v55, %s5233_s11 }
 0x356   : > { %2991 = vrot.lane.b32.xlu1 %v2980_v55, %s5237_s1  ;;  %2976 = vrot.lane.b32.xlu0 %v2980_v55, %s5434_s17 }
 0x35a   : > { %3001 = vrot.lane.b32.xlu1 %v2980_v55, %s5225_s29  ;;  %2986 = vrot.lane.b32.xlu0 %v2980_v55, %s5232_s7 }
 0x35e   : > { %3011 = vrot.lane.b32.xlu1 %v2980_v55, %s5226_s12  ;;  %2996 = vrot.lane.b32.xlu0 %v2980_v55, %s5435_s15  ;;  %s3219_s12 = smov [#allocation9]  }
 0x362   : > { %3021 = vrot.lane.b32.xlu1 %v2980_v55, %s5437_s2  ;;  %3006 = vrot.lane.b32.xlu0 %v2980_v55, %s5236_s27 }
 0x366   : > { %3031 = vrot.lane.b32.xlu1 %v2980_v55, %s5438_s3  ;;  %3016 = vrot.lane.b32.xlu0 %v2980_v55, %s5436_s0 }
 0x36a   : > { %3041 = vrot.lane.b32.xlu1 %v2980_v55, %s5230_s20  ;;  %3026 = vrot.lane.b32.xlu0 %v2980_v55, %s5227_s30  ;;  %s5633_s20 = sshll.u32 %s3395_s26, 4 }
 0x36e   : > { %3056 = vrot.lane.b32.xlu1 %v2980_v55, %s5231_s8  ;;  %3036 = vrot.lane.b32.xlu0 %v2980_v55, %s5228_s10  ;;  %s2481_s10 = sshll.u32 %s3276_s25, 8 }
 0x36f   : > { %s5071_s30 = scalar_lea.hbm %s5121_s6, %s2481_s10 }
 0x372   : > { %3061 = vrot.lane.b32.xlu1 %v2945_v10, %s5225_s29  ;;  %3046 = vrot.lane.b32.xlu0 %v2980_v55, %s5229_s16  ;;  %s282_s16 = scalar_lea.vmem [#allocation9], %s5633_s20 }
 0x373   : > { %s2380_s8 = sshll.u32 %s282_s16, 4  ;;  %s5073_s8 = int_to_ptr.vmem [resolvable:$true] %s2380_s8 }
 0x374   : > { %s3124_s25 = scalar_lea.vmem %s5073_s8, 256 }
 0x375   : > { %p3125_p4 = scmp.ne.s32.totalorder %s5073_s8, %s3124_s25 }
 0x376   : > { %1976 = vrot.lane.b32.xlu1 %v4238_v24, %s5233_s11  ;;  %3051 = vrot.lane.b32.xlu0 %v2945_v10, %s5435_s15  ;;  %v1940_v10 = vld [vmem:[#allocation4 + $0x22] ss:$8 sm:$0x3] }
 0x377   : > { %p3126_p6 = pnand %p3125_p4, %p3346_p12 }
 0x379   : > { %p3127_p8 = pneg %p3126_p6 }
 0x37a   : > { %2042 = vrot.lane.b32.xlu1 %v4238_v24, %s5234_s18  ;;  %2009 = vrot.lane.b32.xlu0 %v4238_v24, %s5434_s17  ;;  %s3128_s17 = sshll.u32 %s3219_s12, 4  ;;  %s3129_s17 = int_to_ptr.vmem [resolvable:$false] %s3128_s17 }
 0x37b   : > { %p3131_p10 = scmp.lt.s32.totalorder %s5073_s8, %s3129_s17 }
 0x37e   : > { %2108 = vrot.lane.b32.xlu1 %v4238_v24, %s5237_s1  ;;  %2075 = vrot.lane.b32.xlu0 %v4238_v24, %s5232_s7 }
 0x382   : > { %2174 = vrot.lane.b32.xlu1 %v4238_v24, %s5225_s29  ;;  %2141 = vrot.lane.b32.xlu0 %v4238_v24, %s5435_s15  ;;  %s3130_s15 = scalar_lea.vmem %s3129_s17, 512 }
 0x383   : > { %p3132_p13 = scmp.lt.s32.totalorder %s3130_s15, %s3124_s25 }
 0x385   : > { %p3133_p3 = por %p3132_p13, %p3131_p10 }
 0x386   : > { %2211 = vrot.lane.b32.xlu1 %v1959_v7, %s5236_s27  ;;  %2209 = vrot.lane.b32.xlu0 %v4271_v43, %s5236_s27 }
 0x387   : > { %p3134_p7 = pnand %p3133_p3, %p3127_p8 }
 0x38a   : > { %2280 = vperm.xlu1 %2944, %v2277_v42   ;;  %2207 = vrot.lane.b32.xlu0 %v4238_v24, %s5236_s27  ;;  %v1522_v42 = vrot.slane %v1514_v30, %v3541_v35 }
 0x38c   : > { %vm4456_vm1 = vcmp.eq.s32.totalorder %v1522_v42, 1 }
 0x38d   : > { %v5462_v8 = vsel %vm4456_vm1, 4294967295, %v5461_v8  ;;  %vm5477_vm1 = vcmask 982016  }
 0x38e   : > { %vm5478_vm10 = vmmov %vm5477_vm1  ;;  %vm5497_vm9 = vnez %v5462_v8 }
 0x38f   : > { %vm2681_vm14 = vmpackc.low %vm5497_vm9, %vm4452_vm3 }
 0x398   : > { %v4332_v27 = vpop.permute.xlu0 %1429  ;;  %v4334_v5 = vpop.permute.xlu1 %1396 }
 0x39c   : > { %v4336_v15 = vpop.permute.xlu0 %1495  ;;  %v4338_v3 = vpop.permute.xlu1 %1462 }
 0x3a0   : > { %v4340_v12 = vpop.permute.xlu0 %1561  ;;  %v4342_v37 = vpop.permute.xlu1 %1528 }
 0x3a4   : > { %v4344_v4 = vpop.permute.xlu0 %1627  ;;  %v4346_v1 = vpop.permute.xlu1 %1594 }
 0x3a8   : > { %v4348_v32 = vpop.permute.xlu0 %1693  ;;  %v4350_v14 = vpop.permute.xlu1 %1660 }
 0x3ac   : > { %v4352_v33 = vpop.permute.xlu0 %1759  ;;  %v4354_v19 = vpop.permute.xlu1 %1726 }
 0x3b0   : > { %v4356_v49 = vpop.permute.xlu0 %1825  ;;  %v4358_v51 = vpop.permute.xlu1 %1792 }
 0x3b4   : > { %v4360_v63 = vpop.permute.xlu0 %1891  ;;  %v4362_v28 = vpop.permute.xlu1 %1858 }
 0x3b8   : > { %v4366_v17 = vpop.permute.xlu0 %2946  ;;  %v4368_v57 = vpop.permute.xlu1 %1924 }
 0x3bc   : > { %v4376_v21 = vpop.permute.xlu0 %2951  ;;  %v4378_v41 = vpop.permute.xlu1 %2956 }
 0x3c0   : > { %v4408_v20 = vpop.permute.xlu0 %2961  ;;  %v4410_v7 = vpop.permute.xlu1 %2966 }
 0x3c1   : > { %5449 = vst [vmem:[#allocation15_spill] sm:$0xff] %v4408_v20  ;;  %5450 = vst [vmem:[#allocation16_spill] sm:$0xff] %v4410_v7  ;;  %v4482_v7 = vsel %vm1744_vm11, 1, %v5276_v46  ;;  %vm4517_vm11 = vcmp.eq.s32.totalorder %v1584_v58, 1 }
 0x3c2   : > { %v5476_v25 = vsel %vm4517_vm11, 4294967295, %v5475_v25  ;;  %vm5480_vm11 = vcmp.gt.f32.partialorder %v1842_v40, 0.0  ;;  %v1749_v62 = vrot.slane %v4482_v7, %v3545_v38 }
 0x3c3   : > { %v4539_v58 = vsel %vm5480_vm11, 1, %v5276_v46  ;;  %vm4557_vm11 = vcmp.eq.s32.totalorder %v1621_v23, 1  ;;  %v5490_v23 = vmov 0 }
 0x3c4   : > { %v2982_v53 = vpop.permute.xlu1 %2981  ;;  %v2972_v54 = vpop.permute.xlu0 %2971 }
 0x3c5   : > { %v2974_v60 = vunpack.i.h.bf16 %v2972_v54  ;;  %v2973_v30 = vunpack.i.l.bf16 %v2972_v54  ;;  %v2984_v44 = vunpack.i.h.bf16 %v2982_v53  ;;  %v2983_v56 = vunpack.i.l.bf16 %v2982_v53 }
 0x3c7   : > { %v1403_v18 = vsel %vm5467_vm7, %v2973_v30, %v2974_v60  ;;  %v1402_v54 = vsel %vm5468_vm13, %v4334_v5, %v2973_v30  ;;  %vm4505_vm7 = vcmp.eq.s32.totalorder %v1588_v31, 1  ;;  %v1683_v5 = vrot.slane %v4444_v36, %v3545_v38 }
 0x3c8   : > { %v2992_v53 = vpop.permute.xlu1 %2991  ;;  %v2977_v0 = vpop.permute.xlu0 %2976  ;;  %v2668_v42 = vpack.c.bf16 %v1403_v18, %v4238_v24  ;;  %v2671_v29 = vpack.c.bf16 %v1402_v54, %v4241_v59  ;;  %v1716_v30 = vrot.slane %v4448_v26, %v3545_v38  ;;  %vm4513_vm13 = vcmp.eq.s32.totalorder %v1551_v16, 1  ;;  %vm2687_vm3 = vmpackc.low %vm4505_vm7, %vm4501_vm15 }
 0x3c9   : > { %v2979_v59 = vunpack.i.h.bf16 %v2977_v0  ;;  %v2978_v18 = vunpack.i.l.bf16 %v2977_v0  ;;  %v5473_v54 = vmov 0  ;;  %v1753_v31 = vrot.slane %v4482_v7, %v3541_v35 }
 0x3ca   : > { %v5474_v54 = vsel %vm4513_vm13, 4294967295, %v5473_v54  ;;  %v1468_v20 = vsel %vm5477_vm1, %v4338_v3, %v2983_v56  ;;  %v1469_v43 = vsel %vm5478_vm10, %v2983_v56, %v2984_v44  ;;  %2670 = vmatprep.subr.msk.bf16.mxu1 %vm2669_vm8, %v2668_v42  ;;  %vm5479_vm13 = vcmp.gt.f32.partialorder %v1809_v45, 0.0 }
 0x3cb   : > { %v4535_v16 = vsel %vm5479_vm13, 1, %v5276_v46  ;;  %v2994_v0 = vunpack.i.h.bf16 %v2992_v53  ;;  %v2993_v24 = vunpack.i.l.bf16 %v2992_v53  ;;  %vm5481_vm1 = vcmask 1031168   ;;  %2673 = vmatpush1.bf16.msk.msra.mxu1 %vm5483_vm12, %v2671_v29 }
 0x3cc   : > { %v1435_v3 = vsel %vm5481_vm1, %v4332_v27, %v2978_v18  ;;  %vm5482_vm10 = vmmov %vm5481_vm1  ;;  %v3002_v42 = vpop.permute.xlu1 %3001  ;;  %v2987_v56 = vpop.permute.xlu0 %2986  ;;  %v5488_v29 = vmov 0  ;;  %vm4573_vm13 = vcmp.eq.s32.totalorder %v1650_v48, 1  ;;  %v1819_v52 = vrot.slane %v4535_v16, %v3541_v35  ;;  %v2059_v27 = vld [vmem:[#allocation4 + $0x26] ss:$8 sm:$0x3] }
 0x3cd   : > { %v1436_v44 = vsel %vm5482_vm10, %v2978_v18, %v2979_v59  ;;  %v2677_v40 = vpack.c.bf16 %v1468_v20, %v1435_v3  ;;  %v2989_v20 = vunpack.i.h.bf16 %v2987_v56  ;;  %v2988_v53 = vunpack.i.l.bf16 %v2987_v56 }
 0x3ce   : > { %v2674_v45 = vpack.c.bf16 %v1469_v43, %v1436_v44  ;;  %v1782_v43 = vrot.slane %v4486_v2, %v3545_v38  ;;  %v5489_v29 = vsel %vm4569_vm5, 4294967295, %v5488_v29  ;;  %v5491_v23 = vsel %vm4573_vm13, 4294967295, %v5490_v23 }
 0x3cf   : > { %v1852_v59 = vrot.slane %v4539_v58, %v3541_v35  ;;  %v3004_v18 = vunpack.i.h.bf16 %v3002_v42  ;;  %v3003_v3 = vunpack.i.l.bf16 %v3002_v42  ;;  %vm1876_vm1 = vcmp.gt.f32.partialorder %v1875_v39, 0.0 }
 0x3d0   : > { %2676 = vmatprep.subr.msk.bf16.mxu1 %vm2675_vm6, %v2674_v45  ;;  %vm1909_vm10 = vcmp.gt.f32.partialorder %v1908_v47, 0.0  ;;  %vm5492_vm12 = vcmask 965632   ;;  %vm5494_vm13 = vcmask 973824   ;;  %v2997_v45 = vpop.permute.xlu0 %2996  ;;  %vm5498_vm6 = vnez %v5464_v6 }
 0x3d1   : > { %v1534_v61 = vsel %vm5492_vm12, %v4342_v37, %v2993_v24  ;;  %vm5493_vm8 = vmmov %vm5492_vm12  ;;  %v1501_v44 = vsel %vm5494_vm13, %v4336_v15, %v2988_v53  ;;  %2679 = vmatpush1.bf16.msk.msra.mxu1 %vm5496_vm0, %v2677_v40  ;;  %v1960_v37 = vld [vmem:[#allocation4 + $0x23] ss:$8 sm:$0x3]  ;;  %v5500_v15 = vrot.slane %v4444_v36, %v3541_v35  ;;  %v1815_v42 = vrot.slane %v4535_v16, %v3545_v38 }
 0x3d2   : > { %v1535_v48 = vsel %vm5493_vm8, %v2993_v24, %v2994_v0  ;;  %vm5495_vm5 = vmmov %vm5494_vm13  ;;  %v2683_v24 = vpack.c.bf16 %v1534_v61, %v1501_v44  ;;  %v3012_v0 = vpop.permute.xlu1 %3011  ;;  %vm5499_vm8 = vnez %v5466_v11  ;;  %v2998_v61 = vunpack.i.l.bf16 %v2997_v45 }
 0x3d3   : > { %v1502_v56 = vsel %vm5495_vm5, %v2988_v53, %v2989_v20  ;;  %vm4608_vm4 = vcmp.eq.s32.totalorder %v5500_v15, 1  ;;  %v1848_v20 = vrot.slane %v4539_v58, %v3545_v38  ;;  %v2999_v53 = vunpack.i.h.bf16 %v2997_v45 }
 0x3d4   : > { %v2680_v55 = vpack.c.bf16 %v1535_v48, %v1502_v56  ;;  %vm4623_vm0 = vcmp.eq.s32.totalorder %v1683_v5, 1  ;;  %v5506_v36 = vmov 0  ;;  %vm4627_vm13 = vcmp.eq.s32.totalorder %v1716_v30, 1 }
 0x3d5   : > { %v5507_v36 = vsel %vm4623_vm0, 4294967295, %v5506_v36  ;;  %v5508_v48 = vmov 0  ;;  %v4633_v26 = vsel %vm1876_vm1, 1, %v5276_v46  ;;  %v4637_v44 = vsel %vm1909_vm10, 1, %v5276_v46 }
 0x3d6   : > { %v5509_v48 = vsel %vm4627_vm13, 4294967295, %v5508_v48  ;;  %vm5510_vm12 = vcmask 908288   ;;  %2682 = vmatprep.subr.msk.bf16.mxu1 %vm2681_vm14, %v2680_v55  ;;  %vm1941_vm13 = vcmp.gt.f32.partialorder %v1940_v10, 0.0  ;;  %vm1961_vm0 = vcmp.gt.f32.partialorder %v1960_v37, 0.0  ;;  %v3007_v55 = vpop.permute.xlu0 %3006 }
 0x3d7   : > { %v1600_v56 = vsel %vm5510_vm12, %v4346_v1, %v3003_v3  ;;  %vm5511_vm5 = vmmov %vm5510_vm12  ;;  %v3014_v30 = vunpack.i.h.bf16 %v3012_v0  ;;  %v3013_v39 = vunpack.i.l.bf16 %v3012_v0  ;;  %vm5512_vm1 = vcmask 916480   ;;  %v1993_v1 = vld [vmem:[#allocation4 + $0x24] ss:$8 sm:$0x3] }
 0x3d8   : > { %v1601_v5 = vsel %vm5511_vm5, %v3003_v3, %v3004_v18  ;;  %v1567_v47 = vsel %vm5512_vm1, %v4340_v12, %v2998_v61  ;;  %vm5513_vm10 = vmmov %vm5512_vm1  ;;  %v3022_v3 = vpop.permute.xlu1 %3021  ;;  %vm5515_vm9 = vnez %v5474_v54  ;;  %vm5516_vm14 = vnez %v5476_v25 }
 0x3d9   : > { %v1568_v45 = vsel %vm5513_vm10, %v2998_v61, %v2999_v53  ;;  %vm5514_vm5 = vmpackc.low %vm5499_vm8, %vm5498_vm6  ;;  %v2689_v18 = vpack.c.bf16 %v1600_v56, %v1567_v47  ;;  %vm4666_vm6 = vcmp.eq.s32.totalorder %v1753_v31, 1  ;;  %v5519_v6 = vrot.slane %v4486_v2, %v3541_v35 }
 0x3da   : > { %2685 = vmatpush1.bf16.msk.msra.mxu1 %vm5514_vm5, %v2683_v24  ;;  %v2686_v8 = vpack.c.bf16 %v1601_v5, %v1568_v45  ;;  %v5520_v11 = vmov 0  ;;  %v1885_v24 = vrot.slane %v4633_v26, %v3541_v35  ;;  %v1918_v0 = vrot.slane %v4637_v44, %v3541_v35  ;;  %v3017_v5 = vpop.permute.xlu0 %3016 }
 0x3db   : > { %vm4673_vm8 = vcmp.eq.s32.totalorder %v5519_v6, 1  ;;  %v3009_v15 = vunpack.i.h.bf16 %v3007_v55  ;;  %v3008_v22 = vunpack.i.l.bf16 %v3007_v55  ;;  %vm4681_vm1 = vcmp.eq.s32.totalorder %v1749_v62, 1 }
 0x3dc   : > { %v5521_v11 = vsel %vm4673_vm8, 4294967295, %v5520_v11  ;;  %v5522_v7 = vmov 0  ;;  %vm4685_vm10 = vcmp.eq.s32.totalorder %v1782_v43, 1  ;;  %v5524_v31 = vmov 0  ;;  %2688 = vmatprep.subr.msk.bf16.mxu1 %vm2687_vm3, %v2686_v8  ;;  %vm5530_vm8 = vmpackc.low %vm5516_vm14, %vm5515_vm9  ;;  %v3032_v60 = vpop.permute.xlu1 %3031 }
 0x3dd   : > { %v5523_v7 = vsel %vm4681_vm1, 4294967295, %v5522_v7  ;;  %v5525_v31 = vsel %vm4685_vm10, 4294967295, %v5524_v31  ;;  %v4691_v2 = vsel %vm1941_vm13, 1, %v5276_v46  ;;  %v4695_v53 = vsel %vm1961_vm0, 1, %v5276_v46 }
 0x3de   : > { %v3024_v61 = vunpack.i.h.bf16 %v3022_v3  ;;  %v3023_v56 = vunpack.i.l.bf16 %v3022_v3  ;;  %vm1994_vm5 = vcmp.gt.f32.partialorder %v1993_v1, 0.0  ;;  %vm2027_vm12 = vcmp.gt.f32.partialorder %v2026_v34, 0.0  ;;  %2691 = vmatpush1.bf16.msk.msra.mxu1 %vm5530_vm8, %v2689_v18  ;;  %v3027_v3 = vpop.permute.xlu0 %3026 }
 0x3df   : > { %vm5526_vm10 = vcmask 523264   ;;  %vm5528_vm13 = vcmask 900096   ;;  %vm5531_vm15 = vnez %v5487_v9  ;;  %vm5532_vm3 = vnez %v5489_v29 }
 0x3e0   : > { %v1666_v62 = vsel %vm5526_vm10, %v4350_v14, %v3013_v39  ;;  %vm5527_vm1 = vmmov %vm5526_vm10  ;;  %v1633_v10 = vsel %vm5528_vm13, %v4344_v4, %v3008_v22  ;;  %vm4731_vm9 = vcmp.eq.s32.totalorder %v1852_v59, 1  ;;  %v1881_v25 = vrot.slane %v4633_v26, %v3545_v38  ;;  %v3042_v34 = vpop.permute.xlu1 %3041 }
 0x3e1   : > { %v1667_v43 = vsel %vm5527_vm1, %v3013_v39, %v3014_v30  ;;  %vm5529_vm0 = vmmov %vm5528_vm13  ;;  %v2695_v14 = vpack.c.bf16 %v1666_v62, %v1633_v10  ;;  %vm5533_vm1 = vnez %v5491_v23  ;;  %vm4724_vm13 = vcmp.eq.s32.totalorder %v1819_v52, 1 }
 0x3e2   : > { %v1634_v37 = vsel %vm5529_vm0, %v3008_v22, %v3009_v15  ;;  %vm2693_vm7 = vmpackc.low %vm5531_vm15, %vm4557_vm11  ;;  %v1914_v30 = vrot.slane %v4637_v44, %v3545_v38  ;;  %v3019_v39 = vunpack.i.h.bf16 %v3017_v5  ;;  %v3018_v47 = vunpack.i.l.bf16 %v3017_v5  ;;  %v3037_v5 = vpop.permute.xlu0 %3036 }
 0x3e3   : > { %v2692_v13 = vpack.c.bf16 %v1667_v43, %v1634_v37  ;;  %vm4739_vm14 = vcmp.eq.s32.totalorder %v1815_v42, 1  ;;  %vm4743_vm8 = vcmp.eq.s32.totalorder %v1848_v20, 1  ;;  %v1950_v58 = vrot.slane %v4691_v2, %v3541_v35  ;;  %vm5546_vm11 = vmpackc.low %vm5533_vm1, %vm5532_vm3 }
 0x3e4   : > { %v1970_v59 = vrot.slane %v4695_v53, %v3541_v35  ;;  %vm5542_vm0 = vcmask 506880   ;;  %v4761_v42 = vsel %vm1994_vm5, 1, %v5276_v46  ;;  %v4765_v20 = vsel %vm2027_vm12, 1, %v5276_v46  ;;  %vm2699_vm5 = vmpackc.low %vm4615_vm2, %vm4608_vm4 }
 0x3e5   : > { %v1732_v26 = vsel %vm5542_vm0, %v4354_v19, %v3023_v56  ;;  %vm5543_vm10 = vmmov %vm5542_vm0  ;;  %2694 = vmatprep.subr.msk.bf16.mxu1 %vm2693_vm7, %v2692_v13  ;;  %v3034_v45 = vunpack.i.h.bf16 %v3032_v60  ;;  %v3033_v8 = vunpack.i.l.bf16 %v3032_v60  ;;  %vm5544_vm0 = vcmask 515072   ;;  %v3057_v60 = vpop.permute.xlu1 %3056 }
 0x3e6   : > { %v1733_v44 = vsel %vm5543_vm10, %v3023_v56, %v3024_v61  ;;  %v1699_v19 = vsel %vm5544_vm0, %v4348_v32, %v3018_v47  ;;  %vm5545_vm10 = vmmov %vm5544_vm0  ;;  %2697 = vmatpush1.bf16.msk.msra.mxu1 %vm5546_vm11, %v2695_v14  ;;  %vm5547_vm12 = vnez %v5507_v36  ;;  %vm5548_vm15 = vnez %v5509_v48 }
 0x3e7   : > { %v1700_v18 = vsel %vm5545_vm10, %v3018_v47, %v3019_v39  ;;  %v2701_v1 = vpack.c.bf16 %v1732_v26, %v1699_v19  ;;  %vm4783_vm0 = vcmp.eq.s32.totalorder %v1885_v24, 1  ;;  %vm4787_vm3 = vcmp.eq.s32.totalorder %v1918_v0, 1 }
 0x3e8   : > { %v2698_v9 = vpack.c.bf16 %v1733_v44, %v1700_v18  ;;  %v5551_v29 = vmov 0  ;;  %v1946_v23 = vrot.slane %v4691_v2, %v3545_v38  ;;  %v1966_v55 = vrot.slane %v4695_v53, %v3545_v38  ;;  %v2092_v2 = vld [vmem:[#allocation4 + $0x27] ss:$8 sm:$0x3] }
 0x3e9   : > { %v5552_v29 = vsel %vm4787_vm3, 4294967295, %v5551_v29  ;;  %v3029_v6 = vunpack.i.h.bf16 %v3027_v3  ;;  %v3028_v15 = vunpack.i.l.bf16 %v3027_v3  ;;  %vm4795_vm1 = vcmp.eq.s32.totalorder %v1881_v25, 1 }
 0x3ea   : > { %v5553_v22 = vmov 0  ;;  %vm4799_vm10 = vcmp.eq.s32.totalorder %v1914_v30, 1  ;;  %v5555_v24 = vmov 0  ;;  %v2003_v0 = vrot.slane %v4761_v42, %v3541_v35  ;;  %2700 = vmatprep.subr.msk.bf16.mxu1 %vm2699_vm5, %v2698_v9  ;;  %vm5565_vm5 = vmpackc.low %vm5548_vm15, %vm5547_vm12  ;;  %v3047_v9 = vpop.permute.xlu0 %3046 }
 0x3eb   : > { %v5554_v22 = vsel %vm4795_vm1, 4294967295, %v5553_v22  ;;  %v5556_v24 = vsel %vm4799_vm10, 4294967295, %v5555_v24  ;;  %v2036_v61 = vrot.slane %v4765_v20, %v3541_v35  ;;  %v3044_v56 = vunpack.i.h.bf16 %v3042_v34  ;;  %2703 = vmatpush1.bf16.msk.msra.mxu1 %vm5565_vm5, %v2701_v1 }
 0x3ec   : > { %v3043_v62 = vunpack.i.l.bf16 %v3042_v34  ;;  %vm4812_vm11 = vcmp.eq.s32.totalorder %v1950_v58, 1  ;;  %vm4816_vm7 = vcmp.eq.s32.totalorder %v1970_v59, 1  ;;  %v5559_v43 = vmov 0  ;;  %v2125_v58 = vld [vmem:[#allocation4 + $0x30] ss:$8 sm:$0x3] }
 0x3ed   : > { %v5560_v43 = vsel %vm4816_vm7, 4294967295, %v5559_v43  ;;  %v1999_v10 = vrot.slane %v4761_v42, %v3545_v38  ;;  %vm5561_vm1 = vcmask 449536   ;;  %vm5563_vm4 = vcmask 457728  }
 0x3ee   : > { %v1798_v37 = vsel %vm5561_vm1, %v4358_v51, %v3033_v8  ;;  %vm5562_vm3 = vmmov %vm5561_vm1  ;;  %v1765_v50 = vsel %vm5563_vm4, %v4352_v33, %v3028_v15  ;;  %vm5566_vm10 = vnez %v5521_v11  ;;  %vm5568_vm1 = vnez %v5525_v31  ;;  %v4920_v54 = vpop.permute.xlu0 %3051 }
 0x3ef   : > { %v1799_v40 = vsel %vm5562_vm3, %v3033_v8, %v3034_v45  ;;  %vm5564_vm2 = vmmov %vm5563_vm4  ;;  %v2707_v51 = vpack.c.bf16 %v1798_v37, %v1765_v50  ;;  %vm5567_vm3 = vnez %v5523_v7  ;;  %v2032_v33 = vrot.slane %v4765_v20, %v3545_v38 }
 0x3f0   : > { %v1766_v13 = vsel %vm5564_vm2, %v3028_v15, %v3029_v6  ;;  %vm2705_vm7 = vmpackc.low %vm5566_vm10, %vm4666_vm6  ;;  %v2949_v36 = vunpack.i.h.bf16 %v4366_v17  ;;  %v2948_v48 = vunpack.i.l.bf16 %v4366_v17  ;;  %v3039_v25 = vunpack.i.h.bf16 %v3037_v5 }
 0x3f1   : > { %v2704_v14 = vpack.c.bf16 %v1799_v40, %v1766_v13  ;;  %v3038_v30 = vunpack.i.l.bf16 %v3037_v5  ;;  %vm4845_vm12 = vcmp.eq.s32.totalorder %v1946_v23, 1  ;;  %v5569_v39 = vmov 0  ;;  %vm2711_vm10 = vmpackc.low %vm4731_vm9, %vm4724_vm13  ;;  %v5599_v13 = vld [vmem:[#allocation15_spill] sm:$0xff] }
 0x3f2   : > { %v5570_v39 = vsel %vm4845_vm12, 4294967295, %v5569_v39  ;;  %vm4849_vm15 = vcmp.eq.s32.totalorder %v1966_v55, 1  ;;  %v5571_v47 = vmov 0  ;;  %vm5573_vm5 = vcmask 392192  }
 0x3f3   : > { %v5572_v47 = vsel %vm4849_vm15, 4294967295, %v5571_v47  ;;  %v1864_v59 = vsel %vm5573_vm5, %v4362_v28, %v3043_v62  ;;  %vm5574_vm4 = vmmov %vm5573_vm5  ;;  %2706 = vmatprep.subr.msk.bf16.mxu1 %vm2705_vm7, %v2704_v14  ;;  %vm4861_vm2 = vcmp.eq.s32.totalorder %v2003_v0, 1  ;;  %vm4865_vm12 = vcmp.eq.s32.totalorder %v2036_v61, 1  ;;  %v2158_v28 = vld [vmem:[#allocation4 + $0x31] ss:$8 sm:$0x3] }
 0x3f4   : > { %v1865_v26 = vsel %vm5574_vm4, %v3043_v62, %v3044_v56  ;;  %vm5579_vm15 = vcmp.gt.f32.partialorder %v2059_v27, 0.0  ;;  %v3059_v45 = vunpack.i.h.bf16 %v3057_v60  ;;  %v3058_v8 = vunpack.i.l.bf16 %v3057_v60  ;;  %vm5582_vm7 = vmpackc.low %vm5568_vm1, %vm5567_vm3  ;;  %v4885_v27 = vpop.permute.xlu1 %3061  ;;  %v5595_v62 = vld [vmem:[#allocation14_spill] sm:$0xff]  ;;  %v5600_v60 = vld [vmem:[#allocation16_spill] sm:$0xff] }
 0x3f5   : > { %v4871_v42 = vsel %vm5579_vm15, 1, %v5276_v46  ;;  %vm5580_vm4 = vcmask 441344   ;;  %2709 = vmatpush1.bf16.msk.msra.mxu1 %vm5582_vm7, %v2707_v51  ;;  %vm2714_vm15 = vmpackc.low %vm4743_vm8, %vm4739_vm14  ;;  %vm5583_vm5 = vcmp.gt.f32.partialorder %v2092_v2, 0.0  ;;  %vm2126_vm3 = vcmp.gt.f32.partialorder %v2125_v58, 0.0 }
 0x3f6   : > { %v1831_v12 = vsel %vm5580_vm4, %v4356_v49, %v3038_v30  ;;  %vm5581_vm6 = vmmov %vm5580_vm4  ;;  %v4893_v49 = vsel %vm5583_vm5, 1, %v5276_v46  ;;  %vm5584_vm1 = vcmask 1039360   ;;  %v3049_v31 = vunpack.i.h.bf16 %v3047_v9 }
 0x3f7   : > { %v1832_v11 = vsel %vm5581_vm6, %v3038_v30, %v3039_v25  ;;  %v2713_v18 = vpack.c.bf16 %v1864_v59, %v1831_v12  ;;  %v1983_v7 = vsel %vm5584_vm1, %v2948_v48, %v2949_v36  ;;  %v3048_v1 = vunpack.i.l.bf16 %v3047_v9  ;;  %v2010_v25 = vpop.permute.xlu0 %2009 }
 0x3f8   : > { %v2710_v19 = vpack.c.bf16 %v1865_v26, %v1832_v11  ;;  %vm2159_vm4 = vcmp.gt.f32.partialorder %v2158_v28, 0.0  ;;  %v2954_v34 = vunpack.i.h.bf16 %v4376_v21  ;;  %v2953_v3 = vunpack.i.l.bf16 %v4376_v21  ;;  %v1977_v4 = vpop.permute.xlu1 %1976 }
 0x3f9   : > { %v2959_v23 = vunpack.i.h.bf16 %v4378_v41  ;;  %v2958_v55 = vunpack.i.l.bf16 %v4378_v41  ;;  %vm5585_vm6 = vcmask 375808   ;;  %vm5587_vm5 = vcmask 384000  }
 0x3fa   : > { %2712 = vmatprep.subr.msk.bf16.mxu1 %vm2711_vm10, %v2710_v19  ;;  %v1930_v6 = vsel %vm5585_vm6, %v4368_v57, %v3058_v8  ;;  %vm5586_vm7 = vmmov %vm5585_vm6  ;;  %v1897_v0 = vsel %vm5587_vm5, %v4360_v63, %v3048_v1  ;;  %vm5589_vm13 = vnez %v5552_v29  ;;  %vm5590_vm10 = vnez %v5554_v22 }
 0x3fb   : > { %v1931_v15 = vsel %vm5586_vm7, %v3058_v8, %v3059_v45  ;;  %vm5588_vm1 = vmmov %vm5587_vm5  ;;  %2715 = vmatpush1.bf16.msk.msra.mxu1 %vm2714_vm15, %v2713_v18  ;;  %v2719_v57 = vpack.c.bf16 %v1930_v6, %v1897_v0  ;;  %vm5591_vm6 = vnez %v5556_v24  ;;  %vm4926_vm5 = vcmp.eq.s32.totalorder %v1999_v10, 1  ;;  %v2076_v12 = vpop.permute.xlu0 %2075 }
 0x3fc   : > { %v1898_v21 = vsel %vm5588_vm1, %v3048_v1, %v3049_v31  ;;  %vm2717_vm9 = vmpackc.low %vm5589_vm13, %vm4783_vm0  ;;  %v2069_v16 = vrot.slane %v4871_v42, %v3541_v35  ;;  %vm5594_vm14 = vnez %v5560_v43  ;;  %v2102_v52 = vrot.slane %v4893_v49, %v3541_v35  ;;  %v2043_v29 = vpop.permute.xlu1 %2042  ;;  %v5606_v43 = vld [vmem:[#allocation13_spill] sm:$0xff] }
 0x3fd   : > { %v2716_v41 = vpack.c.bf16 %v1931_v15, %v1898_v21  ;;  %vm2723_vm8 = vmpackc.low %vm5594_vm14, %vm4812_vm11  ;;  %v2065_v61 = vrot.slane %v4871_v42, %v3545_v38  ;;  %v2127_v2 = vsel %vm2126_vm3, 1, %v5276_v46  ;;  %v2160_v56 = vsel %vm2159_vm4, 1, %v5276_v46 }
 0x3fe   : > { %v2722_v10 = vpack.c.bf16 %v1983_v7, %v5595_v62  ;;  %vm5596_vm15 = vcmask 1031168   ;;  %vm5597_vm1 = vcmask 982016   ;;  %vm5598_vm7 = vcmask 1039360   ;;  %vm5601_vm3 = vmpackc.low %vm5591_vm6, %vm5590_vm10  ;;  %v2357_v62 = vld [vmem:[%s3401_s19] sm:$0xff] }
 0x3ff   : > { %v2016_v37 = vsel %vm5596_vm15, %v2953_v3, %v2954_v34  ;;  %v2049_v40 = vsel %vm5597_vm1, %v2958_v55, %v2959_v23  ;;  %v1982_v50 = vsel %vm5598_vm7, %v1977_v4, %v2948_v48  ;;  %2718 = vmatprep.subr.msk.bf16.mxu1 %vm2717_vm9, %v2716_v41  ;;  %v2964_v14 = vunpack.i.h.bf16 %v5599_v13  ;;  %v2191_v48 = vld [vmem:[#allocation4 + $0x32] ss:$8 sm:$0x3]  ;;  %vm2729_vm11 = vmpackc.low %vm4865_vm12, %vm4861_vm2 }
 0x400   : > { %v2963_v51 = vunpack.i.l.bf16 %v5599_v13  ;;  %v2969_v5 = vunpack.i.h.bf16 %v5600_v60  ;;  %v2968_v36 = vunpack.i.l.bf16 %v5600_v60  ;;  %2721 = vmatpush1.bf16.msk.msra.mxu1 %vm5601_vm3, %v2719_v57  ;;  %vm5602_vm0 = vnez %v5570_v39  ;;  %vm5613_vm14 = vmmov %vm5597_vm1  ;;  %v2109_v8 = vpop.permute.xlu1 %2108 }
 0x401   : > { %2724 = vmatprep.subr.msk.bf16.mxu1 %vm2723_vm8, %v2722_v10  ;;  %vm5603_vm4 = vnez %v5572_v47  ;;  %vm4974_vm9 = vcmp.eq.s32.totalorder %v2032_v33, 1  ;;  %v2098_v22 = vrot.slane %v4893_v49, %v3545_v38  ;;  %v2135_v24 = vrot.slane %v2127_v2, %v3541_v35  ;;  %vm5614_vm8 = vmmov %vm5596_vm15 }
 0x402   : > { %vm2726_vm13 = vmpackc.low %vm5603_vm4, %vm5602_vm0  ;;  %v2168_v53 = vrot.slane %v2160_v56, %v3541_v35  ;;  %v2725_v30 = vpack.c.bf16 %v1982_v50, %v5606_v43  ;;  %vm4987_vm10 = vcmp.eq.s32.totalorder %v2069_v16, 1  ;;  %vm4991_vm6 = vcmp.eq.s32.totalorder %v2102_v52, 1 }
 0x403   : > { %vm4995_vm7 = vcmp.eq.s32.totalorder %v2065_v61, 1  ;;  %v2728_v59 = vpack.c.bf16 %v2049_v40, %v2016_v37  ;;  %v2048_v26 = vsel %vm5613_vm14, %v2043_v29, %v2958_v55  ;;  %v2015_v17 = vsel %vm5614_vm8, %v2010_v25, %v2953_v3  ;;  %vm2732_vm12 = vmpackc.low %vm4974_vm9, %vm4926_vm5  ;;  %v2142_v55 = vpop.permute.xlu0 %2141  ;;  %v2358_v40 = vld [vmem:[%s3401_s19 + $0x8] sm:$0xff]  ;;  %s2366_s19 = scalar_lea.sflag [#allocation6], %s3395_s26 }
 0x404   : > { %vm2192_vm15 = vcmp.gt.f32.partialorder %v2191_v48, 0.0  ;;  %vm5615_vm1 = vcmask 973824   ;;  %vm5616_vm2 = vcmask 965632   ;;  %v3054_v28 = vunpack.i.h.bf16 %v4920_v54  ;;  %2727 = vmatpush1.bf16.msk.msra.mxu1 %vm2726_vm13, %v2725_v30  ;;  %vm2735_vm5 = vmpackc.low %vm4991_vm6, %vm4987_vm10 }
 0x405   : > { %v2082_v44 = vsel %vm5615_vm1, %v2963_v51, %v2964_v14  ;;  %v2115_v42 = vsel %vm5616_vm2, %v2968_v36, %v2969_v5  ;;  %v3053_v45 = vunpack.i.l.bf16 %v4920_v54  ;;  %2730 = vmatprep.subr.msk.bf16.mxu1 %vm2729_vm11, %v2728_v59  ;;  %vm5014_vm3 = vcmp.eq.s32.totalorder %v2098_v22, 1  ;;  %vm5623_vm0 = vmmov %vm5616_vm2 }
 0x406   : > { %vm5018_vm14 = vcmp.eq.s32.totalorder %v2135_v24, 1  ;;  %vm5022_vm8 = vcmp.eq.s32.totalorder %v2168_v53, 1  ;;  %v2131_v47 = vrot.slane %v2127_v2, %v3545_v38  ;;  %v3064_v18 = vunpack.i.h.bf16 %v4885_v27  ;;  %vm5624_vm4 = vmmov %vm5615_vm1  ;;  %v2221_v2 = vld [vmem:[%s5119_s4] sm:$0xff] }
 0x407   : > { %v3063_v9 = vunpack.i.l.bf16 %v4885_v27  ;;  %v2731_v49 = vpack.c.bf16 %v2048_v26, %v2015_v17  ;;  %v2164_v7 = vrot.slane %v2160_v56, %v3545_v38  ;;  %v2734_v31 = vpack.c.bf16 %v2115_v42, %v2082_v44  ;;  %v2175_v27 = vpop.permute.xlu1 %2174  ;;  %vm2738_vm9 = vmpackc.low %vm5014_vm3, %vm4995_vm7  ;;  %v2210_v54 = vpop.permute.xlu0 %2209 }
 0x408   : > { %v2114_v1 = vsel %vm5623_vm0, %v2109_v8, %v2968_v36  ;;  %v2081_v34 = vsel %vm5624_vm4, %v2076_v12, %v2963_v51  ;;  %v2193_v3 = vsel %vm2192_vm15, 1, %v5276_v46  ;;  %vm5625_vm13 = vcmask 916480   ;;  %vm2741_vm6 = vmpackc.low %vm5022_vm8, %vm5018_vm14 }
 0x409   : > { %v2148_v23 = vsel %vm5625_vm13, %v3053_v45, %v3054_v28  ;;  %2733 = vmatpush1.bf16.msk.msra.mxu1 %vm2732_vm12, %v2731_v49  ;;  %vm5043_vm11 = vcmp.eq.s32.totalorder %v2131_v47, 1  ;;  %vm5628_vm10 = vcmask 908288   ;;  %v2737_v0 = vpack.c.bf16 %v2114_v1, %v2081_v34  ;;  %vm5630_vm2 = vmmov %vm5625_vm13 }
 0x40a   : > { %2736 = vmatprep.subr.msk.bf16.mxu1 %vm2735_vm5, %v2734_v31  ;;  %v2181_v15 = vsel %vm5628_vm10, %v3063_v9, %v3064_v18  ;;  %vm2169_vm15 = vcmp.eq.s32.totalorder %v2164_v7, 1  ;;  %v2201_v46 = vrot.slane %v2193_v3, %v3541_v35  ;;  %vm5629_vm1 = vmmov %vm5628_vm10  ;;  %v2147_v57 = vsel %vm5630_vm2, %v2142_v55, %v3053_v45 }
 0x40b   : > { %v2740_v21 = vpack.c.bf16 %v2181_v15, %v2148_v23  ;;  %v2180_v41 = vsel %vm5629_vm1, %v2175_v27, %v3063_v9  ;;  %v2212_v4 = vpop.permute.xlu1 %2211  ;;  %vm2744_vm7 = vmpackc.low %vm2169_vm15, %vm5043_vm11  ;;  %v2197_v63 = vrot.slane %v2193_v3, %v3545_v38  ;;  %vm5631_vm3 = vcmask 900096   ;;  %v2208_v52 = vpop.permute.xlu0 %2207 }
 0x40c   : > { %v2743_v16 = vpack.c.bf16 %v2180_v41, %v2147_v57  ;;  %vm2203_vm12 = vcmp.eq.s32.totalorder %v2201_v46, 1  ;;  %v2214_v35 = vsel %vm5631_vm3, %v2210_v54, %v2212_v4  ;;  %vm5632_vm8 = vmmov %vm5631_vm3 }
 0x40d   : > { %2739 = vmatpush1.bf16.msk.msra.mxu1 %vm2738_vm9, %v2737_v0  ;;  %vm2202_vm14 = vcmp.eq.s32.totalorder %v2197_v63, 1  ;;  %v2213_v61 = vsel %vm5632_vm8, %v2208_v52, %v2210_v54 }
 0x40e   : > { %2742 = vmatprep.subr.msk.bf16.mxu1 %vm2741_vm6, %v2740_v21 }
 0x40f   : > { %v2281_v38 = vpop.permute.xlu1 %2280 }
 0x411   : > { %2745 = vmatpush1.bf16.msk.msra.mxu1 %vm2744_vm7, %v2743_v16 }
 0x412   : > { %2588 = vmatprep.subr.msk.mxu1 %vm2203_vm12, %v2214_v35 }
 0x415   : > { %2589 = vmatpush1.msk.msra.mxu1 %vm2202_vm14, %v2213_v61 }
 0x416   : > { %2351 = vmatmul.mubr.f32.vlgmr.msra.gmra.mrb[0].mxu1 %v2221_v2 }
 0x4e9   : > { %v2352_v56 = vpop.f32.mrb[0].mxu1 }
 0x4ea   : > { %v2353_v10 = vadd.f32 %v2352_v56, %v2281_v38  ;;  %v2354_v37 = vpop.f32.mrb[1].mxu1 }
 0x4eb   : > { %v2355_v50 = vadd.f32 %v2354_v37, %v2281_v38 }
 0x4ec   : > { %v2359_v13 = vadd.f32 %v2357_v62, %v2353_v10 }
 0x4ed   : > { %v2360_v14 = vadd.f32 %v2358_v40, %v2355_v50 }
 0x4ee   : > { %v2361_v51 = vmax.f32 %v2359_v13, 0.0 }
 0x4ef   : > { %v2362_v60 = vmax.f32 %v2360_v14, 0.0 }
 0x4f0   : > { %2363 = vst [vmem:[%s282_s16] sm:$0xff] %v2361_v51 }
 0x4f1   : > { %2364 = vst [vmem:[%s282_s16 + $0x8] sm:$0xff] %v2362_v60 }
 0x4f2   : > { %3137 = shalt.err (!%p3134_p7)
}
 0x4f3   : > { %s3138_s26 = scalar_lea.hbm %s5071_s30, 256  ;;  %s3142_s3 = scalar_lea.hbm %s5121_s6, 512 }
 0x4f4   : > { %p3139_p9 = scmp.ne.s32.totalorder %s5071_s30, %s3138_s26  ;;  %p3143_p0 = scmp.lt.u32.totalorder %s5071_s30, %s5121_s6 }
 0x4f5   : > { %p3144_p1 = scmp.lt.u32.totalorder %s3142_s3, %s3138_s26  ;;  %p3146_p4 = scmp.lt.u32.totalorder %s3138_s26, %s5071_s30 }
 0x4f6   : > { %p3140_p2 = pnand %p3139_p9, %p3346_p12 }
 0x4f7   : > { %p3145_p11 = por %p3144_p1, %p3143_p0 }
 0x4f8   : > { %p3141_p5 = pneg %p3140_p2 }
 0x4f9   : > { %p3147_p6 = por %p3146_p4, %p3145_p11 }
 0x4fb   : > { %p3148_p8 = pnand %p3147_p6, %p3141_p5 }
 0x4fd   : > { %3151 = shalt.err (!%p3148_p8)
}
 0x4fe   : > { %2752 = dma.vmem_to_hbm [thread:$0]  (%p3346_p12), %s5073_s8, 256, %s5071_s30, %s2366_s19  }
 0x4ff PF: > { %s2392_s29 = sand.u32 1, %s3182_s21   ;;  %p5634_p10 = scmp.ne.s32.totalorder %s5212_s28, 0 }
 0x500   : > { %p5635_p13 = scmp.ge.s32.totalorder %s3194_s24, 2  ;;  %s2393_s27 = scalar_lea.sflag [#allocation6], %s2392_s29 }
 0x502   : > { %p2763_p3 = pnand %p5635_p13, %p5634_p10 }
 0x504   : > { %3177 = dma.done.wait (!%p2763_p3), %s2393_s27, 256  }
 0x505   : > { %3179 = vsyncadd (!%p2763_p3), %s2393_s27, 4294967040  ;;  %p20_p7 = scmp.ge.s32.totalorder %s3311_s9, 4   ;;  %s5636_s21 = smov %s3186_s22 }
 0x506   : > { %s5637_s22 = smov %s3190_s23  ;;  %s5638_s23 = smov %s3342_s13 }
 0x507   : > { %s5639_s24 = smov %s3311_s9  ;;  %22 = sbr.rel (!%p20_p7) target bundleno = 11 (0xb), region = 120 }
 0x50e   :  { %2398 = vsyncpa [#allocation5], 1 }
 0x50f   :  { %2400 = vsyncpa [#allocation5 + $0x1], 1 }
 0x510   :  { %2401 = vsyncpa [#allocation8], 1 }
 0x511   :  { %2403 = vsyncpa [#allocation8 + $0x1], 1 }
 0x512   :  { %2404 = vsyncpa [#allocation6], 1 }
 0x513   :  { %2406 = vsyncpa [#allocation6 + $0x1], 1 }

</bundles_post_ra>
